<compile_context>
chip_gen: v6e
topology: v6e:2x2x1
jax: 0.10.0
libtpu: 0.0.40
codegen_flags: <defaults>
</compile_context>

<pallas_src>
import math
import functools

import numpy as np
import jax
import jax.numpy as jnp
from jax import lax
from jax.experimental import pallas as pl
from jax.experimental.pallas import tpu as pltpu

IGNORE_INDEX = -100


def _round_up(x, m):
    return ((x + m - 1) // m) * m


def _tpu_kind():
    try:
        return jax.devices()[0].device_kind.lower()
    except Exception:
        return ""


def _default_tiles():
    """Gen-aware (tm, tv, vmem_limit_bytes)."""
    kind = _tpu_kind()
    if "v6" in kind:
        # v6e roofline crossover ~660 FLOP/B -> tm=1024 makes the streamed
        # weight MXU-bound; 128 MiB physical VMEM, so raise the scoped limit.
        return 1024, 512, 64 * 1024 * 1024
    if "7" in kind:
        # v7x: tm=512 already above the ~310 FLOP/B per-TC crossover; tv=1024
        # halves inner-step overhead.  Only 64 MiB physical VMEM -> <=56 MiB.
        return 512, 1024, 56 * 1024 * 1024
    # v5e (and unknown): already MXU-bound at 512; explicit limit is mandatory
    # (scoped default 16 MiB < ~18 MiB working set).
    return 512, 512, 48 * 1024 * 1024


def _output_layer_kernel(h_ref, w_ref, ll_ref, bias_ref, out_ref, acc_sc,
                         *, logit_scale, softcap, add_bias):
    """One (token-tile, vocab-tile) step of the online-LSE output layer."""
    j = pl.program_id(1)
    tm = h_ref.shape[0]

    @pl.when(j == 0)
    def _init():
        # packed scratch columns: [running max, sum(e), sum(e*logits), rank]
        acc_sc[...] = jnp.concatenate(
            [jnp.full((tm, 1), -1e30, jnp.float32),
             jnp.zeros((tm, 3), jnp.float32)], axis=-1)

    # (tm, H) x (tv, H), contracting on H -> (tm, tv); MXU, operands stay in
    # the input dtype (bf16 in prod), f32 accumulation.
    logits = lax.dot_general(
        h_ref[...], w_ref[...], dimension_numbers=(((1,), (1,)), ((), ())),
        preferred_element_type=jnp.float32)

    # logit_scale on the f32 logits post-matmul (tm*tv elems, ~H/tv x fewer
    # VPU ops than re-scaling the (tm, H) hidden tile every vocab step);
    # folded into the 1/softcap factor when softcapping is on -> free.
    if softcap is not None and softcap > 0:
        # TODO(synk): with softcap on, tanh+exp push ~2*tm*tv transcendentals
        # per step through the single EUP slot; profile for EUP saturation on
        # v6e/v7x before enlarging tiles further.
        logits = jnp.tanh(logits * jnp.float32(logit_scale / softcap)) * jnp.float32(softcap)
    elif logit_scale != 1.0:
        logits = logits * jnp.float32(logit_scale)

    if add_bias:
        # Precomputed additive bias: 0 for real vocab columns, -1e30 for the
        # zero-padded tail.  One broadcast add replaces iota+cmp+select/step.
        logits = logits + bias_ref[...]

    label_logit = ll_ref[...]                     # (tm, 1) f32, host-precomputed

    acc = acc_sc[...]                             # single full-width (tm, 4) load
    m_old = acc[:, 0:1]
    s_old = acc[:, 1:2]
    el_old = acc[:, 2:3]
    rk_old = acc[:, 3:4]

    # Online softmax / LSE / entropy-numerator / rank accumulation.
    m_new = jnp.maximum(m_old, jnp.max(logits, axis=-1, keepdims=True))
    alpha = jnp.exp(m_old - m_new)
    e = jnp.exp(logits - m_new)
    s_new = alpha * s_old + jnp.sum(e, axis=-1, keepdims=True)
    el_new = alpha * el_old + jnp.sum(e * logits, axis=-1, keepdims=True)
    rk_new = rk_old + jnp.sum((logits > label_logit).astype(jnp.float32),
                              axis=-1, keepdims=True)
    acc_sc[...] = jnp.concatenate([m_new, s_new, el_new, rk_new], axis=-1)

    @pl.when(j == pl.num_programs(1) - 1)
    def _finalize():
        lse = m_new + jnp.log(s_new)
        # NOTE: tokens with label == -100 (and zero-padded tokens) produce
        # garbage-but-finite ce/rank here; they are masked out by the caller.
        ce = lse - label_logit                    # Fast_CrossEntropyLoss
        # Exact divide (runs once per token tile -> negligible; avoids the
        # ~1e-3 error of the approximate EUP reciprocal).
        entropy = lse - el_new / s_new            # Categorical entropy
        stats = jnp.concatenate(
            [ce, entropy, rk_new, jnp.zeros((tm, 5), jnp.float32)], axis=-1)  # (tm, 8)
        out_ref[...] = stats.T                    # lane-dense (8, tm) store


def _per_token_stats(flat_h, weight, label_logit, col_bias, *, logit_scale,
                     softcap, add_bias, tm, tv, vmem_limit):
    n_pad, hidden = flat_h.shape
    v_pad = weight.shape[0]
    kernel = functools.partial(
        _output_layer_kernel, logit_scale=float(logit_scale),
        softcap=softcap, add_bias=add_bias)

    def run(single_buffer_resident):
        # h and label_logit block indices are constant along the inner vocab
        # axis, so double-buffering them only burns VMEM; request single
        # buffering when supported.
        res_kw = ({"pipeline_mode": pl.Buffered(1)}
                  if single_buffer_resident else {})
        return pl.pallas_call(
            kernel,
            out_shape=jax.ShapeDtypeStruct((8, n_pad), jnp.float32),
            grid_spec=pltpu.PrefetchScalarGridSpec(
                num_scalar_prefetch=0,
                grid=(n_pad // tm, v_pad // tv),                   # vocab axis last
                in_specs=[
                    pl.BlockSpec((tm, hidden), lambda i, j: (i, 0), **res_kw),
                    pl.BlockSpec((tv, hidden), lambda i, j: (j, 0)),  # streamed [V,H] weight
                    pl.BlockSpec((tm, 1), lambda i, j: (i, 0), **res_kw),
                    pl.BlockSpec((1, tv), lambda i, j: (0, j)),       # vocab-pad bias
                ],
                out_specs=pl.BlockSpec((8, tm), lambda i, j: (0, i)),  # lane-dense slab
                scratch_shapes=[pltpu.VMEM((tm, 4), jnp.float32)],     # packed accumulators
            ),
            compiler_params=pltpu.CompilerParams(
                dimension_semantics=("parallel", "arbitrary"),
                vmem_limit_bytes=vmem_limit),
        )(flat_h, weight, label_logit, col_bias)

    try:
        return run(True)
    except Exception:
        # pipeline_mode=pl.Buffered(1) unsupported on this jax version ->
        # fall back to default double buffering (correct, slightly more VMEM).
        return run(False)


def output_layer_forward(hidden_states, labels, lm_head_weight, *,
                         logit_scale=1.0, loss_type="cross_entropy_loss",
                         focal_loss_gamma=0.0, logit_softcapping=None,
                         tm=None, tv=None, host_gather=True):
    B, T, H = hidden_states.shape
    V, H2 = lm_head_weight.shape
    assert H == H2
    loss_type = loss_type.lower()
    if loss_type == "cross_entropy_loss" and focal_loss_gamma != 0:
        raise ValueError("focal_loss_gamma can't be used with 'cross_entropy_loss'")
    if loss_type == "exponentiated_cross_entropy_loss" and focal_loss_gamma == 0:
        raise ValueError("exponentiated_cross_entropy_loss requires focal_loss_gamma != 0")

    # labels = hstack(labels[..., 1:], -100)  (predict next token; last pos ignored)
    extra = jnp.full((B, 1), IGNORE_INDEX, dtype=labels.dtype)
    shifted = jnp.concatenate([labels[:, 1:], extra], axis=1)

    N = B * T
    flat_h = hidden_states.reshape(N, H)            # keep input dtype (bf16 in prod)
    flat_lab = shifted.reshape(N).astype(jnp.int32)

    # Per-token label logit: gather the label rows in the WEIGHT'S dtype and
    # do the dot with f32 accumulation (same numeric path as the kernel's MXU
    # logits -> consistent strict '>' rank comparison; no (N, H) f32 copies).
    lab_clip = jnp.clip(flat_lab, 0, V - 1)
    w_rows = jnp.take(lm_head_weight, lab_clip, axis=0)              # (N, H), weight dtype
    label_logit = jnp.einsum('nh,nh->n', flat_h, w_rows,
                             preferred_element_type=jnp.float32)[:, None]  # (N, 1) f32
    if logit_scale != 1.0:
        label_logit = label_logit * jnp.float32(logit_scale)
    if logit_softcapping is not None and logit_softcapping > 0:
        label_logit = jnp.tanh(label_logit / logit_softcapping) * logit_softcapping

    # Gen-aware tile sizes / VMEM limit; clamp to (rounded-up) problem size.
    tm_d, tv_d, vmem_limit = _default_tiles()
    tm = tm_d if tm is None else tm
    tv = tv_d if tv is None else tv
    tm_eff = min(_round_up(tm, 128), _round_up(N, 128))
    tv_eff = min(_round_up(tv, 128), _round_up(V, 128))
    n_pad = _round_up(N, tm_eff)
    v_pad = _round_up(V, tv_eff)
    # NOTE(megacore): with the token axis "parallel", an odd tile count only
    # leaves a 1-tile imbalance; padding to an even count does not improve the
    # two-core makespan (ceil(n/2) is unchanged), so we don't add junk tiles.

    if n_pad != N:
        flat_h = jnp.pad(flat_h, ((0, n_pad - N), (0, 0)))
        label_logit = jnp.pad(label_logit, ((0, n_pad - N), (0, 0)))
    weight = lm_head_weight
    if v_pad != V:
        weight = jnp.pad(weight, ((0, v_pad - V), (0, 0)))

    # Additive vocab-padding bias: 0 for real columns, -1e30 for padded ones.
    col_bias = jnp.where(jnp.arange(v_pad) < V, 0.0, -1e30).astype(jnp.float32)[None, :]
    add_bias = (v_pad != V)

    out = _per_token_stats(flat_h, weight, label_logit, col_bias,
                           logit_scale=logit_scale, softcap=logit_softcapping,
                           add_bias=add_bias, tm=tm_eff, tv=tv_eff,
                           vmem_limit=vmem_limit)

    ce_all = out[0, :N]
    ent_all = out[1, :N]
    rank_all = out[2, :N]
    mask = (flat_lab >= 0).astype(jnp.float32)
    n_valid = jnp.sum(mask)

    if loss_type == "cross_entropy_loss":
        per_tok_loss = ce_all
    elif loss_type == "focal_loss":
        p = jnp.exp(-ce_all)
        per_tok_loss = (1.0 - p) ** focal_loss_gamma * ce_all
    elif loss_type == "inverse_focal_loss":
        p = jnp.exp(-ce_all)
        per_tok_loss = (1.0 + p) ** focal_loss_gamma * ce_all
    elif loss_type == "exponentiated_cross_entropy_loss":
        per_tok_loss = ce_all ** focal_loss_gamma / focal_loss_gamma
    else:
        # TODO(synk): 'focal_loss_star' (CE on gamma-scaled logits) and 'dpo'
        # (needs reference-model state across calls) are not implemented.
        raise NotImplementedError(loss_type)

    loss = jnp.sum(jnp.where(mask > 0, per_tok_loss, 0.0)) / n_valid

    log_vocab = math.log(V)
    log_likelihood = jnp.sum(jnp.where(mask > 0, ce_all, 0.0)) / n_valid
    mcfaddens_pseudo_r2 = 1.0 - log_likelihood / log_vocab
    accuracies = tuple(
        jnp.sum(jnp.where(mask > 0, (rank_all < k).astype(jnp.float32), 0.0)) / n_valid
        for k in (1, 5, 20))

    if host_gather:
        # Data-dependent boolean gather (variable-length loss_unreduced /
        # entropy) has no fixed-shape in-kernel equivalent; done host-side.
        # TODO(synk): forces a device->host sync — pass host_gather=False
        # inside jit'd training steps to get dense masked arrays instead.
        mask_np = np.asarray(mask) > 0
        loss_unreduced = np.asarray(per_tok_loss)[mask_np]
        entropy = np.asarray(ent_all)[mask_np]
    else:
        loss_unreduced = jnp.where(mask > 0, per_tok_loss, 0.0)
        entropy = jnp.where(mask > 0, ent_all, 0.0)
    normalised_entropy = entropy / log_vocab

    return (loss, loss_unreduced, entropy, normalised_entropy,
            log_likelihood, mcfaddens_pseudo_r2, *accuracies)


def _reference_loss(hidden_states, labels, w, logit_scale, softcap):
    """Pure-JAX reference for sanity checking the kernel."""
    B, T, H = hidden_states.shape
    V = w.shape[0]
    h = hidden_states.reshape(-1, H) * logit_scale
    logits = h @ w.T
    if softcap is not None and softcap > 0:
        logits = jnp.tanh(logits / softcap) * softcap
    extra = jnp.full((B, 1), IGNORE_INDEX, labels.dtype)
    lab = jnp.concatenate([labels[:, 1:], extra], 1).reshape(-1)
    mask = (lab >= 0).astype(jnp.float32)
    lse = jax.scipy.special.logsumexp(logits, axis=-1)
    label_logit = jnp.take_along_axis(
        logits, jnp.clip(lab, 0, V - 1)[:, None], axis=-1)[:, 0]
    ce = lse - jnp.where(mask > 0, label_logit, 0.0)
    p = jax.nn.softmax(logits, -1)
    ent = lse - jnp.sum(p * logits, axis=-1)
    loss = jnp.sum(ce * mask) / jnp.sum(mask)
    top1 = jnp.sum((jnp.argmax(logits, -1) == lab).astype(jnp.float32) * mask) / jnp.sum(mask)
    return loss, ent, top1, mask


if __name__ == "__main__":
    key = jax.random.PRNGKey(0)
    B, T, H, V = 2, 8, 32, 256
    k1, k2, k3 = jax.random.split(key, 3)

    hidden_states = jax.random.normal(k1, (B, T, H), jnp.float32)
    labels = jax.random.randint(k2, (B, T), 0, V, jnp.int32)
    # deterministic nn.Linear-style init for the lm_head weight [V, H], bias-free
    bound = 1.0 / math.sqrt(H)
    lm_head_weight = jax.random.uniform(k3, (V, H), jnp.float32, -bound, bound)

    # exercise plain / softcap paths and the folded logit_scale path
    for logit_scale, softcap in ((1.0, None), (0.5, 30.0)):
        outputs = output_layer_forward(
            hidden_states, labels, lm_head_weight,
            logit_scale=logit_scale, loss_type="cross_entropy_loss",
            focal_loss_gamma=0.0, logit_softcapping=softcap)

        (loss, loss_unreduced, entropy, normalised_entropy,
         log_likelihood, mcfaddens_pseudo_r2, acc1, acc5, acc20) = outputs
        jax.block_until_ready(loss)

        ref_loss, ref_ent_all, ref_top1, ref_mask = _reference_loss(
            hidden_states, labels, lm_head_weight, logit_scale, softcap)
        ref_loss = float(jax.block_until_ready(ref_loss))
        ref_ent = np.asarray(ref_ent_all)[np.asarray(ref_mask) > 0]

        assert np.allclose(float(loss), ref_loss, rtol=1e-4, atol=1e-4), \
            (float(loss), ref_loss)
        assert np.allclose(entropy, ref_ent, rtol=1e-3, atol=1e-3)
        assert np.allclose(float(acc1), float(ref_top1), rtol=1e-6, atol=1e-6)
        assert np.isfinite(float(mcfaddens_pseudo_r2))
        assert loss_unreduced.shape == entropy.shape == normalised_entropy.shape

    print("KERNEL_OK")
</pallas_src>

<mosaic_0001>
module attributes {stable_mosaic.version = 11 : i64} {
  func.func @_output_layer_kernel(%arg0: i32, %arg1: i32, %arg2: memref<128x32xf32, #tpu.memory_space<vmem>>, %arg3: memref<256x32xf32, #tpu.memory_space<vmem>>, %arg4: memref<128x1xf32, #tpu.memory_space<vmem>>, %arg5: memref<1x256xf32, #tpu.memory_space<vmem>>, %arg6: memref<8x128xf32, #tpu.memory_space<vmem>>, %arg7: memref<128x4xf32, #tpu.memory_space<vmem>>) attributes {dimension_semantics = [#tpu.dimension_semantics<parallel>, #tpu.dimension_semantics<arbitrary>], iteration_bounds = array<i64: 1, 1>, scalar_prefetch = 0 : i64, scratch_operands = 1 : i64, tpu.core_type = #tpu.core_type<tc>, window_params = [{pipeline_mode = #tpu.pipeline_mode<synchronous>, transform_indices = @transform_0, window_bounds = array<i64: 128, 32>}, {transform_indices = @transform_1, window_bounds = array<i64: 256, 32>}, {pipeline_mode = #tpu.pipeline_mode<synchronous>, transform_indices = @transform_2, window_bounds = array<i64: 128, 1>}, {transform_indices = @transform_3, window_bounds = array<i64: 1, 256>}, {transform_indices = @transform_4, window_bounds = array<i64: 8, 128>}]} {
    %c0_i32 = arith.constant 0 : i32
    %0 = arith.cmpi eq, %arg1, %c0_i32 : i32
    %1 = arith.extui %0 : i1 to i32
    %c0_i32_0 = arith.constant 0 : i32
    %2 = arith.cmpi ne, %1, %c0_i32_0 : i32
    scf.if %2 {
      %cst_16 = arith.constant -1.000000e+30 : f32
      %41 = vector.broadcast %cst_16 : f32 to vector<128x1xf32>
      %cst_17 = arith.constant 0.000000e+00 : f32
      %42 = vector.broadcast %cst_17 : f32 to vector<128x3xf32>
      %43 = tpu.concatenate %41, %42 in 1 : vector<128x1xf32>, vector<128x3xf32> -> vector<128x4xf32>
      %c0_18 = arith.constant 0 : index
      %c0_19 = arith.constant 0 : index
      %44 = vector.load %arg7[%c0_18, %c0_19] : memref<128x4xf32, #tpu.memory_space<vmem>>, vector<128x4xf32>
      tpu.vector_store %arg7[%c0_18, %c0_19], %43 {strides = array<i32>} : memref<128x4xf32, #tpu.memory_space<vmem>>, vector<128x4xf32>,
    } else {
    }
    %c0 = arith.constant 0 : index
    %c0_1 = arith.constant 0 : index
    %3 = vector.load %arg2[%c0, %c0_1] : memref<128x32xf32, #tpu.memory_space<vmem>>, vector<128x32xf32>
    %c0_2 = arith.constant 0 : index
    %c0_3 = arith.constant 0 : index
    %4 = vector.load %arg3[%c0_2, %c0_3] : memref<256x32xf32, #tpu.memory_space<vmem>>, vector<256x32xf32>
    %cst = arith.constant dense<0.000000e+00> : vector<128x256xf32>
    %5 = tpu.matmul %3, %4, %cst {dimension_numbers = #tpu.dot_dimension_numbers<[1], [1], [0], [0], [0, 0, 1, 0], [], []>} : vector<128x32xf32>, vector<256x32xf32>, vector<128x256xf32> -> vector<128x256xf32>
    %c0_4 = arith.constant 0 : index
    %c0_5 = arith.constant 0 : index
    %6 = vector.load %arg4[%c0_4, %c0_5] : memref<128x1xf32, #tpu.memory_space<vmem>>, vector<128x1xf32>
    %c0_6 = arith.constant 0 : index
    %c0_7 = arith.constant 0 : index
    %7 = vector.load %arg7[%c0_6, %c0_7] : memref<128x4xf32, #tpu.memory_space<vmem>>, vector<128x4xf32>
    %8 = vector.extract_strided_slice %7 {offsets = [0, 0], sizes = [128, 1], strides = [1, 1]} : vector<128x4xf32> to vector<128x1xf32>
    %9 = vector.extract_strided_slice %7 {offsets = [0, 1], sizes = [128, 1], strides = [1, 1]} : vector<128x4xf32> to vector<128x1xf32>
    %10 = vector.extract_strided_slice %7 {offsets = [0, 2], sizes = [128, 1], strides = [1, 1]} : vector<128x4xf32> to vector<128x1xf32>
    %11 = vector.extract_strided_slice %7 {offsets = [0, 3], sizes = [128, 1], strides = [1, 1]} : vector<128x4xf32> to vector<128x1xf32>
    %cst_8 = arith.constant dense<0xFF800000> : vector<128xf32>
    %12 = vector.multi_reduction <maximumf>, %5, %cst_8 [1] : vector<128x256xf32> to vector<128xf32>
    %13 = vector.shape_cast %12 : vector<128xf32> to vector<128x1xf32>
    %14 = arith.maximumf %8, %13 : vector<128x1xf32>
    %15 = arith.subf %8, %14 : vector<128x1xf32>
    %16 = math.exp %15 : vector<128x1xf32>
    %17 = vector.broadcast %14 : vector<128x1xf32> to vector<128x256xf32>
    %18 = arith.subf %5, %17 : vector<128x256xf32>
    %19 = math.exp %18 : vector<128x256xf32>
    %20 = arith.mulf %16, %9 : vector<128x1xf32>
    %cst_9 = arith.constant dense<0.000000e+00> : vector<128xf32>
    %21 = vector.multi_reduction <add>, %19, %cst_9 [1] : vector<128x256xf32> to vector<128xf32>
    %22 = vector.shape_cast %21 : vector<128xf32> to vector<128x1xf32>
    %23 = arith.addf %20, %22 : vector<128x1xf32>
    %24 = arith.mulf %16, %10 : vector<128x1xf32>
    %25 = arith.mulf %19, %5 : vector<128x256xf32>
    %cst_10 = arith.constant dense<0.000000e+00> : vector<128xf32>
    %26 = vector.multi_reduction <add>, %25, %cst_10 [1] : vector<128x256xf32> to vector<128xf32>
    %27 = vector.shape_cast %26 : vector<128xf32> to vector<128x1xf32>
    %28 = arith.addf %24, %27 : vector<128x1xf32>
    %29 = vector.broadcast %6 : vector<128x1xf32> to vector<128x256xf32>
    %30 = arith.cmpf ogt, %5, %29 : vector<128x256xf32>
    %31 = arith.extui %30 : vector<128x256xi1> to vector<128x256xi32>
    %32 = arith.sitofp %31 : vector<128x256xi32> to vector<128x256xf32>
    %cst_11 = arith.constant dense<0.000000e+00> : vector<128xf32>
    %33 = vector.multi_reduction <add>, %32, %cst_11 [1] : vector<128x256xf32> to vector<128xf32>
    %34 = vector.shape_cast %33 : vector<128xf32> to vector<128x1xf32>
    %35 = arith.addf %11, %34 : vector<128x1xf32>
    %36 = tpu.concatenate %14, %23, %28, %35 in 1 : vector<128x1xf32>, vector<128x1xf32>, vector<128x1xf32>, vector<128x1xf32> -> vector<128x4xf32>
    %c0_12 = arith.constant 0 : index
    %c0_13 = arith.constant 0 : index
    %37 = vector.load %arg7[%c0_12, %c0_13] : memref<128x4xf32, #tpu.memory_space<vmem>>, vector<128x4xf32>
    tpu.vector_store %arg7[%c0_12, %c0_13], %36 {strides = array<i32>} : memref<128x4xf32, #tpu.memory_space<vmem>>, vector<128x4xf32>,
    %c0_i32_14 = arith.constant 0 : i32
    %38 = arith.cmpi eq, %arg1, %c0_i32_14 : i32
    %39 = arith.extui %38 : i1 to i32
    %c0_i32_15 = arith.constant 0 : i32
    %40 = arith.cmpi ne, %39, %c0_i32_15 : i32
    scf.if %40 {
      %41 = math.log %23 : vector<128x1xf32>
      %42 = arith.addf %14, %41 : vector<128x1xf32>
      %43 = arith.subf %42, %6 : vector<128x1xf32>
      %44 = arith.divf %28, %23 : vector<128x1xf32>
      %45 = arith.subf %42, %44 : vector<128x1xf32>
      %cst_16 = arith.constant 0.000000e+00 : f32
      %46 = vector.broadcast %cst_16 : f32 to vector<128x5xf32>
      %47 = tpu.concatenate %43, %45, %35, %46 in 1 : vector<128x1xf32>, vector<128x1xf32>, vector<128x1xf32>, vector<128x5xf32> -> vector<128x8xf32>
      %48 = tpu.transpose %47, [1, 0] : vector<128x8xf32> -> vector<8x128xf32>
      %c0_17 = arith.constant 0 : index
      %c0_18 = arith.constant 0 : index
      %49 = vector.load %arg6[%c0_17, %c0_18] : memref<8x128xf32, #tpu.memory_space<vmem>>, vector<8x128xf32>
      tpu.vector_store %arg6[%c0_17, %c0_18], %48 {strides = array<i32>} : memref<8x128xf32, #tpu.memory_space<vmem>>, vector<8x128xf32>,
    } else {
    }
    return
  }
  func.func @transform_0(%arg0: i32, %arg1: i32) -> (i32, i32) {
    %c0_i32 = arith.constant 0 : i32
    %c0_i32_0 = arith.constant 0 : i32
    return %arg0, %c0_i32 : i32, i32
  }
  func.func @transform_1(%arg0: i32, %arg1: i32) -> (i32, i32) {
    %c0_i32 = arith.constant 0 : i32
    %c0_i32_0 = arith.constant 0 : i32
    return %arg1, %c0_i32 : i32, i32
  }
  func.func @transform_2(%arg0: i32, %arg1: i32) -> (i32, i32) {
    %c0_i32 = arith.constant 0 : i32
    %c0_i32_0 = arith.constant 0 : i32
    return %arg0, %c0_i32 : i32, i32
  }
  func.func @transform_3(%arg0: i32, %arg1: i32) -> (i32, i32) {
    %c0_i32 = arith.constant 0 : i32
    %c0_i32_0 = arith.constant 0 : i32
    return %c0_i32, %arg1 : i32, i32
  }
  func.func @transform_4(%arg0: i32, %arg1: i32) -> (i32, i32) {
    %c0_i32 = arith.constant 0 : i32
    %c0_i32_0 = arith.constant 0 : i32
    return %c0_i32, %arg0 : i32, i32
  }
}

module attributes {stable_mosaic.version = 11 : i64} {
  func.func @_output_layer_kernel(%arg0: i32, %arg1: i32, %arg2: memref<128x32xf32, #tpu.memory_space<vmem>>, %arg3: memref<256x32xf32, #tpu.memory_space<vmem>>, %arg4: memref<128x1xf32, #tpu.memory_space<vmem>>, %arg5: memref<1x256xf32, #tpu.memory_space<vmem>>, %arg6: memref<8x128xf32, #tpu.memory_space<vmem>>, %arg7: memref<128x4xf32, #tpu.memory_space<vmem>>) attributes {dimension_semantics = [#tpu.dimension_semantics<parallel>, #tpu.dimension_semantics<arbitrary>], iteration_bounds = array<i64: 1, 1>, scalar_prefetch = 0 : i64, scratch_operands = 1 : i64, tpu.core_type = #tpu.core_type<tc>, window_params = [{transform_indices = @transform_0, window_bounds = array<i64: 128, 32>}, {transform_indices = @transform_1, window_bounds = array<i64: 256, 32>}, {transform_indices = @transform_2, window_bounds = array<i64: 128, 1>}, {transform_indices = @transform_3, window_bounds = array<i64: 1, 256>}, {transform_indices = @transform_4, window_bounds = array<i64: 8, 128>}]} {
    %c0_i32 = arith.constant 0 : i32
    %0 = arith.cmpi eq, %arg1, %c0_i32 : i32
    %1 = arith.extui %0 : i1 to i32
    %c0_i32_0 = arith.constant 0 : i32
    %2 = arith.cmpi ne, %1, %c0_i32_0 : i32
    scf.if %2 {
      %cst_16 = arith.constant -1.000000e+30 : f32
      %41 = vector.broadcast %cst_16 : f32 to vector<128x1xf32>
      %cst_17 = arith.constant 0.000000e+00 : f32
      %42 = vector.broadcast %cst_17 : f32 to vector<128x3xf32>
      %43 = tpu.concatenate %41, %42 in 1 : vector<128x1xf32>, vector<128x3xf32> -> vector<128x4xf32>
      %c0_18 = arith.constant 0 : index
      %c0_19 = arith.constant 0 : index
      %44 = vector.load %arg7[%c0_18, %c0_19] : memref<128x4xf32, #tpu.memory_space<vmem>>, vector<128x4xf32>
      tpu.vector_store %arg7[%c0_18, %c0_19], %43 {strides = array<i32>} : memref<128x4xf32, #tpu.memory_space<vmem>>, vector<128x4xf32>,
    } else {
    }
    %c0 = arith.constant 0 : index
    %c0_1 = arith.constant 0 : index
    %3 = vector.load %arg2[%c0, %c0_1] : memref<128x32xf32, #tpu.memory_space<vmem>>, vector<128x32xf32>
    %c0_2 = arith.constant 0 : index
    %c0_3 = arith.constant 0 : index
    %4 = vector.load %arg3[%c0_2, %c0_3] : memref<256x32xf32, #tpu.memory_space<vmem>>, vector<256x32xf32>
    %cst = arith.constant dense<0.000000e+00> : vector<128x256xf32>
    %5 = tpu.matmul %3, %4, %cst {dimension_numbers = #tpu.dot_dimension_numbers<[1], [1], [0], [0], [0, 0, 1, 0], [], []>} : vector<128x32xf32>, vector<256x32xf32>, vector<128x256xf32> -> vector<128x256xf32>
    %c0_4 = arith.constant 0 : index
    %c0_5 = arith.constant 0 : index
    %6 = vector.load %arg4[%c0_4, %c0_5] : memref<128x1xf32, #tpu.memory_space<vmem>>, vector<128x1xf32>
    %c0_6 = arith.constant 0 : index
    %c0_7 = arith.constant 0 : index
    %7 = vector.load %arg7[%c0_6, %c0_7] : memref<128x4xf32, #tpu.memory_space<vmem>>, vector<128x4xf32>
    %8 = vector.extract_strided_slice %7 {offsets = [0, 0], sizes = [128, 1], strides = [1, 1]} : vector<128x4xf32> to vector<128x1xf32>
    %9 = vector.extract_strided_slice %7 {offsets = [0, 1], sizes = [128, 1], strides = [1, 1]} : vector<128x4xf32> to vector<128x1xf32>
    %10 = vector.extract_strided_slice %7 {offsets = [0, 2], sizes = [128, 1], strides = [1, 1]} : vector<128x4xf32> to vector<128x1xf32>
    %11 = vector.extract_strided_slice %7 {offsets = [0, 3], sizes = [128, 1], strides = [1, 1]} : vector<128x4xf32> to vector<128x1xf32>
    %cst_8 = arith.constant dense<0xFF800000> : vector<128xf32>
    %12 = vector.multi_reduction <maximumf>, %5, %cst_8 [1] : vector<128x256xf32> to vector<128xf32>
    %13 = vector.shape_cast %12 : vector<128xf32> to vector<128x1xf32>
    %14 = arith.maximumf %8, %13 : vector<128x1xf32>
    %15 = arith.subf %8, %14 : vector<128x1xf32>
    %16 = math.exp %15 : vector<128x1xf32>
    %17 = vector.broadcast %14 : vector<128x1xf32> to vector<128x256xf32>
    %18 = arith.subf %5, %17 : vector<128x256xf32>
    %19 = math.exp %18 : vector<128x256xf32>
    %20 = arith.mulf %16, %9 : vector<128x1xf32>
    %cst_9 = arith.constant dense<0.000000e+00> : vector<128xf32>
    %21 = vector.multi_reduction <add>, %19, %cst_9 [1] : vector<128x256xf32> to vector<128xf32>
    %22 = vector.shape_cast %21 : vector<128xf32> to vector<128x1xf32>
    %23 = arith.addf %20, %22 : vector<128x1xf32>
    %24 = arith.mulf %16, %10 : vector<128x1xf32>
    %25 = arith.mulf %19, %5 : vector<128x256xf32>
    %cst_10 = arith.constant dense<0.000000e+00> : vector<128xf32>
    %26 = vector.multi_reduction <add>, %25, %cst_10 [1] : vector<128x256xf32> to vector<128xf32>
    %27 = vector.shape_cast %26 : vector<128xf32> to vector<128x1xf32>
    %28 = arith.addf %24, %27 : vector<128x1xf32>
    %29 = vector.broadcast %6 : vector<128x1xf32> to vector<128x256xf32>
    %30 = arith.cmpf ogt, %5, %29 : vector<128x256xf32>
    %31 = arith.extui %30 : vector<128x256xi1> to vector<128x256xi32>
    %32 = arith.sitofp %31 : vector<128x256xi32> to vector<128x256xf32>
    %cst_11 = arith.constant dense<0.000000e+00> : vector<128xf32>
    %33 = vector.multi_reduction <add>, %32, %cst_11 [1] : vector<128x256xf32> to vector<128xf32>
    %34 = vector.shape_cast %33 : vector<128xf32> to vector<128x1xf32>
    %35 = arith.addf %11, %34 : vector<128x1xf32>
    %36 = tpu.concatenate %14, %23, %28, %35 in 1 : vector<128x1xf32>, vector<128x1xf32>, vector<128x1xf32>, vector<128x1xf32> -> vector<128x4xf32>
    %c0_12 = arith.constant 0 : index
    %c0_13 = arith.constant 0 : index
    %37 = vector.load %arg7[%c0_12, %c0_13] : memref<128x4xf32, #tpu.memory_space<vmem>>, vector<128x4xf32>
    tpu.vector_store %arg7[%c0_12, %c0_13], %36 {strides = array<i32>} : memref<128x4xf32, #tpu.memory_space<vmem>>, vector<128x4xf32>,
    %c0_i32_14 = arith.constant 0 : i32
    %38 = arith.cmpi eq, %arg1, %c0_i32_14 : i32
    %39 = arith.extui %38 : i1 to i32
    %c0_i32_15 = arith.constant 0 : i32
    %40 = arith.cmpi ne, %39, %c0_i32_15 : i32
    scf.if %40 {
      %41 = math.log %23 : vector<128x1xf32>
      %42 = arith.addf %14, %41 : vector<128x1xf32>
      %43 = arith.subf %42, %6 : vector<128x1xf32>
      %44 = arith.divf %28, %23 : vector<128x1xf32>
      %45 = arith.subf %42, %44 : vector<128x1xf32>
      %cst_16 = arith.constant 0.000000e+00 : f32
      %46 = vector.broadcast %cst_16 : f32 to vector<128x5xf32>
      %47 = tpu.concatenate %43, %45, %35, %46 in 1 : vector<128x1xf32>, vector<128x1xf32>, vector<128x1xf32>, vector<128x5xf32> -> vector<128x8xf32>
      %48 = tpu.transpose %47, [1, 0] : vector<128x8xf32> -> vector<8x128xf32>
      %c0_17 = arith.constant 0 : index
      %c0_18 = arith.constant 0 : index
      %49 = vector.load %arg6[%c0_17, %c0_18] : memref<8x128xf32, #tpu.memory_space<vmem>>, vector<8x128xf32>
      tpu.vector_store %arg6[%c0_17, %c0_18], %48 {strides = array<i32>} : memref<8x128xf32, #tpu.memory_space<vmem>>, vector<8x128xf32>,
    } else {
    }
    return
  }
  func.func @transform_0(%arg0: i32, %arg1: i32) -> (i32, i32) {
    %c0_i32 = arith.constant 0 : i32
    %c0_i32_0 = arith.constant 0 : i32
    return %arg0, %c0_i32 : i32, i32
  }
  func.func @transform_1(%arg0: i32, %arg1: i32) -> (i32, i32) {
    %c0_i32 = arith.constant 0 : i32
    %c0_i32_0 = arith.constant 0 : i32
    return %arg1, %c0_i32 : i32, i32
  }
  func.func @transform_2(%arg0: i32, %arg1: i32) -> (i32, i32) {
    %c0_i32 = arith.constant 0 : i32
    %c0_i32_0 = arith.constant 0 : i32
    return %arg0, %c0_i32 : i32, i32
  }
  func.func @transform_3(%arg0: i32, %arg1: i32) -> (i32, i32) {
    %c0_i32 = arith.constant 0 : i32
    %c0_i32_0 = arith.constant 0 : i32
    return %c0_i32, %arg1 : i32, i32
  }
  func.func @transform_4(%arg0: i32, %arg1: i32) -> (i32, i32) {
    %c0_i32 = arith.constant 0 : i32
    %c0_i32_0 = arith.constant 0 : i32
    return %c0_i32, %arg0 : i32, i32
  }
}

</mosaic_0001>

<bundles_post_ra>
// kernel: tpu_custom_call.1
= control target key start
LH: loop header
LB: loop body
LE: loop exit
PB: predicated region body
PF: predicated region fallthrough
CT: control target
= control target key end

     0   :  { %vm89_vm0 = vcmask 261120   ;;  %vm22_vm1 = vcmask 7168   ;;  %v3708_v3 = vmov 0.0   ;;  %vm24_vm2 = vcmask 31744   ;;  %s2194_s6 = smov 127   ;;  %s3703_s0 = inlined_call_operand.vmem [shape: f32[128,32], index: 0, kind: input, shape index: {}]   ;;  %s3704_s1 = inlined_call_operand.vmem [shape: f32[256,32], index: 1, kind: input, shape index: {}]   ;;  %s3705_s2 = inlined_call_operand.vmem [shape: f32[128,1], index: 2, kind: input, shape index: {}]   ;;  %s3706_s3 = inlined_call_operand.vmem [shape: f32[1,256], index: 3, kind: input, shape index: {}]   ;;  %s3707_s4 = inlined_call_operand.hbm [shape: f32[8,128], index: 4, kind: output, shape index: {}]  }
   0x1   :  { %v88_v0 = vld [vmem:[%s3704_s1 + $0xf8] sm:$0xff]  ;;  %v87_v2 = vld [vmem:[%s3704_s1 + $0xf0] sm:$0xff]  ;;  %v23_v4 = vsel %vm22_vm1, -1e+30, %v3708_v3  ;;  %v86_v6 = vld [vmem:[%s3704_s1 + $0xe8] sm:$0xff]  ;;  %v2193_v7 = vmov 0  }
   0x2   :  { %v72_v1 = vld [vmem:[%s3704_s1 + $0x78] sm:$0xff]  ;;  %1873 = vmatprep.subr.msk.mxu0 %vm89_vm0, %v88_v0  ;;  %1937 = vmatprep.subr.msk.mxu1 %vm89_vm0, %v88_v0  ;;  %25 = vst.msk [vmem:[#allocation2] sm:$0xff] %vm24_vm2, %v23_v4  ;;  %26 = vst.msk [vmem:[#allocation2 + $0x8] sm:$0xff] %vm24_vm2, %v23_v4  ;;  %v71_v5 = vld [vmem:[%s3704_s1 + $0x70] sm:$0xff] }
   0x3   :  { %1874 = vmatpush3.xpose.msk.msra.mxu0 %vm89_vm0, %v72_v1  ;;  %1953 = vmatpush3.xpose.msk.msra.mxu1 %vm89_vm0, %v72_v1  ;;  %27 = vst.msk [vmem:[#allocation2 + $0x10] sm:$0xff] %vm24_vm2, %v23_v4  ;;  %28 = vst.msk [vmem:[#allocation2 + $0x18] sm:$0xff] %vm24_vm2, %v23_v4  ;;  %v70_v8 = vld [vmem:[%s3704_s1 + $0x68] sm:$0xff]  ;;  %v85_v9 = vld [vmem:[%s3704_s1 + $0xe0] sm:$0xff] }
   0x4   :  { %29 = vst.msk [vmem:[#allocation2 + $0x20] sm:$0xff] %vm24_vm2, %v23_v4  ;;  %30 = vst.msk [vmem:[#allocation2 + $0x28] sm:$0xff] %vm24_vm2, %v23_v4  ;;  %1875 = vmatprep.subr.msk.mxu0 %vm89_vm0, %v87_v2  ;;  %1938 = vmatprep.subr.msk.mxu1 %vm89_vm0, %v87_v2  ;;  %v69_v12 = vld [vmem:[%s3704_s1 + $0x60] sm:$0xff]  ;;  %v84_v13 = vld [vmem:[%s3704_s1 + $0xd8] sm:$0xff] }
   0x5   :  { %31 = vst.msk [vmem:[#allocation2 + $0x30] sm:$0xff] %vm24_vm2, %v23_v4  ;;  %32 = vst.msk [vmem:[#allocation2 + $0x38] sm:$0xff] %vm24_vm2, %v23_v4  ;;  %1977 = vset.pattern.permute.xlu1 %v2193_v7  ;;  %1976 = vset.pattern.permute.xlu0 %v2193_v7  ;;  %v68_v16 = vld [vmem:[%s3704_s1 + $0x58] sm:$0xff]  ;;  %v2305_v17 = vld [vmem:[%s3703_s0] sm:$0xff] }
   0x6   :  { %33 = vst.msk [vmem:[#allocation2 + $0x40] sm:$0xff] %vm24_vm2, %v23_v4  ;;  %34 = vst.msk [vmem:[#allocation2 + $0x48] sm:$0xff] %vm24_vm2, %v23_v4  ;;  %v2310_v18 = vld [vmem:[%s3703_s0 + $0x40] sm:$0xff]  ;;  %v83_v19 = vld [vmem:[%s3704_s1 + $0xd0] sm:$0xff]  ;;  %1905 = vmatprep.mubr.msk.f32.mxu0 %vm89_vm0, %v2305_v17 }
   0x7   :  { %35 = vst.msk [vmem:[#allocation2 + $0x50] sm:$0xff] %vm24_vm2, %v23_v4  ;;  %36 = vst.msk [vmem:[#allocation2 + $0x58] sm:$0xff] %vm24_vm2, %v23_v4  ;;  %1876 = vmatpush3.xpose.msk.msra.mxu0 %vm89_vm0, %v71_v5  ;;  %1954 = vmatpush3.xpose.msk.msra.mxu1 %vm89_vm0, %v71_v5  ;;  %v67_v22 = vld [vmem:[%s3704_s1 + $0x50] sm:$0xff]  ;;  %v82_v23 = vld [vmem:[%s3704_s1 + $0xc8] sm:$0xff] }
   0x8   :  { %37 = vst.msk [vmem:[#allocation2 + $0x60] sm:$0xff] %vm24_vm2, %v23_v4  ;;  %38 = vst.msk [vmem:[#allocation2 + $0x68] sm:$0xff] %vm24_vm2, %v23_v4  ;;  %1877 = vmatprep.subr.msk.mxu0 %vm89_vm0, %v86_v6  ;;  %1939 = vmatprep.subr.msk.mxu1 %vm89_vm0, %v86_v6  ;;  %v66_v26 = vld [vmem:[%s3704_s1 + $0x48] sm:$0xff]  ;;  %v81_v27 = vld [vmem:[%s3704_s1 + $0xc0] sm:$0xff] }
   0x9   :  { %39 = vst.msk [vmem:[#allocation2 + $0x70] sm:$0xff] %vm24_vm2, %v23_v4  ;;  %40 = vst.msk [vmem:[#allocation2 + $0x78] sm:$0xff] %vm24_vm2, %v23_v4  ;;  %v2273_v10 = vld [vmem:[#allocation2] sm:$0xff]  ;;  %v2275_v11 = vld [vmem:[#allocation2 + $0x8] sm:$0xff]  ;;  %1921 = vmatprep.mubr.msk.f32.mxu1 %vm89_vm0, %v2310_v18 }
   0xa   :  { %731 = vrot.lane.b32.xlu1 %v2273_v10, %s2194_s6  ;;  %733 = vrot.lane.b32.xlu0 %v2275_v11, %s2194_s6  ;;  %v2291_v14 = vld [vmem:[#allocation2 + $0x10] sm:$0xff]  ;;  %v2293_v15 = vld [vmem:[#allocation2 + $0x18] sm:$0xff]  ;;  %v65_v30 = vld [vmem:[%s3704_s1 + $0x40] sm:$0xff] }
   0xb   :  { %1878 = vmatpush3.xpose.msk.msra.mxu0 %vm89_vm0, %v70_v8  ;;  %1955 = vmatpush3.xpose.msk.msra.mxu1 %vm89_vm0, %v70_v8  ;;  %v2319_v20 = vld [vmem:[#allocation2 + $0x20] sm:$0xff]  ;;  %v2321_v21 = vld [vmem:[#allocation2 + $0x28] sm:$0xff] }
   0xc   :  { %1879 = vmatprep.subr.msk.mxu0 %vm89_vm0, %v85_v9  ;;  %1940 = vmatprep.subr.msk.mxu1 %vm89_vm0, %v85_v9  ;;  %v2341_v24 = vld [vmem:[#allocation2 + $0x30] sm:$0xff]  ;;  %v2343_v25 = vld [vmem:[#allocation2 + $0x38] sm:$0xff] }
   0xd   :  { %v2359_v28 = vld [vmem:[#allocation2 + $0x40] sm:$0xff]  ;;  %v2361_v29 = vld [vmem:[#allocation2 + $0x48] sm:$0xff] }
   0xe   :  { %735 = vrot.lane.b32.xlu1 %v2291_v14, %s2194_s6  ;;  %737 = vrot.lane.b32.xlu0 %v2293_v15, %s2194_s6 }
   0xf   :  { %1880 = vmatpush3.xpose.msk.msra.mxu0 %vm89_vm0, %v69_v12  ;;  %1956 = vmatpush3.xpose.msk.msra.mxu1 %vm89_vm0, %v69_v12 }
  0x10   :  { %1881 = vmatprep.subr.msk.mxu0 %vm89_vm0, %v84_v13  ;;  %1941 = vmatprep.subr.msk.mxu1 %vm89_vm0, %v84_v13 }
  0x12   :  { %739 = vrot.lane.b32.xlu1 %v2319_v20, %s2194_s6  ;;  %741 = vrot.lane.b32.xlu0 %v2321_v21, %s2194_s6 }
  0x13   :  { %1882 = vmatpush3.xpose.msk.msra.mxu0 %vm89_vm0, %v68_v16  ;;  %1957 = vmatpush3.xpose.msk.msra.mxu1 %vm89_vm0, %v68_v16 }
  0x14   :  { %1883 = vmatprep.subr.msk.mxu0 %vm89_vm0, %v83_v19  ;;  %1942 = vmatprep.subr.msk.mxu1 %vm89_vm0, %v83_v19 }
  0x16   :  { %743 = vrot.lane.b32.xlu1 %v2341_v24, %s2194_s6  ;;  %745 = vrot.lane.b32.xlu0 %v2343_v25, %s2194_s6 }
  0x17   :  { %1884 = vmatpush3.xpose.msk.msra.mxu0 %vm89_vm0, %v67_v22  ;;  %1958 = vmatpush3.xpose.msk.msra.mxu1 %vm89_vm0, %v67_v22 }
  0x18   :  { %1885 = vmatprep.subr.msk.mxu0 %vm89_vm0, %v82_v23  ;;  %1943 = vmatprep.subr.msk.mxu1 %vm89_vm0, %v82_v23 }
  0x1b   :  { %1886 = vmatpush3.xpose.msk.msra.mxu0 %vm89_vm0, %v66_v26  ;;  %1959 = vmatpush3.xpose.msk.msra.mxu1 %vm89_vm0, %v66_v26 }
  0x1c   :  { %1887 = vmatprep.subr.msk.mxu0 %vm89_vm0, %v81_v27  ;;  %1944 = vmatprep.subr.msk.mxu1 %vm89_vm0, %v81_v27 }
  0x1d   :  { %9 = vsyncpa [#allocation4], 0  ;;  %v80_v31 = vld [vmem:[%s3704_s1 + $0xb8] sm:$0xff]  ;;  %747 = vrot.lane.b32.xlu1 %v2359_v28, %s2194_s6  ;;  %749 = vrot.lane.b32.xlu0 %v2361_v29, %s2194_s6  ;;  %v2377_v32 = vld [vmem:[#allocation2 + $0x50] sm:$0xff]  ;;  %s2195_s17 = smov 126   ;;  %s2196_s10 = smov 1  }
  0x1e   :  { %v2379_v33 = vld [vmem:[#allocation2 + $0x58] sm:$0xff]  ;;  %v79_v35 = vld [vmem:[%s3704_s1 + $0xb0] sm:$0xff]  ;;  %v2395_v36 = vld [vmem:[#allocation2 + $0x60] sm:$0xff]  ;;  %s2197_s11 = smov 2  }
  0x1f   :  { %1888 = vmatpush3.xpose.msk.msra.mxu0 %vm89_vm0, %v65_v30  ;;  %1960 = vmatpush3.xpose.msk.msra.mxu1 %vm89_vm0, %v65_v30  ;;  %v64_v34 = vld [vmem:[%s3704_s1 + $0x38] sm:$0xff]  ;;  %v2397_v37 = vld [vmem:[#allocation2 + $0x68] sm:$0xff]  ;;  %v63_v38 = vld [vmem:[%s3704_s1 + $0x30] sm:$0xff] }
  0x20   :  { %1889 = vmatprep.subr.msk.mxu0 %vm89_vm0, %v80_v31  ;;  %1945 = vmatprep.subr.msk.mxu1 %vm89_vm0, %v80_v31  ;;  %v78_v39 = vld [vmem:[%s3704_s1 + $0xa8] sm:$0xff]  ;;  %v2413_v40 = vld [vmem:[#allocation2 + $0x70] sm:$0xff]  ;;  %v2415_v41 = vld [vmem:[#allocation2 + $0x78] sm:$0xff] }
  0x21   :  { %751 = vrot.lane.b32.xlu1 %v2377_v32, %s2194_s6  ;;  %753 = vrot.lane.b32.xlu0 %v2379_v33, %s2194_s6  ;;  %v62_v42 = vld [vmem:[%s3704_s1 + $0x28] sm:$0xff]  ;;  %v77_v43 = vld [vmem:[%s3704_s1 + $0xa0] sm:$0xff] }
  0x22   :  { %v61_v44 = vld [vmem:[%s3704_s1 + $0x20] sm:$0xff]  ;;  %v76_v45 = vld [vmem:[%s3704_s1 + $0x98] sm:$0xff]  ;;  %v75_v47 = vld [vmem:[%s3704_s1 + $0x90] sm:$0xff] }
  0x23   :  { %1890 = vmatpush3.xpose.msk.msra.mxu0 %vm89_vm0, %v64_v34  ;;  %1961 = vmatpush3.xpose.msk.msra.mxu1 %vm89_vm0, %v64_v34  ;;  %v60_v46 = vld [vmem:[%s3704_s1 + $0x18] sm:$0xff]  ;;  %v59_v48 = vld [vmem:[%s3704_s1 + $0x10] sm:$0xff]  ;;  %v74_v49 = vld [vmem:[%s3704_s1 + $0x88] sm:$0xff] }
  0x24   :  { %1891 = vmatprep.subr.msk.mxu0 %vm89_vm0, %v79_v35  ;;  %1946 = vmatprep.subr.msk.mxu1 %vm89_vm0, %v79_v35  ;;  %v58_v50 = vld [vmem:[%s3704_s1 + $0x8] sm:$0xff]  ;;  %v73_v51 = vld [vmem:[%s3704_s1 + $0x80] sm:$0xff]  ;;  %v43_v55 = vld [vmem:[%s3703_s0 + $0x10] sm:$0xff] }
  0x25   :  { %755 = vrot.lane.b32.xlu1 %v2395_v36, %s2194_s6  ;;  %757 = vrot.lane.b32.xlu0 %v2397_v37, %s2194_s6  ;;  %v57_v52 = vld [vmem:[%s3704_s1] sm:$0xff]  ;;  %v42_v53 = vld [vmem:[%s3703_s0 + $0x8] sm:$0xff] }
  0x26   :  { %v50_v54 = vld [vmem:[%s3703_s0 + $0x48] sm:$0xff]  ;;  %v51_v56 = vld [vmem:[%s3703_s0 + $0x50] sm:$0xff]  ;;  %v44_v57 = vld [vmem:[%s3703_s0 + $0x18] sm:$0xff] }
  0x27   :  { %1892 = vmatpush3.xpose.msk.msra.mxu0 %vm89_vm0, %v63_v38  ;;  %1962 = vmatpush3.xpose.msk.msra.mxu1 %vm89_vm0, %v63_v38  ;;  %v52_v58 = vld [vmem:[%s3703_s0 + $0x58] sm:$0xff]  ;;  %v396_v59 = vld [vmem:[%s3705_s2 + $0x8] sm:$0xff]  ;;  %v395_v60 = vld [vmem:[%s3705_s2] sm:$0xff] }
  0x28   :  { %1893 = vmatprep.subr.msk.mxu0 %vm89_vm0, %v78_v39  ;;  %1947 = vmatprep.subr.msk.mxu1 %vm89_vm0, %v78_v39  ;;  %v45_v61 = vld [vmem:[%s3703_s0 + $0x20] sm:$0xff]  ;;  %v397_v63 = vld [vmem:[%s3705_s2 + $0x10] sm:$0xff]  ;;  %v398_v0 = vld [vmem:[%s3705_s2 + $0x18] sm:$0xff] }
  0x29   :  { %759 = vrot.lane.b32.xlu1 %v2413_v40, %s2194_s6  ;;  %761 = vrot.lane.b32.xlu0 %v2415_v41, %s2194_s6  ;;  %v53_v62 = vld [vmem:[%s3703_s0 + $0x60] sm:$0xff]  ;;  %v46_v1 = vld [vmem:[%s3703_s0 + $0x28] sm:$0xff] }
  0x2a   :  { %v54_v2 = vld [vmem:[%s3703_s0 + $0x68] sm:$0xff]  ;;  %v399_v4 = vld [vmem:[%s3705_s2 + $0x20] sm:$0xff]  ;;  %v47_v6 = vld [vmem:[%s3703_s0 + $0x30] sm:$0xff] }
  0x2b   :  { %1894 = vmatpush3.xpose.msk.msra.mxu0 %vm89_vm0, %v62_v42  ;;  %1963 = vmatpush3.xpose.msk.msra.mxu1 %vm89_vm0, %v62_v42  ;;  %v400_v5 = vld [vmem:[%s3705_s2 + $0x28] sm:$0xff]  ;;  %v55_v7 = vld [vmem:[%s3703_s0 + $0x70] sm:$0xff]  ;;  %v402_v9 = vld [vmem:[%s3705_s2 + $0x38] sm:$0xff] }
  0x2c   :  { %1895 = vmatprep.subr.msk.mxu0 %vm89_vm0, %v77_v43  ;;  %1948 = vmatprep.subr.msk.mxu1 %vm89_vm0, %v77_v43  ;;  %v401_v8 = vld [vmem:[%s3705_s2 + $0x30] sm:$0xff]  ;;  %v48_v12 = vld [vmem:[%s3703_s0 + $0x38] sm:$0xff]  ;;  %v403_v16 = vld [vmem:[%s3705_s2 + $0x40] sm:$0xff] }
  0x2d   :  { %861 = vrot.lane.b32.xlu1 %v2275_v11, %s2195_s17  ;;  %859 = vrot.lane.b32.xlu0 %v2273_v10, %s2195_s17  ;;  %v56_v13 = vld [vmem:[%s3703_s0 + $0x78] sm:$0xff]  ;;  %v407_v22 = vld [vmem:[%s3705_s2 + $0x60] sm:$0xff] }
  0x2e   :  { %v406_v19 = vld [vmem:[%s3705_s2 + $0x58] sm:$0xff]  ;;  %v408_v23 = vld [vmem:[%s3705_s2 + $0x68] sm:$0xff]  ;;  %v409_v26 = vld [vmem:[%s3705_s2 + $0x70] sm:$0xff] }
  0x2f   :  { %1896 = vmatpush3.xpose.msk.msra.mxu0 %vm89_vm0, %v61_v44  ;;  %1964 = vmatpush3.xpose.msk.msra.mxu1 %vm89_vm0, %v61_v44  ;;  %v410_v27 = vld [vmem:[%s3705_s2 + $0x78] sm:$0xff] }
  0x30   :  { %1897 = vmatprep.subr.msk.mxu0 %vm89_vm0, %v76_v45  ;;  %1949 = vmatprep.subr.msk.mxu1 %vm89_vm0, %v76_v45 }
  0x31   :  { %863 = vrot.lane.b32.xlu1 %v2291_v14, %s2195_s17  ;;  %865 = vrot.lane.b32.xlu0 %v2293_v15, %s2195_s17 }
  0x33   :  { %1898 = vmatpush3.xpose.msk.msra.mxu0 %vm89_vm0, %v60_v46  ;;  %1965 = vmatpush3.xpose.msk.msra.mxu1 %vm89_vm0, %v60_v46 }
  0x34   :  { %1899 = vmatprep.subr.msk.mxu0 %vm89_vm0, %v75_v47  ;;  %1950 = vmatprep.subr.msk.mxu1 %vm89_vm0, %v75_v47 }
  0x35   :  { %867 = vrot.lane.b32.xlu1 %v2319_v20, %s2195_s17  ;;  %869 = vrot.lane.b32.xlu0 %v2321_v21, %s2195_s17 }
  0x37   :  { %1900 = vmatpush3.xpose.msk.msra.mxu0 %vm89_vm0, %v59_v48  ;;  %1966 = vmatpush3.xpose.msk.msra.mxu1 %vm89_vm0, %v59_v48 }
  0x38   :  { %1901 = vmatprep.subr.msk.mxu0 %vm89_vm0, %v74_v49  ;;  %1951 = vmatprep.subr.msk.mxu1 %vm89_vm0, %v74_v49 }
  0x39   :  { %871 = vrot.lane.b32.xlu1 %v2341_v24, %s2195_s17  ;;  %873 = vrot.lane.b32.xlu0 %v2343_v25, %s2195_s17 }
  0x3b   :  { %1902 = vmatpush3.xpose.msk.msra.mxu0 %vm89_vm0, %v58_v50  ;;  %1967 = vmatpush3.xpose.msk.msra.mxu1 %vm89_vm0, %v58_v50 }
  0x3c   :  { %1903 = vmatprep.subr.msk.mxu0 %vm89_vm0, %v73_v51  ;;  %1952 = vmatprep.subr.msk.mxu1 %vm89_vm0, %v73_v51 }
  0x3d   :  { %875 = vrot.lane.b32.xlu1 %v2359_v28, %s2195_s17  ;;  %877 = vrot.lane.b32.xlu0 %v2361_v29, %s2195_s17 }
  0x3f   :  { %1904 = vmatpush3.xpose.msk.msra.mxu0 %vm89_vm0, %v57_v52  ;;  %1968 = vmatpush3.xpose.msk.msra.mxu1 %vm89_vm0, %v57_v52 }
  0x41   :  { %879 = vrot.lane.b32.xlu1 %v2377_v32, %s2195_s17  ;;  %881 = vrot.lane.b32.xlu0 %v2379_v33, %s2195_s17 }
  0x42   :  { %1906 = vmatmul.mubr.msk.f32.vlgmr.msra.gmra.mxu0 %vm89_vm0, %v2305_v17  ;;  %1922 = vmatmul.mubr.msk.f32.vlgmr.msra.gmra.mxu1 %vm89_vm0, %v2310_v18  ;;  %v404_v17 = vld [vmem:[%s3705_s2 + $0x48] sm:$0xff]  ;;  %v405_v18 = vld [vmem:[%s3705_s2 + $0x50] sm:$0xff] }
  0x43   :  { %1907 = vmatprep.mubr.msk.f32.mxu0 %vm89_vm0, %v42_v53  ;;  %1923 = vmatprep.mubr.msk.f32.mxu1 %vm89_vm0, %v50_v54 }
  0x45   :  { %883 = vrot.lane.b32.xlu1 %v2395_v36, %s2195_s17  ;;  %885 = vrot.lane.b32.xlu0 %v2397_v37, %s2195_s17 }
  0x46   :  { %1908 = vmatmul.mubr.msk.f32.gmra.mxu0 %vm89_vm0, %v42_v53  ;;  %1924 = vmatmul.mubr.msk.f32.gmra.mxu1 %vm89_vm0, %v50_v54 }
  0x47   :  { %1909 = vmatprep.mubr.msk.f32.mxu0 %vm89_vm0, %v43_v55  ;;  %1925 = vmatprep.mubr.msk.f32.mxu1 %vm89_vm0, %v51_v56 }
  0x49   :  { %887 = vrot.lane.b32.xlu1 %v2413_v40, %s2195_s17  ;;  %889 = vrot.lane.b32.xlu0 %v2415_v41, %s2195_s17 }
  0x4a   :  { %1910 = vmatmul.mubr.msk.f32.gmra.mxu0 %vm89_vm0, %v43_v55  ;;  %1926 = vmatmul.mubr.msk.f32.gmra.mxu1 %vm89_vm0, %v51_v56 }
  0x4b   :  { %1911 = vmatprep.mubr.msk.f32.mxu0 %vm89_vm0, %v44_v57  ;;  %1927 = vmatprep.mubr.msk.f32.mxu1 %vm89_vm0, %v52_v58 }
  0x4d   :  { %1026 = vperm.xlu1 %1977, %v396_v59   ;;  %1021 = vperm.xlu0 %1976, %v395_v60  }
  0x4e   :  { %1912 = vmatmul.mubr.msk.f32.gmra.mxu0 %vm89_vm0, %v44_v57  ;;  %1928 = vmatmul.mubr.msk.f32.gmra.mxu1 %vm89_vm0, %v52_v58 }
  0x4f   :  { %1913 = vmatprep.mubr.msk.f32.mxu0 %vm89_vm0, %v45_v61  ;;  %1929 = vmatprep.mubr.msk.f32.mxu1 %vm89_vm0, %v53_v62 }
  0x51   :  { %1031 = vperm.xlu1 %1977, %v397_v63   ;;  %1036 = vperm.xlu0 %1976, %v398_v0  }
  0x52   :  { %1914 = vmatmul.mubr.msk.f32.gmra.mxu0 %vm89_vm0, %v45_v61  ;;  %1930 = vmatmul.mubr.msk.f32.gmra.mxu1 %vm89_vm0, %v53_v62 }
  0x53   :  { %1915 = vmatprep.mubr.msk.f32.mxu0 %vm89_vm0, %v46_v1  ;;  %1931 = vmatprep.mubr.msk.f32.mxu1 %vm89_vm0, %v54_v2 }
  0x55   :  { %1041 = vperm.xlu1 %1977, %v399_v4   ;;  %1046 = vperm.xlu0 %1976, %v400_v5  }
  0x56   :  { %1916 = vmatmul.mubr.msk.f32.gmra.mxu0 %vm89_vm0, %v46_v1  ;;  %1932 = vmatmul.mubr.msk.f32.gmra.mxu1 %vm89_vm0, %v54_v2 }
  0x57   :  { %1917 = vmatprep.mubr.msk.f32.mxu0 %vm89_vm0, %v47_v6  ;;  %1933 = vmatprep.mubr.msk.f32.mxu1 %vm89_vm0, %v55_v7 }
  0x59   :  { %1051 = vperm.xlu1 %1977, %v401_v8   ;;  %1056 = vperm.xlu0 %1976, %v402_v9  }
  0x5a   :  { %1918 = vmatmul.mubr.msk.f32.gmra.mxu0 %vm89_vm0, %v47_v6  ;;  %1934 = vmatmul.mubr.msk.f32.gmra.mxu1 %vm89_vm0, %v55_v7 }
  0x5b   :  { %1919 = vmatprep.mubr.msk.f32.mxu0 %vm89_vm0, %v48_v12  ;;  %1935 = vmatprep.mubr.msk.f32.mxu1 %vm89_vm0, %v56_v13 }
  0x5d   :  { %1061 = vperm.xlu1 %1977, %v403_v16   ;;  %1066 = vperm.xlu0 %1976, %v404_v17  }
  0x5e   :  { %1920 = vmatmul.mubr.msk.f32.gmra.mxu0 %vm89_vm0, %v48_v12  ;;  %1936 = vmatmul.mubr.msk.f32.gmra.mxu1 %vm89_vm0, %v56_v13 }
  0x61   :  { %1071 = vperm.xlu1 %1977, %v405_v18   ;;  %1076 = vperm.xlu0 %1976, %v406_v19  }
  0x65   :  { %1081 = vperm.xlu1 %1977, %v407_v22   ;;  %1086 = vperm.xlu0 %1976, %v408_v23  }
  0x69   :  { %1091 = vperm.xlu1 %1977, %v409_v26   ;;  %1096 = vperm.xlu0 %1976, %v410_v27  }
  0x7c   :  { %v2634_v30 = vpop.permute.xlu1 %731  ;;  %v2636_v31 = vpop.permute.xlu0 %733 }
  0x7d   :  { %3739 = vst [vmem:[#allocation6_spill] sm:$0xff] %v2634_v30  ;;  %3740 = vst [vmem:[#allocation7_spill] sm:$0xff] %v2636_v31 }
  0x80   :  { %v2638_v34 = vpop.permute.xlu1 %735  ;;  %v2640_v35 = vpop.permute.xlu0 %737 }
  0x81   :  { %3741 = vst [vmem:[#allocation8_spill] sm:$0xff] %v2638_v34  ;;  %3742 = vst [vmem:[#allocation9_spill] sm:$0xff] %v2640_v35 }
  0x84   :  { %v2642_v38 = vpop.permute.xlu1 %739  ;;  %v2644_v39 = vpop.permute.xlu0 %741 }
  0x85   :  { %3743 = vst [vmem:[#allocation10_spill] sm:$0xff] %v2642_v38  ;;  %3744 = vst [vmem:[#allocation11_spill] sm:$0xff] %v2644_v39 }
  0x88   :  { %v2646_v42 = vpop.permute.xlu1 %743  ;;  %v2648_v43 = vpop.permute.xlu0 %745 }
  0x89   :  { %3745 = vst [vmem:[#allocation12_spill] sm:$0xff] %v2646_v42  ;;  %3746 = vst [vmem:[#allocation13_spill] sm:$0xff] %v2648_v43 }
  0x8f   :  { %v2650_v44 = vpop.permute.xlu1 %747  ;;  %v2652_v45 = vpop.permute.xlu0 %749 }
  0x90   :  { %3747 = vst [vmem:[#allocation14_spill] sm:$0xff] %v2652_v45 }
  0x93   :  { %v2654_v46 = vpop.permute.xlu1 %751  ;;  %v2656_v47 = vpop.permute.xlu0 %753 }
  0x94   :  { %3748 = vst [vmem:[#allocation15_spill] sm:$0xff] %v2654_v46  ;;  %3749 = vst [vmem:[#allocation16_spill] sm:$0xff] %v2656_v47 }
  0x97   :  { %v2658_v48 = vpop.permute.xlu1 %755  ;;  %v2660_v49 = vpop.permute.xlu0 %757 }
  0x98   :  { %3750 = vst [vmem:[#allocation17_spill] sm:$0xff] %v2658_v48  ;;  %3751 = vst [vmem:[#allocation18_spill] sm:$0xff] %v2660_v49 }
  0x9b   :  { %v2662_v50 = vpop.permute.xlu1 %759  ;;  %v2664_v51 = vpop.permute.xlu0 %761 }
  0x9c   :  { %3752 = vst [vmem:[#allocation19_spill] sm:$0xff] %v2662_v50  ;;  %3753 = vst [vmem:[#allocation20_spill] sm:$0xff] %v2664_v51 }
  0x9f   :  { %v2666_v52 = vpop.permute.xlu1 %861  ;;  %v2668_v53 = vpop.permute.xlu0 %859 }
  0xa0   :  { %3754 = vst [vmem:[#allocation21_spill] sm:$0xff] %v2666_v52  ;;  %3755 = vst [vmem:[#allocation22_spill] sm:$0xff] %v2668_v53 }
  0xa3   :  { %v2670_v54 = vpop.permute.xlu1 %863  ;;  %v2672_v55 = vpop.permute.xlu0 %865 }
  0xa4   :  { %3756 = vst [vmem:[#allocation23_spill] sm:$0xff] %v2670_v54  ;;  %3757 = vst [vmem:[#allocation24_spill] sm:$0xff] %v2672_v55 }
  0xa7   :  { %v2674_v56 = vpop.permute.xlu1 %867  ;;  %v2676_v57 = vpop.permute.xlu0 %869 }
  0xa8   :  { %3758 = vst [vmem:[#allocation25_spill] sm:$0xff] %v2674_v56  ;;  %3759 = vst [vmem:[#allocation26_spill] sm:$0xff] %v2676_v57 }
  0xab   :  { %v2678_v58 = vpop.permute.xlu1 %871  ;;  %v2680_v59 = vpop.permute.xlu0 %873 }
  0xac   :  { %3760 = vst [vmem:[#allocation27_spill] sm:$0xff] %v2678_v58  ;;  %3761 = vst [vmem:[#allocation28_spill] sm:$0xff] %v2680_v59 }
  0xaf   :  { %v2682_v60 = vpop.permute.xlu1 %875  ;;  %v2684_v61 = vpop.permute.xlu0 %877 }
  0xb0   :  { %3762 = vst [vmem:[#allocation29_spill] sm:$0xff] %v2682_v60  ;;  %3763 = vst [vmem:[#allocation30_spill] sm:$0xff] %v2684_v61 }
  0xb3   :  { %v2686_v62 = vpop.permute.xlu1 %879  ;;  %v2688_v63 = vpop.permute.xlu0 %881 }
  0xb4   :  { %3764 = vst [vmem:[#allocation31_spill] sm:$0xff] %v2686_v62  ;;  %3765 = vst [vmem:[#allocation32_spill] sm:$0xff] %v2688_v63 }
  0xb7   :  { %v2690_v0 = vpop.permute.xlu1 %883  ;;  %v2692_v1 = vpop.permute.xlu0 %885 }
  0xb8   :  { %3766 = vst [vmem:[#allocation33_spill] sm:$0xff] %v2690_v0  ;;  %3767 = vst [vmem:[#allocation34_spill] sm:$0xff] %v2692_v1 }
  0xbb   :  { %v2694_v2 = vpop.permute.xlu1 %887  ;;  %v2696_v4 = vpop.permute.xlu0 %889 }
  0xbc   :  { %3768 = vst [vmem:[#allocation35_spill] sm:$0xff] %v2694_v2  ;;  %3769 = vst [vmem:[#allocation36_spill] sm:$0xff] %v2696_v4  ;;  %v3770_v2 = vmov 0.0  }
  0xc8   :  { %v1027_v5 = vpop.permute.xlu1 %1026  ;;  %v1022_v6 = vpop.permute.xlu0 %1021 }
  0xcc   :  { %v2698_v7 = vpop.permute.xlu1 %1031  ;;  %v2700_v8 = vpop.permute.xlu0 %1036 }
  0xd0   :  { %v2702_v9 = vpop.permute.xlu1 %1041  ;;  %v2704_v12 = vpop.permute.xlu0 %1046 }
  0xd4   :  { %v2706_v13 = vpop.permute.xlu1 %1051  ;;  %v2708_v16 = vpop.permute.xlu0 %1056 }
  0xd8   :  { %v1062_v23 = vpop.permute.xlu1 %1061  ;;  %v1067_v58 = vpop.permute.xlu0 %1066 }
 0x102   :  { %v2710_v17 = vpop.f32.mrf.mxu0  ;;  %v2712_v18 = vpop.f32.mrf.mxu1 }
 0x103   :  { %vm1099_vm3 = vcmp.gt.f32.partialorder %v2710_v17, %v1022_v6  ;;  %vm1115_vm6 = vcmp.gt.f32.partialorder %v2712_v18, %v1062_v23 }
 0x104   :  { %v2715_v19 = vpop.f32.mrf.mxu0  ;;  %v2717_v22 = vpop.f32.mrf.mxu1  ;;  %v1841_v4 = vsel %vm1099_vm3, 1.0, %v3770_v2 }
 0x105   :  { %v427_v26 = vmax.f32 %v2710_v17, %v2715_v19  ;;  %vm1100_vm4 = vcmp.gt.f32.partialorder %v2715_v19, %v1022_v6  ;;  %vm1116_vm5 = vcmp.gt.f32.partialorder %v2717_v22, %v1062_v23  ;;  %v451_v6 = vmax.f32 %v2712_v18, %v2717_v22 }
 0x106   :  { %v2722_v27 = vpop.f32.mrf.mxu0  ;;  %v2724_v3 = vpop.f32.mrf.mxu1  ;;  %v1842_v59 = vsel %vm1100_vm4, 1.0, %v3770_v2 }
 0x107   :  { %428 = vmax.xlane.f32.xlu0 %v427_v26  ;;  %v1195_v50 = vadd.f32 %v1842_v59, %v1841_v4  ;;  %v1858_v59 = vsel %vm1116_vm5, 1.0, %v3770_v2  ;;  %vm1117_vm8 = vcmp.gt.f32.partialorder %v2724_v3, %v1067_v58  ;;  %v1857_v26 = vsel %vm1115_vm6, 1.0, %v3770_v2 }
 0x108   :  { %v2729_v51 = vpop.f32.mrf.mxu0  ;;  %v2731_v1 = vpop.f32.mrf.mxu1  ;;  %v1219_v0 = vadd.f32 %v1858_v59, %v1857_v26  ;;  %v1859_v23 = vsel %vm1117_vm8, 1.0, %v3770_v2  ;;  %vm1101_vm10 = vcmp.gt.f32.partialorder %v2722_v27, %v1027_v5 }
 0x109   :  { %1196 = vadd.xlane.f32.xlu1 %v1195_v50  ;;  %v454_v57 = vmax.f32 %v2724_v3, %v2731_v1  ;;  %vm1118_vm7 = vcmp.gt.f32.partialorder %v2731_v1, %v1067_v58  ;;  %vm1102_vm9 = vcmp.gt.f32.partialorder %v2729_v51, %v1027_v5  ;;  %v430_v58 = vmax.f32 %v2722_v27, %v2729_v51 }
 0x10a   :  { %v2739_v43 = vpop.f32.mrf.mxu0  ;;  %v2743_v4 = vpop.f32.mrf.mxu1  ;;  %v1860_v42 = vsel %vm1118_vm7, 1.0, %v3770_v2  ;;  %v1843_v59 = vsel %vm1101_vm10, 1.0, %v3770_v2 }
 0x10b   :  { %452 = vmax.xlane.f32.xlu0 %v451_v6  ;;  %v1222_v49 = vadd.f32 %v1860_v42, %v1859_v23  ;;  %vm1103_vm12 = vcmp.gt.f32.partialorder %v2739_v43, %v2698_v7 }
 0x10c   :  { %v2745_v50 = vpop.f32.mrf.mxu0  ;;  %v2751_v56 = vpop.f32.mrf.mxu1  ;;  %v1845_v39 = vsel %vm1103_vm12, 1.0, %v3770_v2 }
 0x10d   :  { %455 = vmax.xlane.f32.xlu1 %v454_v57  ;;  %v433_v63 = vmax.f32 %v2739_v43, %v2745_v50  ;;  %v1844_v57 = vsel %vm1102_vm9, 1.0, %v3770_v2  ;;  %v457_v23 = vmax.f32 %v2743_v4, %v2751_v56  ;;  %vm1104_vm11 = vcmp.gt.f32.partialorder %v2745_v50, %v2698_v7 }
 0x10e   :  { %v2753_v6 = vpop.f32.mrf.mxu0  ;;  %v1198_v26 = vadd.f32 %v1844_v57, %v1843_v59  ;;  %v1846_v57 = vsel %vm1104_vm11, 1.0, %v3770_v2  ;;  %v1077_v59 = vpop.permute.xlu0 %1076 }
 0x10f   :  { %1220 = vadd.xlane.f32.xlu0 %v1219_v0  ;;  %v2761_v0 = vpop.f32.mrf.mxu1  ;;  %vm1105_vm14 = vcmp.gt.f32.partialorder %v2753_v6, %v2700_v8  ;;  %v1201_v55 = vadd.f32 %v1846_v57, %v1845_v39 }
 0x110   :  { %v2763_v42 = vpop.f32.mrf.mxu0  ;;  %vm1121_vm4 = vcmp.gt.f32.partialorder %v2761_v0, %v1077_v59 }
 0x111   :  { %1223 = vadd.xlane.f32.xlu1 %v1222_v49  ;;  %v436_v49 = vmax.f32 %v2753_v6, %v2763_v42  ;;  %v2772_v5 = vpop.f32.mrf.mxu1  ;;  %vm1106_vm13 = vcmp.gt.f32.partialorder %v2763_v42, %v2700_v8 }
 0x112   :  { %v460_v48 = vmax.f32 %v2761_v0, %v2772_v5  ;;  %v1848_v7 = vsel %vm1106_vm13, 1.0, %v3770_v2  ;;  %vm1122_vm3 = vcmp.gt.f32.partialorder %v2772_v5, %v1077_v59 }
 0x113   :  { %431 = vmax.xlane.f32.xlu0 %v430_v58  ;;  %v2774_v58 = vpop.f32.mrf.mxu0  ;;  %v1864_v39 = vsel %vm1122_vm3, 1.0, %v3770_v2 }
 0x114   :  { %vm1107_vm6 = vcmp.gt.f32.partialorder %v2774_v58, %v2702_v9 }
 0x115   :  { %434 = vmax.xlane.f32.xlu1 %v433_v63  ;;  %v1072_v63 = vpop.permute.xlu1 %1071  ;;  %v1849_v52 = vsel %vm1107_vm6, 1.0, %v3770_v2 }
 0x116   :  { %vm1120_vm15 = vcmp.gt.f32.partialorder %v2751_v56, %v1072_v63  ;;  %vm1119_vm0 = vcmp.gt.f32.partialorder %v2743_v4, %v1072_v63  ;;  %v1863_v63 = vsel %vm1121_vm4, 1.0, %v3770_v2 }
 0x117   :  { %1199 = vadd.xlane.f32.xlu0 %v1198_v26  ;;  %v2786_v26 = vpop.f32.mrf.mxu1  ;;  %v1862_v8 = vsel %vm1120_vm15, 1.0, %v3770_v2  ;;  %v1861_v54 = vsel %vm1119_vm0, 1.0, %v3770_v2  ;;  %v1228_v57 = vadd.f32 %v1864_v39, %v1863_v63 }
 0x119   :  { %437 = vmax.xlane.f32.xlu1 %v436_v49  ;;  %v2788_v49 = vpop.f32.mrf.mxu0  ;;  %v2797_v62 = vpop.f32.mrf.mxu1 }
 0x11a   :  { %vm1108_vm5 = vcmp.gt.f32.partialorder %v2788_v49, %v2702_v9 }
 0x11b   :  { %458 = vmax.xlane.f32.xlu0 %v457_v23  ;;  %v1847_v23 = vsel %vm1105_vm14, 1.0, %v3770_v2  ;;  %v2799_v61 = vpop.f32.mrf.mxu0  ;;  %v1850_v63 = vsel %vm1108_vm5, 1.0, %v3770_v2 }
 0x11c   :  { %v1204_v38 = vadd.f32 %v1848_v7, %v1847_v23  ;;  %v2806_v7 = vpop.f32.mrf.mxu1  ;;  %vm1109_vm8 = vcmp.gt.f32.partialorder %v2799_v61, %v2704_v12  ;;  %v1207_v47 = vadd.f32 %v1850_v63, %v1849_v52 }
 0x11d   :  { %461 = vmax.xlane.f32.xlu1 %v460_v48  ;;  %v1225_v48 = vadd.f32 %v1862_v8, %v1861_v54  ;;  %v2808_v59 = vpop.f32.mrf.mxu0 }
 0x11e   :  { %v442_v23 = vmax.f32 %v2799_v61, %v2808_v59  ;;  %v2816_v54 = vpop.f32.mrf.mxu1  ;;  %vm1110_vm7 = vcmp.gt.f32.partialorder %v2808_v59, %v2704_v12 }
 0x11f   :  { %1202 = vadd.xlane.f32.xlu0 %v1201_v55  ;;  %v439_v55 = vmax.f32 %v2774_v58, %v2788_v49  ;;  %v2818_v8 = vpop.f32.mrf.mxu0  ;;  %v466_v39 = vmax.f32 %v2806_v7, %v2816_v54  ;;  %v1852_v9 = vsel %vm1110_vm7, 1.0, %v3770_v2  ;;  %vm1404_vm7 = vcmask 15360  }
 0x120   :  { %vm1111_vm14 = vcmp.gt.f32.partialorder %v2818_v8, %v2706_v13 }
 0x121   :  { %1205 = vadd.xlane.f32.xlu1 %v1204_v38  ;;  %v463_v38 = vmax.f32 %v2786_v26, %v2797_v62 }
 0x123   :  { %1226 = vadd.xlane.f32.xlu0 %v1225_v48  ;;  %v1082_v48 = vpop.permute.xlu1 %1081 }
 0x124   :  { %vm1124_vm9 = vcmp.gt.f32.partialorder %v2797_v62, %v1082_v48  ;;  %vm1123_vm10 = vcmp.gt.f32.partialorder %v2786_v26, %v1082_v48 }
 0x125   :  { %1229 = vadd.xlane.f32.xlu1 %v1228_v57  ;;  %v1087_v57 = vpop.permute.xlu0 %1086  ;;  %v1866_v12 = vsel %vm1124_vm9, 1.0, %v3770_v2  ;;  %v1865_v34 = vsel %vm1123_vm10, 1.0, %v3770_v2 }
 0x126   :  { %vm1126_vm11 = vcmp.gt.f32.partialorder %v2816_v54, %v1087_v57  ;;  %vm1125_vm12 = vcmp.gt.f32.partialorder %v2806_v7, %v1087_v57 }
 0x127   :  { %440 = vmax.xlane.f32.xlu0 %v439_v55  ;;  %v2830_v55 = vpop.f32.mrf.mxu1  ;;  %v1868_v52 = vsel %vm1126_vm11, 1.0, %v3770_v2  ;;  %v1867_v48 = vsel %vm1125_vm12, 1.0, %v3770_v2 }
 0x128   :  { %v1234_v63 = vadd.f32 %v1868_v52, %v1867_v48  ;;  %v1092_v52 = vpop.permute.xlu1 %1091 }
 0x129   :  { %443 = vmax.xlane.f32.xlu1 %v442_v23  ;;  %v2832_v23 = vpop.f32.mrf.mxu0  ;;  %v2841_v45 = vpop.f32.mrf.mxu1  ;;  %vm1127_vm4 = vcmp.gt.f32.partialorder %v2830_v55, %v1092_v52 }
 0x12a   :  { %vm1112_vm13 = vcmp.gt.f32.partialorder %v2832_v23, %v2706_v13  ;;  %vm1128_vm3 = vcmp.gt.f32.partialorder %v2841_v45, %v1092_v52  ;;  %v1097_v48 = vpop.permute.xlu0 %1096 }
 0x12b   :  { %464 = vmax.xlane.f32.xlu0 %v463_v38  ;;  %v1851_v38 = vsel %vm1109_vm8, 1.0, %v3770_v2  ;;  %v2843_v35 = vpop.f32.mrf.mxu0  ;;  %vm1421_vm8 = vcmask 23552  }
 0x12c   :  { %v1210_v46 = vadd.f32 %v1852_v9, %v1851_v38  ;;  %v2850_v9 = vpop.f32.mrf.mxu1  ;;  %vm1113_vm0 = vcmp.gt.f32.partialorder %v2843_v35, %v2708_v16 }
 0x12d   :  { %467 = vmax.xlane.f32.xlu1 %v466_v39  ;;  %v1231_v39 = vadd.f32 %v1866_v12, %v1865_v34  ;;  %v2852_v57 = vpop.f32.mrf.mxu0  ;;  %v1855_v13 = vsel %vm1113_vm0, 1.0, %v3770_v2  ;;  %vm1129_vm6 = vcmp.gt.f32.partialorder %v2850_v9, %v1097_v48 }
 0x12e   :  { %v448_v38 = vmax.f32 %v2843_v35, %v2852_v57  ;;  %v2860_v34 = vpop.f32.mrf.mxu1  ;;  %vm1114_vm15 = vcmp.gt.f32.partialorder %v2852_v57, %v2708_v16  ;;  %v1869_v16 = vsel %vm1127_vm4, 1.0, %v3770_v2 }
 0x12f   :  { %1208 = vadd.xlane.f32.xlu0 %v1207_v47  ;;  %v445_v47 = vmax.f32 %v2818_v8, %v2832_v23  ;;  %v472_v12 = vmax.f32 %v2850_v9, %v2860_v34  ;;  %vm1130_vm5 = vcmp.gt.f32.partialorder %v2860_v34, %v1097_v48 }
 0x130   :  { %v1872_v31 = vsel %vm1130_vm5, 1.0, %v3770_v2 }
 0x131   :  { %1211 = vadd.xlane.f32.xlu1 %v1210_v46  ;;  %v469_v46 = vmax.f32 %v2830_v55, %v2841_v45 }
 0x133   :  { %1232 = vadd.xlane.f32.xlu0 %v1231_v39  ;;  %v1854_v39 = vsel %vm1112_vm13, 1.0, %v3770_v2 }
 0x135   :  { %1235 = vadd.xlane.f32.xlu1 %v1234_v63  ;;  %v1853_v63 = vsel %vm1111_vm14, 1.0, %v3770_v2 }
 0x137   :  { %446 = vmax.xlane.f32.xlu0 %v445_v47  ;;  %v1856_v47 = vsel %vm1114_vm15, 1.0, %v3770_v2 }
 0x138   :  { %v1216_v30 = vadd.f32 %v1856_v47, %v1855_v13 }
 0x139   :  { %449 = vmax.xlane.f32.xlu1 %v448_v38  ;;  %v1213_v38 = vadd.f32 %v1854_v39, %v1853_v63 }
 0x13b   :  { %470 = vmax.xlane.f32.xlu0 %v469_v46  ;;  %v1870_v46 = vsel %vm1128_vm3, 1.0, %v3770_v2 }
 0x13c   :  { %v1237_v60 = vadd.f32 %v1870_v46, %v1869_v16 }
 0x13d   :  { %473 = vmax.xlane.f32.xlu1 %v472_v12  ;;  %v1871_v12 = vsel %vm1129_vm6, 1.0, %v3770_v2 }
 0x13e   :  { %v1240_v52 = vadd.f32 %v1872_v31, %v1871_v12 }
 0x13f   :  { %1214 = vadd.xlane.f32.xlu0 %v1213_v38 }
 0x141   :  { %1217 = vadd.xlane.f32.xlu1 %v1216_v30 }
 0x143   :  { %1238 = vadd.xlane.f32.xlu0 %v1237_v60 }
 0x145   :  { %1241 = vadd.xlane.f32.xlu1 %v1240_v52 }
 0x190   :  { %v429_v39 = vpop.xlane.xlu0 %428 }
 0x191   :  { %v2883_v63 = vmax.f32 %v2273_v10, %v429_v39 }
 0x192   :  { %v1197_v53 = vpop.xlane.xlu1 %1196 }
 0x193   :  { %541 = vperm.xlu0 %1976, %v2883_v63   ;;  %v2887_v48 = vadd.f32 %v1197_v53, %v2273_v10 }
 0x194   :  { %v453_v47 = vpop.xlane.xlu0 %452 }
 0x195   :  { %3771 = vst [vmem:[#allocation37_spill] sm:$0xff] %v2887_v48  ;;  %v2890_v38 = vmax.f32 %v2359_v28, %v453_v47 }
 0x196   :  { %v456_v30 = vpop.xlane.xlu1 %455 }
 0x197   :  { %581 = vperm.xlu1 %1977, %v2890_v38   ;;  %1650 = vrot.lane.b32.xlu0 %v2887_v48, %s2194_s6  ;;  %v2903_v53 = vmax.f32 %v2361_v29, %v456_v30 }
 0x198   :  { %v1221_v31 = vpop.xlane.xlu0 %1220 }
 0x199   :  { %v2896_v60 = vadd.f32 %v1221_v31, %v2359_v28 }
 0x19a   :  { %v2898_v2 = vpop.xlane.xlu1 %1223 }
 0x19b   :  { %3772 = vst [vmem:[#allocation38_spill] sm:$0xff] %v2896_v60  ;;  %1666 = vrot.lane.b32.xlu0 %v2896_v60, %s2194_s6 }
 0x19c   :  { %v432_v10 = vpop.xlane.xlu0 %431 }
 0x19d   :  { %v2906_v13 = vmax.f32 %v2275_v11, %v432_v10 }
 0x19e   :  { %v435_v46 = vpop.xlane.xlu1 %434 }
 0x19f   :  { %546 = vperm.xlu1 %1977, %v2906_v13   ;;  %586 = vperm.xlu0 %1976, %v2903_v53   ;;  %v2911_v28 = vmax.f32 %v2291_v14, %v435_v46 }
 0x1a0   :  { %v1200_v16 = vpop.xlane.xlu0 %1199 }
 0x1a1   :  { %v2914_v12 = vadd.f32 %v1200_v16, %v2275_v11 }
 0x1a2   :  { %v438_v52 = vpop.xlane.xlu1 %437 }
 0x1a3   :  { %3773 = vst [vmem:[#allocation39_spill] sm:$0xff] %v2914_v12  ;;  %1652 = vrot.lane.b32.xlu0 %v2914_v12, %s2194_s6  ;;  %551 = vperm.xlu1 %1977, %v2911_v28   ;;  %v2924_v31 = vmax.f32 %v2293_v15, %v438_v52 }
 0x1a4   :  { %v459_v29 = vpop.xlane.xlu0 %458 }
 0x1a5   :  { %v2920_v39 = vmax.f32 %v2377_v32, %v459_v29 }
 0x1a6   :  { %v462_v47 = vpop.xlane.xlu1 %461 }
 0x1a7   :  { %591 = vperm.xlu1 %1977, %v2920_v39   ;;  %v2935_v32 = vmax.f32 %v2379_v33, %v462_v47 }
 0x1a8   :  { %v1203_v30 = vpop.xlane.xlu0 %1202 }
 0x1a9   :  { %v2927_v11 = vadd.f32 %v1203_v30, %v2291_v14 }
 0x1aa   :  { %v1206_v10 = vpop.xlane.xlu1 %1205 }
 0x1ab   :  { %3774 = vst [vmem:[#allocation40_spill] sm:$0xff] %v2927_v11  ;;  %1654 = vrot.lane.b32.xlu0 %v2927_v11, %s2194_s6  ;;  %556 = vperm.xlu1 %1977, %v2924_v31   ;;  %v2941_v29 = vadd.f32 %v1206_v10, %v2293_v15 }
 0x1ac   :  { %v2932_v46 = vpop.xlane.xlu0 %1226 }
 0x1ad   :  { %3775 = vst [vmem:[#allocation41_spill] sm:$0xff] %v2941_v29 }
 0x1ae   :  { %v2937_v16 = vpop.xlane.xlu1 %1229 }
 0x1af   :  { %596 = vperm.xlu0 %1976, %v2935_v32  }
 0x1b0   :  { %v441_v52 = vpop.xlane.xlu0 %440 }
 0x1b1   :  { %v2944_v14 = vmax.f32 %v2319_v20, %v441_v52 }
 0x1b2   :  { %v444_v30 = vpop.xlane.xlu1 %443 }
 0x1b3   :  { %3776 = vst [vmem:[#allocation42_spill] sm:$0xff] %v2944_v14  ;;  %561 = vperm.xlu1 %1977, %v2944_v14   ;;  %1656 = vrot.lane.b32.xlu0 %v2941_v29, %s2194_s6  ;;  %v2954_v15 = vmax.f32 %v2321_v21, %v444_v30 }
 0x1b4   :  { %v465_v12 = vpop.xlane.xlu0 %464 }
 0x1b5   :  { %v2950_v33 = vmax.f32 %v2395_v36, %v465_v12  ;;  %3778 = vst [vmem:[#allocation44_spill] sm:$0xff] %v2954_v15 }
 0x1b6   :  { %v468_v47 = vpop.xlane.xlu1 %467 }
 0x1b7   :  { %3777 = vst [vmem:[#allocation43_spill] sm:$0xff] %v2950_v33  ;;  %601 = vperm.xlu1 %1977, %v2950_v33   ;;  %v2965_v36 = vmax.f32 %v2397_v37, %v468_v47 }
 0x1b8   :  { %v1209_v11 = vpop.xlane.xlu0 %1208 }
 0x1b9   :  { %v2957_v10 = vadd.f32 %v1209_v11, %v2319_v20  ;;  %3780 = vst [vmem:[#allocation46_spill] sm:$0xff] %v2965_v36 }
 0x1ba   :  { %v1212_v52 = vpop.xlane.xlu1 %1211 }
 0x1bb   :  { %3779 = vst [vmem:[#allocation45_spill] sm:$0xff] %v2957_v10  ;;  %1658 = vrot.lane.b32.xlu0 %v2957_v10, %s2194_s6  ;;  %566 = vperm.xlu1 %1977, %v2954_v15   ;;  %v2971_v48 = vadd.f32 %v1212_v52, %v2321_v21 }
 0x1bc   :  { %v2962_v29 = vpop.xlane.xlu0 %1232 }
 0x1bd   :  { %3782 = vst [vmem:[#allocation48_spill] sm:$0xff] %v2971_v48 }
 0x1be   :  { %v2967_v12 = vpop.xlane.xlu1 %1235 }
 0x1bf   :  { %3781 = vst [vmem:[#allocation47_spill] sm:$0xff] %v2967_v12  ;;  %606 = vperm.xlu0 %1976, %v2965_v36  }
 0x1c0   :  { %v447_v30 = vpop.xlane.xlu0 %446 }
 0x1c1   :  { %v2974_v20 = vmax.f32 %v2341_v24, %v447_v30 }
 0x1c2   :  { %v450_v11 = vpop.xlane.xlu1 %449 }
 0x1c3   :  { %3783 = vst [vmem:[#allocation49_spill] sm:$0xff] %v2974_v20  ;;  %571 = vperm.xlu1 %1977, %v2974_v20   ;;  %1660 = vrot.lane.b32.xlu0 %v2971_v48, %s2194_s6  ;;  %v2984_v21 = vmax.f32 %v2343_v25, %v450_v11 }
 0x1c4   :  { %v471_v10 = vpop.xlane.xlu0 %470 }
 0x1c5   :  { %v2980_v37 = vmax.f32 %v2413_v40, %v471_v10  ;;  %3785 = vst [vmem:[#allocation51_spill] sm:$0xff] %v2984_v21 }
 0x1c6   :  { %v474_v47 = vpop.xlane.xlu1 %473 }
 0x1c7   :  { %3784 = vst [vmem:[#allocation50_spill] sm:$0xff] %v2980_v37  ;;  %611 = vperm.xlu1 %1977, %v2980_v37   ;;  %v2993_v30 = vmax.f32 %v2415_v41, %v474_v47 }
 0x1c8   :  { %v1215_v60 = vpop.xlane.xlu0 %1214 }
 0x1c9   :  { %v2987_v52 = vadd.f32 %v1215_v60, %v2341_v24  ;;  %3787 = vst [vmem:[#allocation53_spill] sm:$0xff] %v2993_v30 }
 0x1ca   :  { %v1218_v40 = vpop.xlane.xlu1 %1217 }
 0x1cb   :  { %3786 = vst [vmem:[#allocation52_spill] sm:$0xff] %v2987_v52  ;;  %1662 = vrot.lane.b32.xlu0 %v2987_v52, %s2194_s6  ;;  %576 = vperm.xlu1 %1977, %v2984_v21   ;;  %v2997_v10 = vadd.f32 %v1218_v40, %v2343_v25 }
 0x1cc   :  { %v3001_v11 = vpop.xlane.xlu0 %1238 }
 0x1cd   :  { %3788 = vst [vmem:[#allocation54_spill] sm:$0xff] %v2997_v10  ;;  %3789 = vst [vmem:[#allocation55_spill] sm:$0xff] %v3001_v11 }
 0x1ce   :  { %v3003_v24 = vpop.xlane.xlu1 %1241 }
 0x1cf   :  { %616 = vperm.xlu0 %1976, %v2993_v30   ;;  %3790 = vst [vmem:[#allocation56_spill] sm:$0xff] %v3003_v24 }
 0x1d3   :  { %1664 = vrot.lane.b32.xlu0 %v2997_v10, %s2194_s6 }
 0x20e   :  { %v542_v60 = vpop.permute.xlu0 %541 }
 0x20f   :  { %v619_v52 = vsub.f32 %v2710_v17, %v542_v60  ;;  %v620_v48 = vsub.f32 %v2715_v19, %v542_v60 }
 0x211   :  { %v651_v41 = vmul.f32 1.442695, %v619_v52  ;;  %v653_v47 = vmul.f32 1.442695, %v620_v48 }
 0x212   :  { %v3007_v37 = vpop.permute.xlu0 %1650  ;;  %v582_v30 = vpop.permute.xlu1 %581 }
 0x213   :  { %3791 = vst [vmem:[#allocation57_spill] sm:$0xff] %v3007_v37  ;;  %1978 = vpow2.f32 %v651_v41  ;;  %v635_v25 = vsub.f32 %v2712_v18, %v582_v30  ;;  %v636_v40 = vsub.f32 %v2717_v22, %v582_v30 }
 0x214   :  { %1980 = vpow2.f32 %v653_v47 }
 0x215   :  { %v683_v10 = vmul.f32 1.442695, %v635_v25  ;;  %v685_v21 = vmul.f32 1.442695, %v636_v40 }
 0x216   :  { %v3011_v20 = vpop.permute.xlu0 %1666 }
 0x217   :  { %3792 = vst [vmem:[#allocation58_spill] sm:$0xff] %v3011_v20  ;;  %1982 = vpow2.f32 %v683_v10 }
 0x218   :  { %1984 = vpow2.f32 %v685_v21 }
 0x21a   :  { %v587_v24 = vpop.permute.xlu0 %586  ;;  %v547_v36 = vpop.permute.xlu1 %546 }
 0x21b   :  { %v637_v52 = vsub.f32 %v2724_v3, %v587_v24  ;;  %v638_v48 = vsub.f32 %v2731_v1, %v587_v24  ;;  %v621_v60 = vsub.f32 %v2722_v27, %v547_v36  ;;  %v622_v41 = vsub.f32 %v2729_v51, %v547_v36 }
 0x21d   :  { %v687_v37 = vmul.f32 1.442695, %v637_v52  ;;  %v689_v11 = vmul.f32 1.442695, %v638_v48  ;;  %v655_v30 = vmul.f32 1.442695, %v621_v60 }
 0x21e   :  { %v657_v47 = vmul.f32 1.442695, %v622_v41  ;;  %v552_v25 = vpop.permute.xlu1 %551  ;;  %v3018_v21 = vpop.permute.xlu0 %1652 }
 0x21f   :  { %1986 = vpow2.f32 %v687_v37  ;;  %v623_v40 = vsub.f32 %v2739_v43, %v552_v25  ;;  %3793 = vst [vmem:[#allocation59_spill] sm:$0xff] %v3018_v21  ;;  %v624_v20 = vsub.f32 %v2745_v50, %v552_v25 }
 0x220   :  { %v1979_v10 = vpop.eup %1978  ;;  %1988 = vpow2.f32 %v689_v11 }
 0x221   :  { %v1981_v33 = vpop.eup %1980  ;;  %1990 = vpow2.f32 %v655_v30  ;;  %v923_v24 = vmul.f32 %v1979_v10, %v2710_v17  ;;  %v659_v60 = vmul.f32 1.442695, %v623_v40  ;;  %v661_v11 = vmul.f32 1.442695, %v624_v20 }
 0x222   :  { %1992 = vpow2.f32 %v657_v47  ;;  %v592_v36 = vpop.permute.xlu1 %591  ;;  %v795_v52 = vadd.f32 %v1981_v33, %v1979_v10  ;;  %v924_v48 = vmul.f32 %v1981_v33, %v2715_v19  ;;  %v3025_v12 = vpop.permute.xlu0 %1654 }
 0x223   :  { %v639_v37 = vsub.f32 %v2743_v4, %v592_v36  ;;  %v640_v41 = vsub.f32 %v2751_v56, %v592_v36  ;;  %3794 = vst [vmem:[#allocation60_spill] sm:$0xff] %v3025_v12  ;;  %1994 = vpow2.f32 %v659_v60 }
 0x224   :  { %v1983_v15 = vpop.eup %1982  ;;  %796 = vadd.xlane.f32.xlu1 %v795_v52  ;;  %v955_v25 = vadd.f32 %v924_v48, %v923_v24  ;;  %1996 = vpow2.f32 %v661_v11 }
 0x225   :  { %v1985_v21 = vpop.eup %1984  ;;  %v691_v14 = vmul.f32 1.442695, %v639_v37  ;;  %v693_v30 = vmul.f32 1.442695, %v640_v41  ;;  %v939_v10 = vmul.f32 %v1983_v15, %v2712_v18 }
 0x226   :  { %v557_v17 = vpop.permute.xlu1 %556  ;;  %v819_v47 = vadd.f32 %v1985_v21, %v1983_v15  ;;  %v940_v19 = vmul.f32 %v1985_v21, %v2717_v22 }
 0x227   :  { %v625_v33 = vsub.f32 %v2753_v6, %v557_v17  ;;  %v626_v40 = vsub.f32 %v2763_v42, %v557_v17  ;;  %1998 = vpow2.f32 %v691_v14 }
 0x228   :  { %956 = vadd.xlane.f32.xlu1 %v955_v25  ;;  %820 = vadd.xlane.f32.xlu0 %v819_v47  ;;  %2000 = vpow2.f32 %v693_v30  ;;  %v979_v52 = vadd.f32 %v940_v19, %v939_v10 }
 0x229   :  { %v663_v20 = vmul.f32 1.442695, %v625_v33  ;;  %v665_v24 = vmul.f32 1.442695, %v626_v40 }
 0x22a   :  { %v597_v36 = vpop.permute.xlu0 %596 }
 0x22b   :  { %2002 = vpow2.f32 %v663_v20  ;;  %v641_v48 = vsub.f32 %v2761_v0, %v597_v36  ;;  %v642_v18 = vsub.f32 %v2772_v5, %v597_v36 }
 0x22c   :  { %v1987_v22 = vpop.eup %1986  ;;  %2004 = vpow2.f32 %v665_v24  ;;  %980 = vadd.xlane.f32.xlu0 %v979_v52 }
 0x22d   :  { %v1989_v15 = vpop.eup %1988  ;;  %v695_v21 = vmul.f32 1.442695, %v641_v48  ;;  %v697_v60 = vmul.f32 1.442695, %v642_v18  ;;  %v941_v14 = vmul.f32 %v1987_v22, %v2724_v3 }
 0x22e   :  { %v1991_v37 = vpop.eup %1990  ;;  %v562_v41 = vpop.permute.xlu1 %561  ;;  %v822_v11 = vadd.f32 %v1989_v15, %v1987_v22  ;;  %v942_v25 = vmul.f32 %v1989_v15, %v2731_v1 }
 0x22f   :  { %v1993_v30 = vpop.eup %1992  ;;  %2006 = vpow2.f32 %v695_v21  ;;  %v627_v17 = vsub.f32 %v2774_v58, %v562_v41  ;;  %v628_v47 = vsub.f32 %v2788_v49, %v562_v41  ;;  %v3037_v10 = vpop.permute.xlu0 %1656  ;;  %v925_v33 = vmul.f32 %v1991_v37, %v2722_v27 }
 0x230   :  { %2008 = vpow2.f32 %v697_v60  ;;  %3795 = vst [vmem:[#allocation61_spill] sm:$0xff] %v3037_v10  ;;  %823 = vadd.xlane.f32.xlu1 %v822_v11  ;;  %v798_v19 = vadd.f32 %v1993_v30, %v1991_v37  ;;  %v926_v40 = vmul.f32 %v1993_v30, %v2729_v51  ;;  %v982_v3 = vadd.f32 %v942_v25, %v941_v14  ;;  %v1995_v52 = vpop.eup %1994 }
 0x231   :  { %v667_v24 = vmul.f32 1.442695, %v627_v17  ;;  %v669_v48 = vmul.f32 1.442695, %v628_v47  ;;  %v1997_v22 = vpop.eup %1996 }
 0x232   :  { %799 = vadd.xlane.f32.xlu0 %v798_v19  ;;  %v602_v20 = vpop.permute.xlu1 %601  ;;  %v958_v18 = vadd.f32 %v926_v40, %v925_v33  ;;  %v801_v25 = vadd.f32 %v1997_v22, %v1995_v52 }
 0x233   :  { %v643_v1 = vsub.f32 %v2786_v26, %v602_v20  ;;  %v644_v36 = vsub.f32 %v2797_v62, %v602_v20  ;;  %v3043_v60 = vpop.permute.xlu0 %1658  ;;  %2010 = vpow2.f32 %v667_v24 }
 0x234   :  { %983 = vadd.xlane.f32.xlu1 %v982_v3  ;;  %v1999_v21 = vpop.eup %1998  ;;  %3796 = vst [vmem:[#allocation62_spill] sm:$0xff] %v3043_v60  ;;  %2012 = vpow2.f32 %v669_v48 }
 0x235   :  { %v699_v15 = vmul.f32 1.442695, %v643_v1  ;;  %v701_v27 = vmul.f32 1.442695, %v644_v36  ;;  %v2001_v37 = vpop.eup %2000  ;;  %v927_v1 = vmul.f32 %v1995_v52, %v2739_v43  ;;  %v928_v36 = vmul.f32 %v1997_v22, %v2745_v50 }
 0x236   :  { %959 = vadd.xlane.f32.xlu0 %v958_v18  ;;  %v567_v51 = vpop.permute.xlu1 %566  ;;  %v825_v24 = vadd.f32 %v2001_v37, %v1999_v21  ;;  %v943_v50 = vmul.f32 %v1999_v21, %v2743_v4  ;;  %v944_v52 = vmul.f32 %v2001_v37, %v2751_v56 }
 0x237   :  { %v629_v41 = vsub.f32 %v2799_v61, %v567_v51  ;;  %v630_v11 = vsub.f32 %v2808_v59, %v567_v51  ;;  %2014 = vpow2.f32 %v699_v15  ;;  %v961_v43 = vadd.f32 %v928_v36, %v927_v1 }
 0x238   :  { %v2003_v14 = vpop.eup %2002  ;;  %2016 = vpow2.f32 %v701_v27 }
 0x239   :  { %v2005_v30 = vpop.eup %2004  ;;  %v671_v17 = vmul.f32 1.442695, %v629_v41  ;;  %v673_v47 = vmul.f32 1.442695, %v630_v11  ;;  %v929_v41 = vmul.f32 %v2003_v14, %v2753_v6 }
 0x23a   :  { %802 = vadd.xlane.f32.xlu0 %v801_v25  ;;  %v607_v19 = vpop.permute.xlu0 %606  ;;  %v804_v33 = vadd.f32 %v2005_v30, %v2003_v14  ;;  %v930_v11 = vmul.f32 %v2005_v30, %v2763_v42 }
 0x23b   :  { %2018 = vpow2.f32 %v671_v17  ;;  %v645_v40 = vsub.f32 %v2806_v7, %v607_v19  ;;  %v646_v20 = vsub.f32 %v2816_v54, %v607_v19 }
 0x23c   :  { %v2007_v3 = vpop.eup %2006  ;;  %2020 = vpow2.f32 %v673_v47  ;;  %805 = vadd.xlane.f32.xlu1 %v804_v33  ;;  %v964_v14 = vadd.f32 %v930_v11, %v929_v41 }
 0x23d   :  { %v2009_v48 = vpop.eup %2008  ;;  %v703_v18 = vmul.f32 1.442695, %v645_v40  ;;  %v705_v15 = vmul.f32 1.442695, %v646_v20  ;;  %v945_v42 = vmul.f32 %v2007_v3, %v2761_v0 }
 0x23e   :  { %826 = vadd.xlane.f32.xlu0 %v825_v24  ;;  %v572_v27 = vpop.permute.xlu1 %571  ;;  %v828_v51 = vadd.f32 %v2009_v48, %v2007_v3  ;;  %v3055_v47 = vpop.permute.xlu0 %1660  ;;  %v946_v30 = vmul.f32 %v2009_v48, %v2772_v5  ;;  %v985_v24 = vadd.f32 %v944_v52, %v943_v50 }
 0x23f   :  { %2022 = vpow2.f32 %v703_v18  ;;  %v631_v25 = vsub.f32 %v2818_v8, %v572_v27  ;;  %v632_v17 = vsub.f32 %v2832_v23, %v572_v27  ;;  %3797 = vst [vmem:[#allocation63_spill] sm:$0xff] %v3055_v47 }
 0x240   :  { %2024 = vpow2.f32 %v705_v15  ;;  %829 = vadd.xlane.f32.xlu1 %v828_v51  ;;  %v2011_v20 = vpop.eup %2010  ;;  %v988_v0 = vadd.f32 %v946_v30, %v945_v42 }
 0x241   :  { %v675_v22 = vmul.f32 1.442695, %v631_v25  ;;  %v677_v19 = vmul.f32 1.442695, %v632_v17  ;;  %v2013_v1 = vpop.eup %2012 }
 0x242   :  { %962 = vadd.xlane.f32.xlu0 %v961_v43  ;;  %v612_v6 = vpop.permute.xlu1 %611  ;;  %v3063_v37 = vpop.permute.xlu0 %1662  ;;  %v807_v15 = vadd.f32 %v2013_v1, %v2011_v20 }
 0x243   :  { %v647_v33 = vsub.f32 %v2830_v55, %v612_v6  ;;  %v648_v40 = vsub.f32 %v2841_v45, %v612_v6  ;;  %2026 = vpow2.f32 %v675_v22  ;;  %3798 = vst [vmem:[#allocation64_spill] sm:$0xff] %v3063_v37  ;;  %v931_v22 = vmul.f32 %v2011_v20, %v2774_v58 }
 0x244   :  { %965 = vadd.xlane.f32.xlu1 %v964_v14  ;;  %v2015_v21 = vpop.eup %2014  ;;  %2028 = vpow2.f32 %v677_v19  ;;  %v932_v19 = vmul.f32 %v2013_v1, %v2788_v49 }
 0x245   :  { %v707_v4 = vmul.f32 1.442695, %v647_v33  ;;  %v709_v56 = vmul.f32 1.442695, %v648_v40  ;;  %v2017_v3 = vpop.eup %2016 }
 0x246   :  { %986 = vadd.xlane.f32.xlu0 %v985_v24  ;;  %v577_v36 = vpop.permute.xlu1 %576  ;;  %v831_v52 = vadd.f32 %v2017_v3, %v2015_v21  ;;  %v967_v24 = vadd.f32 %v932_v19, %v931_v22  ;;  %v2140_v22 = vld [vmem:[#allocation2] sm:$0xff] }
 0x247   :  { %2030 = vpow2.f32 %v707_v4  ;;  %v633_v5 = vsub.f32 %v2843_v35, %v577_v36  ;;  %v634_v48 = vsub.f32 %v2852_v57, %v577_v36  ;;  %v947_v4 = vmul.f32 %v2015_v21, %v2786_v26 }
 0x248   :  { %v2019_v18 = vpop.eup %2018  ;;  %2032 = vpow2.f32 %v709_v56  ;;  %989 = vadd.xlane.f32.xlu1 %v988_v0  ;;  %v948_v56 = vmul.f32 %v2017_v3, %v2797_v62  ;;  %v491_v19 = vsub.f32 %v2140_v22, %v2883_v63  ;;  %v3806_v22 = vld [vmem:[#allocation43_spill] sm:$0xff] }
 0x249   :  { %v2021_v27 = vpop.eup %2020  ;;  %v679_v51 = vmul.f32 1.442695, %v633_v5  ;;  %v681_v41 = vmul.f32 1.442695, %v634_v48  ;;  %v933_v33 = vmul.f32 %v2019_v18, %v2799_v61 }
 0x24a   :  { %808 = vadd.xlane.f32.xlu0 %v807_v15  ;;  %v617_v11 = vpop.permute.xlu0 %616  ;;  %v810_v25 = vadd.f32 %v2021_v27, %v2019_v18  ;;  %v934_v40 = vmul.f32 %v2021_v27, %v2808_v59  ;;  %v991_v61 = vadd.f32 %v948_v56, %v947_v4 }
 0x24b   :  { %2034 = vpow2.f32 %v679_v51  ;;  %v649_v17 = vsub.f32 %v2850_v9, %v617_v11  ;;  %v650_v43 = vsub.f32 %v2860_v34, %v617_v11 }
 0x24c   :  { %v2023_v50 = vpop.eup %2022  ;;  %2036 = vpow2.f32 %v681_v41  ;;  %811 = vadd.xlane.f32.xlu1 %v810_v25  ;;  %v970_v49 = vadd.f32 %v934_v40, %v933_v33  ;;  %v2143_v33 = vld [vmem:[#allocation2 + $0x50] sm:$0xff] }
 0x24d   :  { %v2025_v6 = vpop.eup %2024  ;;  %v711_v14 = vmul.f32 1.442695, %v649_v17  ;;  %v713_v42 = vmul.f32 1.442695, %v650_v43  ;;  %v949_v20 = vmul.f32 %v2023_v50, %v2806_v7  ;;  %v3095_v40 = vadd.f32 %v2143_v33, %v2932_v46 }
 0x24e   :  { %832 = vadd.xlane.f32.xlu0 %v831_v52  ;;  %v834_v30 = vadd.f32 %v2025_v6, %v2023_v50  ;;  %v950_v1 = vmul.f32 %v2025_v6, %v2816_v54  ;;  %v507_v6 = vmul.f32 1.442695, %v491_v19 }
 0x24f   :  { %2038 = vpow2.f32 %v711_v14 }
 0x250   :  { %2040 = vpow2.f32 %v713_v42  ;;  %835 = vadd.xlane.f32.xlu1 %v834_v30  ;;  %v2027_v58 = vpop.eup %2026  ;;  %v994_v48 = vadd.f32 %v950_v1, %v949_v20 }
 0x251   :  { %v2029_v36 = vpop.eup %2028  ;;  %v935_v27 = vmul.f32 %v2027_v58, %v2818_v8  ;;  %v2138_v8 = vld [vmem:[#allocation2 + $0x48] sm:$0xff] }
 0x252   :  { %968 = vadd.xlane.f32.xlu0 %v967_v24  ;;  %v813_v62 = vadd.f32 %v2029_v36, %v2027_v58  ;;  %v936_v51 = vmul.f32 %v2029_v36, %v2832_v23  ;;  %v3086_v23 = vadd.f32 %v2138_v8, %v2898_v2  ;;  %v2142_v2 = vld [vmem:[#allocation2 + $0x10] sm:$0xff]  ;;  %v2144_v24 = vld [vmem:[#allocation2 + $0x18] sm:$0xff]  ;;  %v500_v58 = vsub.f32 %v2138_v8, %v2903_v53 }
 0x253   :  { %v493_v30 = vsub.f32 %v2142_v2, %v2911_v28  ;;  %v494_v4 = vsub.f32 %v2144_v24, %v2924_v31  ;;  %v501_v36 = vsub.f32 %v2143_v33, %v2920_v39  ;;  %v3805_v8 = vld [vmem:[#allocation44_spill] sm:$0xff]  ;;  %v3809_v2 = vld [vmem:[#allocation46_spill] sm:$0xff]  ;;  %v3810_v33 = vld [vmem:[#allocation7_spill] sm:$0xff] }
 0x254   :  { %v2031_v0 = vpop.eup %2030  ;;  %971 = vadd.xlane.f32.xlu1 %v970_v49  ;;  %v973_v25 = vadd.f32 %v936_v51, %v935_v27  ;;  %v3099_v49 = vpop.permute.xlu0 %1664 }
 0x255   :  { %v2033_v59 = vpop.eup %2032  ;;  %v951_v5 = vmul.f32 %v2031_v0, %v2830_v55  ;;  %3799 = vst [vmem:[#allocation65_spill] sm:$0xff] %v3099_v49  ;;  %v511_v1 = vmul.f32 1.442695, %v493_v30 }
 0x256   :  { %992 = vadd.xlane.f32.xlu0 %v991_v61  ;;  %v952_v26 = vmul.f32 %v2033_v59, %v2841_v45  ;;  %v837_v54 = vadd.f32 %v2033_v59, %v2031_v0  ;;  %v2145_v0 = vld [vmem:[#allocation2 + $0x58] sm:$0xff]  ;;  %v513_v61 = vmul.f32 1.442695, %v494_v4 }
 0x257   :  { %v3107_v46 = vadd.f32 %v2145_v0, %v2937_v16  ;;  %v502_v59 = vsub.f32 %v2145_v0, %v2935_v32  ;;  %v3152_v0 = vld [vmem:[#allocation2 + $0x78] sm:$0xff] }
 0x258   :  { %v2035_v21 = vpop.eup %2034  ;;  %995 = vadd.xlane.f32.xlu1 %v994_v48  ;;  %v997_v3 = vadd.f32 %v952_v26, %v951_v5  ;;  %v525_v26 = vmul.f32 1.442695, %v500_v58 }
 0x259   :  { %v2037_v18 = vpop.eup %2036  ;;  %v937_v11 = vmul.f32 %v2035_v21, %v2843_v35  ;;  %v2139_v35 = vld [vmem:[#allocation2 + $0x40] sm:$0xff] }
 0x25a   :  { %814 = vadd.xlane.f32.xlu0 %v813_v62  ;;  %v816_v7 = vadd.f32 %v2037_v18, %v2035_v21  ;;  %v938_v45 = vmul.f32 %v2037_v18, %v2852_v57  ;;  %v499_v57 = vsub.f32 %v2139_v35, %v2890_v38  ;;  %v527_v62 = vmul.f32 1.442695, %v501_v36  ;;  %v2146_v18 = vld [vmem:[#allocation2 + $0x60] sm:$0xff] }
 0x25b   :  { %v503_v19 = vsub.f32 %v2146_v18, %v3806_v22 }
 0x25c   :  { %v2039_v15 = vpop.eup %2038  ;;  %817 = vadd.xlane.f32.xlu1 %v816_v7  ;;  %v976_v17 = vadd.f32 %v938_v45, %v937_v11  ;;  %v3116_v7 = vadd.f32 %v2146_v18, %v2962_v29  ;;  %v3801_v29 = vld [vmem:[#allocation47_spill] sm:$0xff]  ;;  %v3803_v11 = vld [vmem:[#allocation29_spill] sm:$0xff] }
 0x25d   :  { %v2041_v41 = vpop.eup %2040  ;;  %v953_v43 = vmul.f32 %v2039_v15, %v2850_v9  ;;  %v523_v9 = vmul.f32 1.442695, %v499_v57  ;;  %v531_v36 = vmul.f32 1.442695, %v503_v19  ;;  %v3817_v19 = vld [vmem:[#allocation49_spill] sm:$0xff] }
 0x25e   :  { %838 = vadd.xlane.f32.xlu0 %v837_v54  ;;  %v840_v55 = vadd.f32 %v2041_v41, %v2039_v15  ;;  %v954_v50 = vmul.f32 %v2041_v41, %v2860_v34  ;;  %v2141_v34 = vld [vmem:[#allocation2 + $0x8] sm:$0xff]  ;;  %v529_v15 = vmul.f32 1.442695, %v502_v59 }
 0x25f   :  { %2042 = vpow2.f32 %v523_v9  ;;  %v492_v14 = vsub.f32 %v2141_v34, %v2906_v13  ;;  %v3800_v54 = vld [vmem:[#allocation22_spill] sm:$0xff]  ;;  %v3138_v9 = vld [vmem:[#allocation2 + $0x70] sm:$0xff] }
 0x260   :  { %841 = vadd.xlane.f32.xlu1 %v840_v55  ;;  %v1000_v52 = vadd.f32 %v954_v50, %v953_v43  ;;  %2044 = vpow2.f32 %v507_v6  ;;  %v2147_v41 = vld [vmem:[#allocation2 + $0x68] sm:$0xff]  ;;  %v3807_v6 = vld [vmem:[#allocation55_spill] sm:$0xff] }
 0x261   :  { %v509_v42 = vmul.f32 1.442695, %v492_v14  ;;  %v3126_v55 = vadd.f32 %v2147_v41, %v3801_v29  ;;  %v3804_v43 = vld [vmem:[#allocation42_spill] sm:$0xff]  ;;  %v3142_v34 = vadd.f32 %v3138_v9, %v3807_v6  ;;  %v504_v30 = vsub.f32 %v2147_v41, %v3809_v2 }
 0x262   :  { %974 = vadd.xlane.f32.xlu0 %v973_v25 }
 0x263   :  { %2046 = vpow2.f32 %v509_v42  ;;  %3802 = vst [vmem:[#allocation22_spill] sm:$0xff] %v3126_v55  ;;  %3808 = vst [vmem:[#allocation47_spill] sm:$0xff] %v3142_v34 }
 0x264   :  { %977 = vadd.xlane.f32.xlu1 %v976_v17  ;;  %2048 = vpow2.f32 %v511_v1  ;;  %v2148_v17 = vld [vmem:[#allocation2 + $0x20] sm:$0xff] }
 0x265   :  { %2050 = vpow2.f32 %v513_v61  ;;  %v495_v50 = vsub.f32 %v2148_v17, %v3804_v43  ;;  %v3811_v61 = vld [vmem:[#allocation56_spill] sm:$0xff] }
 0x266   :  { %2052 = vpow2.f32 %v525_v26  ;;  %v3156_v59 = vadd.f32 %v3152_v0, %v3811_v61 }
 0x267   :  { %2054 = vpow2.f32 %v527_v62  ;;  %v515_v4 = vmul.f32 1.442695, %v495_v50  ;;  %v533_v62 = vmul.f32 1.442695, %v504_v30 }
 0x268   :  { %1001 = vadd.xlane.f32.xlu1 %v1000_v52  ;;  %2056 = vpow2.f32 %v529_v15  ;;  %v2149_v52 = vld [vmem:[#allocation2 + $0x28] sm:$0xff]  ;;  %3812 = vst [vmem:[#allocation29_spill] sm:$0xff] %v3156_v59 }
 0x269   :  { %v496_v35 = vsub.f32 %v2149_v52, %v3805_v8  ;;  %2058 = vpow2.f32 %v515_v4 }
 0x26c   :  { %v2043_v56 = vpop.eup %2042 }
 0x26d   :  { %v787_v5 = vmul.f32 %v2043_v56, %v2650_v44  ;;  %v2045_v48 = vpop.eup %2044  ;;  %v915_v45 = vmul.f32 %v2043_v56, %v3803_v11  ;;  %v517_v56 = vmul.f32 1.442695, %v496_v35  ;;  %v3815_v11 = vld [vmem:[#allocation9_spill] sm:$0xff]  ;;  %v2152_v35 = vld [vmem:[#allocation2 + $0x30] sm:$0xff] }
 0x26e   :  { %v907_v27 = vmul.f32 %v2045_v48, %v3800_v54  ;;  %v497_v6 = vsub.f32 %v2152_v35, %v3817_v19 }
 0x26f   :  { %2060 = vpow2.f32 %v517_v56  ;;  %v2153_v56 = vld [vmem:[#allocation2 + $0x38] sm:$0xff] }
 0x270   :  { %v2047_v25 = vpop.eup %2046  ;;  %2062 = vpow2.f32 %v531_v36  ;;  %v3819_v36 = vld [vmem:[#allocation51_spill] sm:$0xff] }
 0x271   :  { %v780_v24 = vmul.f32 %v2047_v25, %v3810_v33  ;;  %v2049_v1 = vpop.eup %2048  ;;  %2064 = vpow2.f32 %v533_v62  ;;  %v498_v61 = vsub.f32 %v2153_v56, %v3819_v36 }
 0x272   :  { %v3161_v18 = vpop.eup %2050 }
 0x273   :  { %v2053_v54 = vpop.eup %2052 }
 0x278   :  { %1668 = vrot.lane.b32.xlu0 %v3086_v23, %s2194_s6 }
 0x297   :  { %998 = vadd.xlane.f32.xlu0 %v997_v3 }
 0x2ad   :  { %1670 = vrot.lane.b32.xlu0 %v3095_v40, %s2194_s6  ;;  %v3103_v20 = vpop.xlane.xlu1 %796 }
 0x2b1   :  { %1672 = vrot.lane.b32.xlu0 %v3107_v46, %s2194_s6  ;;  %v821_v21 = vpop.xlane.xlu0 %820  ;;  %v957_v16 = vpop.xlane.xlu1 %956 }
 0x2b2   :  { %v3113_v3 = vadd.f32 %v821_v21, %v787_v5  ;;  %v3123_v51 = vadd.f32 %v957_v16, %v907_v27  ;;  %v3813_v5 = vld [vmem:[#allocation6_spill] sm:$0xff]  ;;  %v3814_v27 = vld [vmem:[#allocation8_spill] sm:$0xff] }
 0x2b3   :  { %v779_v26 = vmul.f32 %v2045_v48, %v3813_v5  ;;  %v2055_v48 = vpop.eup %2054 }
 0x2b4   :  { %1291 = vrot.lane.b32.xlu1 %v3113_v3, %s2196_s10  ;;  %v3171_v17 = vpop.eup %2056 }
 0x2b5   :  { %1674 = vrot.lane.b32.xlu0 %v3116_v7, %s2194_s6  ;;  %v981_v44 = vpop.xlane.xlu0 %980  ;;  %v3164_v16 = vadd.f32 %v3103_v20, %v779_v26  ;;  %v3816_v20 = vld [vmem:[#allocation14_spill] sm:$0xff]  ;;  %v3820_v26 = vld [vmem:[#allocation16_spill] sm:$0xff] }
 0x2b6   :  { %v3135_v57 = vadd.f32 %v981_v44, %v915_v45  ;;  %v781_v44 = vmul.f32 %v2049_v1, %v3814_v27  ;;  %v782_v45 = vmul.f32 %v3161_v18, %v3815_v11  ;;  %v788_v50 = vmul.f32 %v2053_v54, %v3816_v20  ;;  %v3821_v27 = vld [vmem:[#allocation50_spill] sm:$0xff] }
 0x2b7   :  { %2066 = vlog2.f32 %v3164_v16  ;;  %v790_v62 = vmul.f32 %v3171_v17, %v3820_v26  ;;  %v2059_v26 = vpop.eup %2058 }
 0x2b8   :  { %1339 = vrot.lane.b32.xlu1 %v3123_v51, %s2197_s11 }
 0x2b9   :  { %1676 = vrot.lane.b32.xlu0 %v3126_v55, %s2194_s6  ;;  %v824_v42 = vpop.xlane.xlu1 %823 }
 0x2bb   :  { %v800_v14 = vpop.xlane.xlu0 %799 }
 0x2bc   :  { %1355 = vrot.lane.b32.xlu1 %v3135_v57, %s2197_s11  ;;  %v3150_v58 = vadd.f32 %v800_v14, %v780_v24  ;;  %v3818_v14 = vld [vmem:[#allocation15_spill] sm:$0xff]  ;;  %v3182_v24 = vadd.f32 %v824_v42, %v788_v50 }
 0x2bd   :  { %1678 = vrot.lane.b32.xlu0 %v3142_v34, %s2194_s6  ;;  %v984_v15 = vpop.xlane.xlu1 %983  ;;  %v789_v30 = vmul.f32 %v2055_v48, %v3818_v14  ;;  %v521_v14 = vmul.f32 1.442695, %v498_v61  ;;  %v3837_v34 = vld [vmem:[#allocation13_spill] sm:$0xff] }
 0x2bf   :  { %v960_v21 = vpop.xlane.xlu0 %959 }
 0x2c0   :  { %1277 = vrot.lane.b32.xlu1 %v3150_v58, %s2196_s10 }
 0x2c1   :  { %1680 = vrot.lane.b32.xlu0 %v3156_v59, %s2194_s6 }
 0x2c3   :  { %v803_v41 = vpop.xlane.xlu0 %802 }
 0x2c4   :  { %v845_v29 = vadd.f32 %v803_v41, %v781_v44  ;;  %v505_v44 = vsub.f32 %v3138_v9, %v3821_v27  ;;  %v3822_v41 = vld [vmem:[#allocation21_spill] sm:$0xff] }
 0x2c5   :  { %1275 = vrot.lane.b32.xlu0 %v3164_v16, %s2196_s10  ;;  %v806_v52 = vpop.xlane.xlu1 %805  ;;  %v908_v11 = vmul.f32 %v2047_v25, %v3822_v41 }
 0x2c6   :  { %2068 = vlog2.f32 %v845_v29  ;;  %1279 = vrot.lane.b32.xlu1 %v845_v29, %s2196_s10  ;;  %v3180_v33 = vadd.f32 %v806_v52, %v782_v45  ;;  %v3823_v45 = vld [vmem:[#allocation23_spill] sm:$0xff]  ;;  %v3824_v52 = vld [vmem:[#allocation53_spill] sm:$0xff] }
 0x2c7   :  { %2070 = vrcp.f32 %v845_v29  ;;  %v827_v4 = vpop.xlane.xlu0 %826  ;;  %v519_v29 = vmul.f32 1.442695, %v497_v6  ;;  %v909_v20 = vmul.f32 %v2049_v1, %v3823_v45  ;;  %v506_v35 = vsub.f32 %v3152_v0, %v3824_v52  ;;  %v3825_v6 = vld [vmem:[#allocation30_spill] sm:$0xff]  ;;  %v3826_v0 = vld [vmem:[#allocation31_spill] sm:$0xff] }
 0x2c8   :  { %v853_v5 = vadd.f32 %v827_v4, %v789_v30  ;;  %2072 = vlog2.f32 %v3180_v33  ;;  %v3200_v9 = vadd.f32 %v960_v21, %v908_v11  ;;  %v535_v4 = vmul.f32 1.442695, %v505_v44 }
 0x2c9   :  { %2074 = vrcp.f32 %v3180_v33  ;;  %1293 = vrot.lane.b32.xlu0 %v3182_v24, %s2196_s10  ;;  %v830_v42 = vpop.xlane.xlu1 %829  ;;  %v916_v56 = vmul.f32 %v2053_v54, %v3825_v6  ;;  %v917_v21 = vmul.f32 %v2055_v48, %v3826_v0  ;;  %v537_v61 = vmul.f32 1.442695, %v506_v35 }
 0x2ca   :  { %2076 = vlog2.f32 %v853_v5  ;;  %1295 = vrot.lane.b32.xlu1 %v853_v5, %s2196_s10  ;;  %v3196_v50 = vadd.f32 %v830_v42, %v790_v62 }
 0x2cb   :  { %2078 = vrcp.f32 %v853_v5  ;;  %v963_v25 = vpop.xlane.xlu0 %962  ;;  %v3209_v5 = vpop.eup %2060  ;;  %v3212_v62 = vadd.f32 %v984_v15, %v916_v56  ;;  %v3829_v56 = vld [vmem:[#allocation11_spill] sm:$0xff] }
 0x2cc   :  { %v1005_v30 = vadd.f32 %v963_v25, %v909_v20  ;;  %2080 = vlog2.f32 %v3196_v50  ;;  %v3214_v44 = vpop.eup %2062  ;;  %v3828_v20 = vld [vmem:[#allocation24_spill] sm:$0xff]  ;;  %v784_v0 = vmul.f32 %v3209_v5, %v3829_v56 }
 0x2cd   :  { %2082 = vrcp.f32 %v3196_v50  ;;  %1341 = vrot.lane.b32.xlu0 %v3200_v9, %s2197_s11  ;;  %v966_v1 = vpop.xlane.xlu1 %965  ;;  %v3216_v11 = vpop.eup %2064  ;;  %v910_v35 = vmul.f32 %v3161_v18, %v3828_v20 }
 0x2ce   :  { %2084 = vpow2.f32 %v519_v29  ;;  %1343 = vrot.lane.b32.xlu1 %v1005_v30, %s2197_s11  ;;  %v2067_v48 = vpop.eup %2066  ;;  %v3827_v29 = vld [vmem:[#allocation10_spill] sm:$0xff] }
 0x2cf   :  { %2086 = vlog2.f32 %v3113_v3  ;;  %v987_v54 = vpop.xlane.xlu0 %986  ;;  %v783_v15 = vmul.f32 %v2059_v26, %v3827_v29 }
 0x2d0   :  { %2088 = vpow2.f32 %v521_v14  ;;  %v1013_v41 = vadd.f32 %v987_v54, %v917_v21  ;;  %v1006_v54 = vadd.f32 %v966_v1, %v910_v35  ;;  %v3831_v1 = vld [vmem:[#allocation32_spill] sm:$0xff] }
 0x2d1   :  { %2090 = vpow2.f32 %v535_v4  ;;  %1357 = vrot.lane.b32.xlu0 %v3212_v62, %s2197_s11  ;;  %v990_v42 = vpop.xlane.xlu1 %989 }
 0x2d2   :  { %2092 = vrcp.f32 %v3164_v16  ;;  %1359 = vrot.lane.b32.xlu1 %v1013_v41, %s2197_s11 }
 0x2d3   :  { %v2069_v45 = vpop.eup %2068  ;;  %2094 = vpow2.f32 %v537_v61  ;;  %v809_v25 = vpop.xlane.xlu0 %808  ;;  %v3830_v61 = vld [vmem:[#allocation17_spill] sm:$0xff] }
 0x2d4   :  { %v2071_v14 = vpop.eup %2070  ;;  %2096 = vrcp.f32 %v3113_v3  ;;  %v1463_v4 = vmul.f32 0.6931472, %v2069_v45  ;;  %v847_v6 = vadd.f32 %v809_v25, %v783_v15  ;;  %v791_v18 = vmul.f32 %v3214_v44, %v3830_v61 }
 0x2d5   :  { %v2073_v21 = vpop.eup %2072  ;;  %2098 = vlog2.f32 %v3150_v58  ;;  %v3229_v16 = vmul.f32 %v2071_v14, %v1005_v30  ;;  %1281 = vrot.lane.b32.xlu0 %v3180_v33, %s2196_s10  ;;  %v812_v29 = vpop.xlane.xlu1 %811  ;;  %v918_v33 = vmul.f32 %v3171_v17, %v3831_v1  ;;  %v3832_v14 = vld [vmem:[#allocation25_spill] sm:$0xff]  ;;  %v3833_v17 = vld [vmem:[#allocation18_spill] sm:$0xff] }
 0x2d6   :  { %v2075_v20 = vpop.eup %2074  ;;  %v3236_v3 = vadd.f32 %v1463_v4, %v2911_v28  ;;  %v1465_v15 = vmul.f32 0.6931472, %v2073_v21  ;;  %2100 = vlog2.f32 %v847_v6  ;;  %1283 = vrot.lane.b32.xlu1 %v847_v6, %s2196_s10  ;;  %v3239_v45 = vadd.f32 %v812_v29, %v784_v0 }
 0x2d7   :  { %v2077_v30 = vpop.eup %2076  ;;  %v3241_v25 = vmul.f32 %v2075_v20, %v1006_v54  ;;  %2102 = vrcp.f32 %v847_v6  ;;  %v833_v35 = vpop.xlane.xlu0 %832  ;;  %v911_v56 = vmul.f32 %v2059_v26, %v3832_v14  ;;  %v1014_v20 = vadd.f32 %v990_v42, %v918_v33 }
 0x2d8   :  { %v2079_v61 = vpop.eup %2078  ;;  %v1479_v21 = vmul.f32 0.6931472, %v2077_v30  ;;  %v3249_v49 = vadd.f32 %v1465_v15, %v2924_v31  ;;  %v855_v0 = vadd.f32 %v833_v35, %v791_v18  ;;  %2104 = vlog2.f32 %v3239_v45 }
 0x2d9   :  { %v2081_v29 = vpop.eup %2080  ;;  %v3251_v37 = vmul.f32 %v2079_v61, %v1013_v41  ;;  %1297 = vrot.lane.b32.xlu0 %v3196_v50, %s2196_s10  ;;  %v792_v26 = vmul.f32 %v3216_v11, %v3833_v17  ;;  %v836_v6 = vpop.xlane.xlu1 %835  ;;  %v1459_v42 = vmul.f32 0.6931472, %v2067_v48 }
 0x2da   :  { %v2083_v1 = vpop.eup %2082  ;;  %v3259_v30 = vadd.f32 %v1479_v21, %v2920_v39  ;;  %v1481_v15 = vmul.f32 0.6931472, %v2081_v29  ;;  %2106 = vlog2.f32 %v855_v0  ;;  %1299 = vrot.lane.b32.xlu1 %v855_v0, %s2196_s10 }
 0x2db   :  { %v3264_v41 = vpop.eup %2084  ;;  %v3266_v33 = vmul.f32 %v2083_v1, %v1014_v20  ;;  %2108 = vrcp.f32 %v855_v0  ;;  %v969_v50 = vpop.xlane.xlu0 %968  ;;  %v3268_v35 = vadd.f32 %v836_v6, %v792_v26  ;;  %v3834_v6 = vld [vmem:[#allocation33_spill] sm:$0xff] }
 0x2dc   :  { %v2087_v14 = vpop.eup %2086  ;;  %v3273_v21 = vadd.f32 %v1481_v15, %v2935_v32  ;;  %2110 = vrcp.f32 %v3239_v45  ;;  %v1007_v29 = vadd.f32 %v969_v50, %v911_v56  ;;  %v919_v1 = vmul.f32 %v3214_v44, %v3834_v6  ;;  %v3836_v44 = vld [vmem:[#allocation12_spill] sm:$0xff] }
 0x2dd   :  { %v3276_v17 = vpop.eup %2088  ;;  %2112 = vlog2.f32 %v3268_v35  ;;  %1345 = vrot.lane.b32.xlu0 %v1006_v54, %s2197_s11  ;;  %v972_v48 = vpop.xlane.xlu1 %971  ;;  %v1475_v15 = vmul.f32 0.6931472, %v2087_v14  ;;  %v3291_v54 = vadd.f32 %v1459_v42, %v2883_v63  ;;  %v785_v14 = vmul.f32 %v3264_v41, %v3836_v44  ;;  %v3838_v44 = vld [vmem:[#allocation26_spill] sm:$0xff] }
 0x2de   :  { %v3280_v0 = vpop.eup %2090  ;;  %2114 = vrcp.f32 %v3268_v35  ;;  %1347 = vrot.lane.b32.xlu1 %v1007_v29, %s2197_s11  ;;  %v912_v59 = vmul.f32 %v3209_v5, %v3838_v44  ;;  %v3840_v5 = vld [vmem:[#allocation20_spill] sm:$0xff] }
 0x2df   :  { %v2093_v56 = vpop.eup %2092  ;;  %v993_v50 = vpop.xlane.xlu0 %992  ;;  %3835 = vst [vmem:[#allocation42_spill] sm:$0xff] %v3291_v54  ;;  %2116 = vlog2.f32 %v3182_v24  ;;  %v3301_v42 = vadd.f32 %v1475_v15, %v2890_v38 }
 0x2e0   :  { %v3288_v18 = vpop.eup %2094  ;;  %v1015_v61 = vadd.f32 %v993_v50, %v919_v1  ;;  %v1523_v60 = vmul.f32 %v2093_v56, %v3123_v51  ;;  %2118 = vrcp.f32 %v3150_v58  ;;  %v786_v51 = vmul.f32 %v3276_v17, %v3837_v34 }
 0x2e1   :  { %v2097_v4 = vpop.eup %2096  ;;  %1361 = vrot.lane.b32.xlu0 %v1014_v20, %s2197_s11  ;;  %v996_v26 = vpop.xlane.xlu1 %995  ;;  %2120 = vrcp.f32 %v3182_v24 }
 0x2e2   :  { %v2099_v47 = vpop.eup %2098  ;;  %1363 = vrot.lane.b32.xlu1 %v1015_v61, %s2197_s11  ;;  %v1554_v50 = vsub.f32 %v3291_v54, %v1523_v60  ;;  %v1539_v58 = vmul.f32 %v2097_v4, %v3135_v57 }
 0x2e3   :  { %v2101_v6 = vpop.eup %2100  ;;  %v815_v10 = vpop.xlane.xlu0 %814 }
 0x2e4   :  { %v2103_v1 = vpop.eup %2102  ;;  %v1467_v20 = vmul.f32 0.6931472, %v2101_v6  ;;  %v849_v12 = vadd.f32 %v815_v10, %v785_v14  ;;  %v3839_v10 = vld [vmem:[#allocation34_spill] sm:$0xff]  ;;  %v1562_v4 = vsub.f32 %v3301_v42, %v1539_v58 }
 0x2e5   :  { %v3308_v56 = vmul.f32 %v2103_v1, %v1007_v29  ;;  %1285 = vrot.lane.b32.xlu0 %v3239_v45, %s2196_s10  ;;  %v818_v15 = vpop.xlane.xlu1 %817  ;;  %v2105_v55 = vpop.eup %2104  ;;  %v920_v34 = vmul.f32 %v3216_v11, %v3839_v10  ;;  %v794_v45 = vmul.f32 %v3288_v18, %v3840_v5 }
 0x2e6   :  { %v3315_v60 = vadd.f32 %v1467_v20, %v3804_v43  ;;  %2122 = vlog2.f32 %v849_v12  ;;  %1586 = vrot.lane.b32.xlu1 %v1554_v50, %s2196_s10  ;;  %v850_v57 = vadd.f32 %v818_v15, %v786_v51  ;;  %v1469_v29 = vmul.f32 0.6931472, %v2105_v55 }
 0x2e7   :  { %v2107_v24 = vpop.eup %2106  ;;  %2124 = vrcp.f32 %v849_v12  ;;  %v1008_v20 = vadd.f32 %v972_v48, %v912_v59  ;;  %v1016_v10 = vadd.f32 %v996_v26, %v920_v34  ;;  %v839_v59 = vpop.xlane.xlu0 %838  ;;  %v3841_v26 = vld [vmem:[#allocation19_spill] sm:$0xff] }
 0x2e8   :  { %v2109_v14 = vpop.eup %2108  ;;  %v1483_v1 = vmul.f32 0.6931472, %v2107_v24  ;;  %2126 = vlog2.f32 %v850_v57  ;;  %v3328_v50 = vadd.f32 %v1469_v29, %v3805_v8  ;;  %v1461_v29 = vmul.f32 0.6931472, %v2099_v47 }
 0x2e9   :  { %v2111_v44 = vpop.eup %2110  ;;  %v3325_v11 = vmul.f32 %v2109_v14, %v1015_v61  ;;  %2128 = vrcp.f32 %v850_v57  ;;  %1301 = vrot.lane.b32.xlu0 %v3268_v35, %s2196_s10  ;;  %v842_v55 = vpop.xlane.xlu1 %841  ;;  %v793_v34 = vmul.f32 %v3280_v0, %v3841_v26 }
 0x2ea   :  { %v2113_v51 = vpop.eup %2112  ;;  %v3333_v58 = vadd.f32 %v1483_v1, %v3806_v22  ;;  %v3335_v15 = vmul.f32 %v2111_v44, %v1008_v20  ;;  %1602 = vrot.lane.b32.xlu1 %v1562_v4, %s2196_s10  ;;  %v858_v61 = vadd.f32 %v842_v55, %v794_v45  ;;  %v3354_v45 = vadd.f32 %v1461_v29, %v2906_v13  ;;  %v3843_v29 = vld [vmem:[#allocation28_spill] sm:$0xff] }
 0x2eb   :  { %v2115_v48 = vpop.eup %2114  ;;  %v1485_v24 = vmul.f32 0.6931472, %v2113_v51  ;;  %v3356_v51 = vadd.f32 %v839_v59, %v793_v34 }
 0x2ec   :  { %v3342_v14 = vmul.f32 %v2115_v48, %v1016_v10  ;;  %v2117_v1 = vpop.eup %2116  ;;  %2130 = vlog2.f32 %v858_v61  ;;  %v975_v48 = vpop.xlane.xlu0 %974 }
 0x2ed   :  { %v3345_v44 = vadd.f32 %v1485_v24, %v3809_v2  ;;  %1349 = vrot.lane.b32.xlu0 %v1008_v20, %s2197_s11  ;;  %2132 = vrcp.f32 %v858_v61  ;;  %v2119_v47 = vpop.eup %2118  ;;  %v1477_v55 = vmul.f32 0.6931472, %v2117_v1  ;;  %v3842_v24 = vld [vmem:[#allocation27_spill] sm:$0xff]  ;;  %v978_v35 = vpop.xlane.xlu1 %977  ;;  %v914_v1 = vmul.f32 %v3276_v17, %v3843_v29 }
 0x2ee   :  { %1287 = vrot.lane.b32.xlu1 %v849_v12, %s2196_s10  ;;  %v913_v20 = vmul.f32 %v3264_v41, %v3842_v24  ;;  %v2121_v26 = vpop.eup %2120  ;;  %v1525_v12 = vmul.f32 %v2119_v47, %v3200_v9  ;;  %2134 = vlog2.f32 %v3356_v51 }
 0x2ef   :  { %v3368_v6 = vadd.f32 %v1477_v55, %v2903_v53  ;;  %v1010_v54 = vadd.f32 %v978_v35, %v914_v1  ;;  %v1541_v47 = vmul.f32 %v2121_v26, %v3212_v62  ;;  %2136 = vrcp.f32 %v3356_v51 }
 0x2f0   :  { %v1009_v5 = vadd.f32 %v975_v48, %v913_v20  ;;  %v1555_v34 = vsub.f32 %v3354_v45, %v1525_v12 }
 0x2f1   :  { %1365 = vrot.lane.b32.xlu0 %v1016_v10, %s2197_s11  ;;  %v1002_v55 = vpop.xlane.xlu1 %1001 }
 0x2f2   :  { %1303 = vrot.lane.b32.xlu1 %v3356_v51, %s2196_s10 }
 0x2f3   :  { %v2123_v4 = vpop.eup %2122 }
 0x2f4   :  { %v2125_v59 = vpop.eup %2124  ;;  %v1471_v41 = vmul.f32 0.6931472, %v2123_v4  ;;  %v1563_v4 = vsub.f32 %v3368_v6, %v1541_v47 }
 0x2f5   :  { %v2127_v24 = vpop.eup %2126  ;;  %v3370_v10 = vmul.f32 %v2125_v59, %v1009_v5  ;;  %1289 = vrot.lane.b32.xlu0 %v850_v57, %s2196_s10  ;;  %v3844_v57 = vld [vmem:[#allocation36_spill] sm:$0xff] }
 0x2f6   :  { %v2129_v9 = vpop.eup %2128  ;;  %v3375_v48 = vadd.f32 %v1471_v41, %v3817_v19  ;;  %v1473_v17 = vmul.f32 0.6931472, %v2127_v24  ;;  %1588 = vrot.lane.b32.xlu1 %v1555_v34, %s2196_s10  ;;  %v922_v62 = vmul.f32 %v3288_v18, %v3844_v57 }
 0x2f7   :  { %v3378_v20 = vmul.f32 %v2129_v9, %v1010_v54  ;;  %v3845_v9 = vld [vmem:[#allocation35_spill] sm:$0xff] }
 0x2f8   :  { %v1560_v12 = vsub.f32 %v3375_v48, %v3370_v10  ;;  %v3384_v35 = vadd.f32 %v1473_v17, %v3819_v36  ;;  %v1018_v1 = vadd.f32 %v1002_v55, %v922_v62  ;;  %v921_v47 = vmul.f32 %v3280_v0, %v3845_v9 }
 0x2f9   :  { %1305 = vrot.lane.b32.xlu0 %v858_v61, %s2196_s10  ;;  %v2131_v26 = vpop.eup %2130  ;;  %v3402_v61 = vpop.permute.xlu0 %1668 }
 0x2fa   :  { %v1561_v29 = vsub.f32 %v3384_v35, %v3378_v20  ;;  %1604 = vrot.lane.b32.xlu1 %v1563_v4, %s2196_s10  ;;  %v2133_v59 = vpop.eup %2132  ;;  %v1489_v34 = vmul.f32 0.6931472, %v2131_v26  ;;  %v3847_v26 = vsub.f32 %v3259_v30, %v3251_v37 }
 0x2fb   :  { %v3392_v41 = vmul.f32 %v2133_v59, %v1018_v1 }
 0x2fc   :  { %v3395_v24 = vadd.f32 %v1489_v34, %v3824_v52 }
 0x2fd   :  { %1353 = vrot.lane.b32.xlu0 %v1010_v54, %s2197_s11  ;;  %v3846_v54 = vsub.f32 %v3236_v3, %v3229_v16  ;;  %v3848_v16 = vsub.f32 %v3249_v49, %v3241_v25  ;;  %v3851_v25 = vsub.f32 %v3315_v60, %v3308_v56  ;;  %v3854_v56 = vsub.f32 %v3328_v50, %v3335_v15 }
 0x2fe   :  { %1351 = vrot.lane.b32.xlu1 %v1009_v5, %s2197_s11  ;;  %v1569_v18 = vsub.f32 %v3395_v24, %v3392_v41  ;;  %v3856_v15 = vsub.f32 %v3345_v44, %v3342_v14 }
 0x301   :  { %1369 = vrot.lane.b32.xlu0 %v1018_v1, %s2197_s11 }
 0x320   :  { %v999_v17 = vpop.xlane.xlu0 %998 }
 0x321   :  { %v1017_v55 = vadd.f32 %v999_v17, %v921_v47  ;;  %v3849_v47 = vld [vmem:[#allocation38_spill] sm:$0xff] }
 0x323   :  { %1367 = vrot.lane.b32.xlu1 %v1017_v55, %s2197_s11 }
 0x324   :  { %v3407_v4 = vpop.permute.xlu0 %1670 }
 0x326   :  { %v1292_v57 = vpop.permute.xlu1 %1291 }
 0x327   :  { %1590 = vrot.lane.b32.xlu1 %v3846_v54, %s2196_s10  ;;  %v1396_v1 = vsel %vm22_vm1, %v2890_v38, %v1292_v57  ;;  %v3850_v38 = vsub.f32 %v3273_v21, %v3266_v33 }
 0x328   :  { %v3413_v5 = vpop.permute.xlu0 %1672 }
 0x32a   :  { %v1340_v62 = vpop.permute.xlu1 %1339 }
 0x32b   :  { %1606 = vrot.lane.b32.xlu1 %v3847_v26, %s2196_s10 }
 0x32c   :  { %v3419_v0 = vpop.permute.xlu0 %1674 }
 0x32e   :  { %v1356_v59 = vpop.permute.xlu1 %1355 }
 0x32f   :  { %1592 = vrot.lane.b32.xlu1 %v3848_v16, %s2196_s10  ;;  %v1413_v34 = vsel %vm1404_vm7, %v1396_v1, %v1356_v59  ;;  %v3852_v1 = vsub.f32 %v3333_v58, %v3325_v11 }
 0x330   :  { %v3428_v9 = vpop.permute.xlu0 %1676  ;;  %v1430_v37 = vsel %vm1421_vm8, %v1413_v34, %v3849_v47  ;;  %v3853_v34 = vld [vmem:[#allocation37_spill] sm:$0xff] }
 0x331   :  { %1447 = vst.msk [vmem:[#allocation2 + $0x40] sm:$0xff] %vm24_vm2, %v1430_v37  ;;  %v2135_v37 = vpop.eup %2134 }
 0x332   :  { %v1278_v17 = vpop.permute.xlu1 %1277 }
 0x333   :  { %1608 = vrot.lane.b32.xlu1 %v3850_v38, %s2196_s10 }
 0x334   :  { %v3438_v57 = vpop.permute.xlu0 %1678 }
 0x337   :  { %1594 = vrot.lane.b32.xlu1 %v3851_v25, %s2196_s10 }
 0x338   :  { %v3445_v54 = vpop.permute.xlu0 %1680  ;;  %v1280_v26 = vpop.permute.xlu1 %1279 }
 0x339   :  { %v1390_v11 = vsel %vm22_vm1, %v2911_v28, %v1280_v26  ;;  %v1389_v28 = vsel %vm22_vm1, %v2906_v13, %v1278_v17 }
 0x33b   :  { %1610 = vrot.lane.b32.xlu1 %v3852_v1, %s2196_s10  ;;  %v3855_v1 = vld [vmem:[#allocation40_spill] sm:$0xff] }
 0x33c   :  { %v1276_v59 = vpop.permute.xlu0 %1275  ;;  %v1296_v33 = vpop.permute.xlu1 %1295 }
 0x33d   :  { %v1388_v16 = vsel %vm22_vm1, %v2883_v63, %v1276_v59  ;;  %v1487_v59 = vmul.f32 0.6931472, %v2135_v37  ;;  %v1398_v26 = vsel %vm22_vm1, %v2920_v39, %v1296_v33 }
 0x33e   :  { %v1405_v51 = vsel %vm1404_vm7, %v1388_v16, %v1340_v62  ;;  %v2137_v16 = vpop.eup %2136 }
 0x33f   :  { %v1422_v47 = vsel %vm1421_vm8, %v1405_v51, %v3853_v34  ;;  %1596 = vrot.lane.b32.xlu1 %v3854_v56, %s2196_s10 }
 0x340   :  { %1439 = vst.msk [vmem:[#allocation2] sm:$0xff] %vm24_vm2, %v1422_v47  ;;  %v1294_v38 = vpop.permute.xlu0 %1293  ;;  %v1344_v25 = vpop.permute.xlu1 %1343  ;;  %v1551_v47 = vmul.f32 %v2137_v16, %v1017_v55 }
 0x341   :  { %v1407_v63 = vsel %vm1404_vm7, %v1390_v11, %v1344_v25  ;;  %v3857_v11 = vld [vmem:[#allocation39_spill] sm:$0xff]  ;;  %v1397_v13 = vsel %vm22_vm1, %v2903_v53, %v1294_v38 }
 0x342   :  { %v1424_v62 = vsel %vm1421_vm8, %v1407_v63, %v3855_v1  ;;  %v3482_v63 = vadd.f32 %v1487_v59, %v3821_v27  ;;  %v3858_v59 = vld [vmem:[#allocation45_spill] sm:$0xff] }
 0x343   :  { %1441 = vst.msk [vmem:[#allocation2 + $0x10] sm:$0xff] %vm24_vm2, %v1424_v62  ;;  %1612 = vrot.lane.b32.xlu1 %v3856_v15, %s2196_s10 }
 0x344   :  { %v1342_v51 = vpop.permute.xlu0 %1341  ;;  %v1360_v34 = vpop.permute.xlu1 %1359  ;;  %v1568_v17 = vsub.f32 %v3482_v63, %v1551_v47 }
 0x345   :  { %v1406_v56 = vsel %vm1404_vm7, %v1389_v28, %v1342_v51  ;;  %v1415_v37 = vsel %vm1404_vm7, %v1398_v26, %v1360_v34  ;;  %v3859_v26 = vld [vmem:[#allocation41_spill] sm:$0xff] }
 0x346   :  { %v1423_v25 = vsel %vm1421_vm8, %v1406_v56, %v3857_v11  ;;  %v1432_v14 = vsel %vm1421_vm8, %v1415_v37, %v3095_v40 }
 0x347   :  { %1440 = vst.msk [vmem:[#allocation2 + $0x8] sm:$0xff] %vm24_vm2, %v1423_v25  ;;  %1449 = vst.msk [vmem:[#allocation2 + $0x50] sm:$0xff] %vm24_vm2, %v1432_v14  ;;  %1598 = vrot.lane.b32.xlu1 %v1560_v12, %s2196_s10 }
 0x348   :  { %v1358_v39 = vpop.permute.xlu0 %1357  ;;  %v1284_v55 = vpop.permute.xlu1 %1283 }
 0x349   :  { %v1414_v40 = vsel %vm1404_vm7, %v1397_v13, %v1358_v39  ;;  %v1392_v53 = vsel %vm22_vm1, %v3804_v43, %v1284_v55 }
 0x34a   :  { %v1431_v33 = vsel %vm1421_vm8, %v1414_v40, %v3086_v23 }
 0x34b   :  { %1448 = vst.msk [vmem:[#allocation2 + $0x48] sm:$0xff] %vm24_vm2, %v1431_v33  ;;  %1614 = vrot.lane.b32.xlu1 %v1568_v17, %s2196_s10  ;;  %v3860_v17 = vld [vmem:[#allocation48_spill] sm:$0xff] }
 0x34c   :  { %v1282_v1 = vpop.permute.xlu0 %1281  ;;  %v1300_v62 = vpop.permute.xlu1 %1299 }
 0x34d   :  { %v1391_v20 = vsel %vm22_vm1, %v2924_v31, %v1282_v1  ;;  %v1400_v43 = vsel %vm22_vm1, %v3806_v22, %v1300_v62 }
 0x34f   :  { %1600 = vrot.lane.b32.xlu1 %v1561_v29, %s2196_s10 }
 0x350   :  { %v1298_v10 = vpop.permute.xlu0 %1297  ;;  %v1348_v12 = vpop.permute.xlu1 %1347 }
 0x351   :  { %v1409_v38 = vsel %vm1404_vm7, %v1392_v53, %v1348_v12  ;;  %v1399_v31 = vsel %vm22_vm1, %v2935_v32, %v1298_v10  ;;  %v3861_v53 = vld [vmem:[#allocation22_spill] sm:$0xff] }
 0x352   :  { %v1426_v23 = vsel %vm1421_vm8, %v1409_v38, %v3858_v59 }
 0x353   :  { %1443 = vst.msk [vmem:[#allocation2 + $0x20] sm:$0xff] %vm24_vm2, %v1426_v23  ;;  %1616 = vrot.lane.b32.xlu1 %v1569_v18, %s2196_s10 }
 0x354   :  { %v1346_v29 = vpop.permute.xlu0 %1345  ;;  %v1364_v15 = vpop.permute.xlu1 %1363 }
 0x355   :  { %v1408_v16 = vsel %vm1404_vm7, %v1391_v20, %v1346_v29  ;;  %v1417_v28 = vsel %vm1404_vm7, %v1400_v43, %v1364_v15  ;;  %v3862_v15 = vld [vmem:[#allocation52_spill] sm:$0xff] }
 0x356   :  { %v1425_v51 = vsel %vm1421_vm8, %v1408_v16, %v3859_v26  ;;  %v1434_v34 = vsel %vm1421_vm8, %v1417_v28, %v3116_v7  ;;  %v2154_v7 = vld [vmem:[%s3705_s2 + $0x40] sm:$0xff] }
 0x357   :  { %1442 = vst.msk [vmem:[#allocation2 + $0x18] sm:$0xff] %vm24_vm2, %v1425_v51  ;;  %1451 = vst.msk [vmem:[#allocation2 + $0x60] sm:$0xff] %vm24_vm2, %v1434_v34  ;;  %v1514_v56 = vsub.f32 %v3301_v42, %v2154_v7  ;;  %v2156_v28 = vld [vmem:[%s3705_s2] sm:$0xff] }
 0x358   :  { %v1362_v22 = vpop.permute.xlu0 %1361  ;;  %v1587_v41 = vpop.permute.xlu1 %1586 }
 0x359   :  { %v1416_v18 = vsel %vm1404_vm7, %v1399_v31, %v1362_v22  ;;  %v3864_v22 = vld [vmem:[#allocation54_spill] sm:$0xff] }
 0x35a   :  { %v1433_v47 = vsel %vm1421_vm8, %v1416_v18, %v3107_v46 }
 0x35b   :  { %1450 = vst.msk [vmem:[#allocation2 + $0x58] sm:$0xff] %vm24_vm2, %v1433_v47  ;;  %v2157_v47 = vld [vmem:[%s3705_s2 + $0x8] sm:$0xff] }
 0x35c   :  { %v1286_v37 = vpop.permute.xlu0 %1285  ;;  %v1603_v11 = vpop.permute.xlu1 %1602  ;;  %v1507_v7 = vsub.f32 %v3354_v45, %v2157_v47 }
 0x35d   :  { %v3535_v25 = vsel %vm22_vm1, %v1514_v56, %v1603_v11  ;;  %v1393_v13 = vsel %vm22_vm1, %v3805_v8, %v1286_v37  ;;  %v2155_v8 = vld [vmem:[%s3705_s2 + $0x48] sm:$0xff]  ;;  %v3865_v56 = vld [vmem:[#allocation57_spill] sm:$0xff] }
 0x35e   :  { %v1515_v12 = vsub.f32 %v3368_v6, %v2155_v8  ;;  %v3863_v6 = vld [vmem:[#allocation42_spill] sm:$0xff] }
 0x35f   :  { %v1506_v26 = vsub.f32 %v3863_v6, %v2156_v28  ;;  %v2160_v28 = vld [vmem:[%s3705_s2 + $0x20] sm:$0xff] }
 0x360   :  { %v1302_v32 = vpop.permute.xlu0 %1301  ;;  %v1288_v14 = vpop.permute.xlu1 %1287  ;;  %v1510_v6 = vsub.f32 %v3315_v60, %v2160_v28  ;;  %v3872_v60 = vld [vmem:[#allocation63_spill] sm:$0xff] }
 0x361   :  { %v1401_v42 = vsel %vm22_vm1, %v3809_v2, %v1302_v32  ;;  %v1394_v2 = vsel %vm22_vm1, %v3817_v19, %v1288_v14  ;;  %v1698_v19 = vsel %vm22_vm1, %v1506_v26, %v1587_v41  ;;  %v3866_v14 = vld [vmem:[#allocation29_spill] sm:$0xff] }
 0x362   :  { %v1714_v37 = vsel %vm1404_vm7, %v1698_v19, %v3865_v56 }
 0x363   :  { %v1730_v45 = vsel %vm1421_vm8, %v1714_v37, 0.0 }
 0x364   :  { %v1350_v39 = vpop.permute.xlu0 %1349  ;;  %v1304_v46 = vpop.permute.xlu1 %1303 }
 0x365   :  { %v1410_v55 = vsel %vm1404_vm7, %v1393_v13, %v1350_v39  ;;  %v3867_v39 = vld [vmem:[#allocation59_spill] sm:$0xff] }
 0x366   :  { %v1427_v40 = vsel %vm1421_vm8, %v1410_v55, %v3860_v17 }
 0x367   :  { %1444 = vst.msk [vmem:[#allocation2 + $0x28] sm:$0xff] %vm24_vm2, %v1427_v40 }
 0x368   :  { %v1366_v33 = vpop.permute.xlu0 %1365  ;;  %v1589_v1 = vpop.permute.xlu1 %1588 }
 0x369   :  { %v1418_v62 = vsel %vm1404_vm7, %v1401_v42, %v1366_v33  ;;  %v1699_v11 = vsel %vm22_vm1, %v1507_v7, %v1589_v1  ;;  %v3868_v33 = vld [vmem:[#allocation47_spill] sm:$0xff] }
 0x36a   :  { %v1435_v10 = vsel %vm1421_vm8, %v1418_v62, %v3861_v53  ;;  %v1715_v55 = vsel %vm1404_vm7, %v1699_v11, %v3867_v39  ;;  %v2158_v62 = vld [vmem:[%s3705_s2 + $0x10] sm:$0xff] }
 0x36b   :  { %1452 = vst.msk [vmem:[#allocation2 + $0x68] sm:$0xff] %vm24_vm2, %v1435_v10  ;;  %v1731_v17 = vsel %vm1421_vm8, %v1715_v55, 0.0  ;;  %v1508_v53 = vsub.f32 %v3236_v3, %v2158_v62  ;;  %v3870_v3 = vld [vmem:[#allocation61_spill] sm:$0xff]  ;;  %v2163_v55 = vld [vmem:[%s3705_s2 + $0x38] sm:$0xff] }
 0x36c   :  { %v1290_v38 = vpop.permute.xlu0 %1289  ;;  %v1605_v59 = vpop.permute.xlu1 %1604 }
 0x36d   :  { %v3554_v23 = vsel %vm22_vm1, %v1515_v12, %v1605_v59  ;;  %v1395_v51 = vsel %vm22_vm1, %v3819_v36, %v1290_v38  ;;  %v3869_v12 = vld [vmem:[#allocation60_spill] sm:$0xff] }
 0x36e   :  { %v2159_v59 = vld [vmem:[%s3705_s2 + $0x18] sm:$0xff] }
 0x370   :  { %v1306_v20 = vpop.permute.xlu0 %1305  ;;  %v1352_v43 = vpop.permute.xlu1 %1351 }
 0x371   :  { %v1411_v29 = vsel %vm1404_vm7, %v1394_v2, %v1352_v43  ;;  %v1403_v36 = vsel %vm22_vm1, %v3824_v52, %v1306_v20  ;;  %v1402_v52 = vsel %vm22_vm1, %v3821_v27, %v1304_v46  ;;  %v1509_v2 = vsub.f32 %v3249_v49, %v2159_v59  ;;  %v3871_v49 = vld [vmem:[#allocation62_spill] sm:$0xff] }
 0x372   :  { %v1428_v16 = vsel %vm1421_vm8, %v1411_v29, %v3862_v15 }
 0x373   :  { %1445 = vst.msk [vmem:[#allocation2 + $0x30] sm:$0xff] %vm24_vm2, %v1428_v16 }
 0x374   :  { %v1354_v34 = vpop.permute.xlu0 %1353 }
 0x375   :  { %v1412_v31 = vsel %vm1404_vm7, %v1395_v51, %v1354_v34 }
 0x376   :  { %v1429_v18 = vsel %vm1421_vm8, %v1412_v31, %v3864_v22  ;;  %v2161_v22 = vld [vmem:[%s3705_s2 + $0x28] sm:$0xff] }
 0x377   :  { %1446 = vst.msk [vmem:[#allocation2 + $0x38] sm:$0xff] %vm24_vm2, %v1429_v18  ;;  %v1511_v18 = vsub.f32 %v3328_v50, %v2161_v22  ;;  %v3873_v50 = vld [vmem:[#allocation64_spill] sm:$0xff] }
 0x378   :  { %v1370_v41 = vpop.permute.xlu0 %1369 }
 0x379   :  { %v1420_v32 = vsel %vm1404_vm7, %v1403_v36, %v1370_v41  ;;  %v2162_v41 = vld [vmem:[%s3705_s2 + $0x30] sm:$0xff] }
 0x37a   :  { %v1437_v13 = vsel %vm1421_vm8, %v1420_v32, %v3866_v14  ;;  %v1512_v11 = vsub.f32 %v3375_v48, %v2162_v41  ;;  %v3874_v48 = vld [vmem:[#allocation65_spill] sm:$0xff] }
 0x37b   :  { %1454 = vst.msk [vmem:[#allocation2 + $0x78] sm:$0xff] %vm24_vm2, %v1437_v13 }
 0x37c   :  { %1746 = vxpose.xlu1.b32.start [1/16] (narrow) %v1730_v45, 8 }
 0x380   :  { %1747 = vxpose.xlu1.b32.cont [2/16] (narrow) %v1731_v17, 8  ;;  %v1513_v17 = vsub.f32 %v3384_v35, %v2163_v55 }
 0x395   :  { %v1368_v40 = vpop.permute.xlu1 %1367 }
 0x396   :  { %v1419_v42 = vsel %vm1404_vm7, %v1402_v52, %v1368_v40 }
 0x397   :  { %v1436_v1 = vsel %vm1421_vm8, %v1419_v42, %v3868_v33 }
 0x398   :  { %1453 = vst.msk [vmem:[#allocation2 + $0x70] sm:$0xff] %vm24_vm2, %v1436_v1  ;;  %v3875_v1 = vld [vmem:[#allocation58_spill] sm:$0xff] }
 0x399   :  { %v1591_v10 = vpop.permute.xlu1 %1590  ;;  %v1722_v62 = vsel %vm1404_vm7, %v3535_v25, %v3875_v1  ;;  %v2165_v25 = vld [vmem:[%s3705_s2 + $0x58] sm:$0xff] }
 0x39a   :  { %v1700_v8 = vsel %vm22_vm1, %v1508_v53, %v1591_v10  ;;  %v2164_v53 = vld [vmem:[%s3705_s2 + $0x50] sm:$0xff]  ;;  %v1738_v35 = vsel %vm1421_vm8, %v1722_v62, 0.0 }
 0x39b   :  { %v1716_v27 = vsel %vm1404_vm7, %v1700_v8, %v3869_v12  ;;  %v1516_v10 = vsub.f32 %v3259_v30, %v2164_v53  ;;  %v1723_v8 = vsel %vm1404_vm7, %v3554_v23, %v3402_v61  ;;  %v2166_v61 = vld [vmem:[%s3705_s2 + $0x60] sm:$0xff] }
 0x39c   :  { %v1732_v46 = vsel %vm1421_vm8, %v1716_v27, 0.0  ;;  %v1517_v27 = vsub.f32 %v3273_v21, %v2165_v25  ;;  %v1518_v23 = vsub.f32 %v3333_v58, %v2166_v61 }
 0x39d   :  { %1748 = vxpose.xlu1.b32.cont [3/16] (narrow) %v1732_v46, 8  ;;  %v1607_v38 = vpop.permute.xlu1 %1606  ;;  %v1739_v46 = vsel %vm1421_vm8, %v1723_v8, 0.0 }
 0x39e   :  { %v1708_v12 = vsel %vm22_vm1, %v1516_v10, %v1607_v38 }
 0x39f   :  { %v1724_v30 = vsel %vm1404_vm7, %v1708_v12, %v3407_v4  ;;  %v2167_v4 = vld [vmem:[%s3705_s2 + $0x68] sm:$0xff] }
 0x3a0   :  { %v1740_v38 = vsel %vm1421_vm8, %v1724_v30, 0.0 }
 0x3a1   :  { %v1593_v20 = vpop.permute.xlu1 %1592 }
 0x3a2   :  { %v1701_v43 = vsel %vm22_vm1, %v1509_v2, %v1593_v20  ;;  %v1519_v20 = vsub.f32 %v3345_v44, %v2167_v4 }
 0x3a3   :  { %v1717_v29 = vsel %vm1404_vm7, %v1701_v43, %v3870_v3 }
 0x3a4   :  { %v1733_v15 = vsel %vm1421_vm8, %v1717_v29, 0.0 }
 0x3a5   :  { %1749 = vxpose.xlu1.b32.cont [4/16] (narrow) %v1733_v15, 8  ;;  %v1609_v16 = vpop.permute.xlu1 %1608 }
 0x3a6   :  { %v1709_v59 = vsel %vm22_vm1, %v1517_v27, %v1609_v16 }
 0x3a7   :  { %v1725_v2 = vsel %vm1404_vm7, %v1709_v59, %v3413_v5  ;;  %v2168_v5 = vld [vmem:[%s3705_s2 + $0x70] sm:$0xff] }
 0x3a8   :  { %v1741_v43 = vsel %vm1421_vm8, %v1725_v2, 0.0  ;;  %v1520_v29 = vsub.f32 %v3482_v63, %v2168_v5 }
 0x3a9   :  { %v1595_v26 = vpop.permute.xlu1 %1594 }
 0x3aa   :  { %v1702_v51 = vsel %vm22_vm1, %v1510_v6, %v1595_v26 }
 0x3ab   :  { %v1718_v34 = vsel %vm1404_vm7, %v1702_v51, %v3871_v49 }
 0x3ac   :  { %v1734_v19 = vsel %vm1421_vm8, %v1718_v34, 0.0 }
 0x3ad   :  { %1750 = vxpose.xlu1.b32.cont [5/16] (narrow) %v1734_v19, 8  ;;  %v1611_v31 = vpop.permute.xlu1 %1610 }
 0x3ae   :  { %v1710_v21 = vsel %vm22_vm1, %v1518_v23, %v1611_v31 }
 0x3af   :  { %v1726_v3 = vsel %vm1404_vm7, %v1710_v21, %v3419_v0  ;;  %v2169_v0 = vld [vmem:[%s3705_s2 + $0x78] sm:$0xff]  ;;  %s2198_s2 = smov [#allocation3]  }
 0x3b0   :  { %v1742_v15 = vsel %vm1421_vm8, %v1726_v3, 0.0  ;;  %v1521_v6 = vsub.f32 %v3395_v24, %v2169_v0  ;;  %s1785_s14 = sshll.u32 %s2198_s2, 4  ;;  %s1786_s14 = int_to_ptr.vmem [resolvable:$true] %s1785_s14 }
 0x3b1   :  { %v1597_v47 = vpop.permute.xlu1 %1596  ;;  %s2170_s15 = scalar_lea.vmem %s1786_s14, 128  ;;  %p2175_p1 = scmp.lt.s32.totalorder %s1786_s14, %s1786_s14 }
 0x3b2   :  { %v1703_v7 = vsel %vm22_vm1, %v1511_v18, %v1597_v47  ;;  %p2171_p0 = scmp.ne.s32.totalorder %s1786_s14, %s2170_s15  ;;  %p2176_p2 = scmp.lt.s32.totalorder %s2170_s15, %s2170_s15 }
 0x3b3   :  { %v1719_v56 = vsel %vm1404_vm7, %v1703_v7, %v3872_v60 }
 0x3b4   :  { %v1735_v37 = vsel %vm1421_vm8, %v1719_v56, 0.0  ;;  %p2177_p3 = por %p2176_p2, %p2175_p1 }
 0x3b5   :  { %1751 = vxpose.xlu1.b32.cont [6/16] (narrow) %v1735_v37, 8  ;;  %v1613_v36 = vpop.permute.xlu1 %1612 }
 0x3b6   :  { %v1711_v58 = vsel %vm22_vm1, %v1519_v20, %v1613_v36  ;;  %p2178_p4 = pnand %p2177_p3, %p2171_p0 }
 0x3b7   :  { %v1727_v16 = vsel %vm1404_vm7, %v1711_v58, %v3428_v9 }
 0x3b8   :  { %v1743_v26 = vsel %vm1421_vm8, %v1727_v16, 0.0 }
 0x3b9   :  { %v1599_v32 = vpop.permute.xlu1 %1598 }
 0x3ba   :  { %v1704_v14 = vsel %vm22_vm1, %v1512_v11, %v1599_v32 }
 0x3bb   :  { %v1720_v13 = vsel %vm1404_vm7, %v1704_v14, %v3873_v50 }
 0x3bc   :  { %v1736_v45 = vsel %vm1421_vm8, %v1720_v13, 0.0 }
 0x3bd   :  { %1752 = vxpose.xlu1.b32.cont [7/16] (narrow) %v1736_v45, 8  ;;  %v1615_v39 = vpop.permute.xlu1 %1614 }
 0x3be   :  { %v1712_v44 = vsel %vm22_vm1, %v1520_v29, %v1615_v39 }
 0x3bf   :  { %v1728_v63 = vsel %vm1404_vm7, %v1712_v44, %v3438_v57 }
 0x3c0   :  { %v1744_v9 = vsel %vm1421_vm8, %v1728_v63, 0.0 }
 0x3c1   :  { %v1601_v52 = vpop.permute.xlu1 %1600 }
 0x3c2   :  { %v1705_v40 = vsel %vm22_vm1, %v1513_v17, %v1601_v52 }
 0x3c3   :  { %v1721_v42 = vsel %vm1404_vm7, %v1705_v40, %v3874_v48 }
 0x3c4   :  { %v1737_v33 = vsel %vm1421_vm8, %v1721_v42, 0.0 }
 0x3c5   :  { %1753 = vxpose.xlu1.b32.cont [8/16] (narrow) %v1737_v33, 8  ;;  %v1617_v28 = vpop.permute.xlu1 %1616 }
 0x3c6   :  { %v1713_v51 = vsel %vm22_vm1, %v1521_v6, %v1617_v28 }
 0x3c7   :  { %v1729_v49 = vsel %vm1404_vm7, %v1713_v51, %v3445_v54 }
 0x3c8   :  { %v1745_v34 = vsel %vm1421_vm8, %v1729_v49, 0.0 }
 0x3c9   :  { %1754 = vxpose.xlu1.b32.cont [9/16] (narrow) %v1738_v35, 8 }
 0x3cd   :  { %1755 = vxpose.xlu1.b32.cont [10/16] (narrow) %v1739_v46, 8 }
 0x3d1   :  { %1756 = vxpose.xlu1.b32.cont [11/16] (narrow) %v1740_v38, 8 }
 0x3d5   :  { %1757 = vxpose.xlu1.b32.cont [12/16] (narrow) %v1741_v43, 8 }
 0x3d9   :  { %1758 = vxpose.xlu1.b32.cont [13/16] (narrow) %v1742_v15, 8 }
 0x3dd   :  { %1759 = vxpose.xlu1.b32.cont [14/16] (narrow) %v1743_v26, 8 }
 0x3e1   :  { %1760 = vxpose.xlu1.b32.cont [15/16] (narrow) %v1744_v9, 8 }
 0x3e5   :  { %1761 = vxpose.xlu1.b32.end [16/16] (narrow) %v1745_v34, 8 }
 0x425   :  { %v1762_v24 = vpop.trf.xlu1 }
 0x426   :  { %1778 = vst [vmem:[#allocation3] sm:$0xff] %v1762_v24 }
 0x427   :  { %2181 = shalt.err (!%p2178_p4)
}
 0x428   :  { %1788 = dma.vmem_to_hbm [thread:$0]  %s1786_s14, 128, %s3707_s4, [#allocation4]  }
 0x429   :  { %2190 = dma.done.wait [#allocation4], 128  }
 0x42a   :  { %2191 = vsyncadd [#allocation4], 4294967168 }
 0x42b   :  { %1792 = vsyncpa [#allocation4], 1 }

// kernel: tpu_custom_call.1
= control target key start
LH: loop header
LB: loop body
LE: loop exit
PB: predicated region body
PF: predicated region fallthrough
CT: control target
= control target key end

     0   :  { %vm89_vm0 = vcmask 261120   ;;  %vm22_vm1 = vcmask 7168   ;;  %v3708_v3 = vmov 0.0   ;;  %vm24_vm2 = vcmask 31744   ;;  %s2194_s6 = smov 127   ;;  %s3703_s0 = inlined_call_operand.vmem [shape: f32[128,32], index: 0, kind: input, shape index: {}]   ;;  %s3704_s1 = inlined_call_operand.vmem [shape: f32[256,32], index: 1, kind: input, shape index: {}]   ;;  %s3705_s2 = inlined_call_operand.vmem [shape: f32[128,1], index: 2, kind: input, shape index: {}]   ;;  %s3706_s3 = inlined_call_operand.vmem [shape: f32[1,256], index: 3, kind: input, shape index: {}]   ;;  %s3707_s4 = inlined_call_operand.hbm [shape: f32[8,128], index: 4, kind: output, shape index: {}]  }
   0x1   :  { %v88_v0 = vld [vmem:[%s3704_s1 + $0xf8] sm:$0xff]  ;;  %v87_v2 = vld [vmem:[%s3704_s1 + $0xf0] sm:$0xff]  ;;  %v23_v4 = vsel %vm22_vm1, -1e+30, %v3708_v3  ;;  %v86_v6 = vld [vmem:[%s3704_s1 + $0xe8] sm:$0xff]  ;;  %v2193_v7 = vmov 0  }
   0x2   :  { %v72_v1 = vld [vmem:[%s3704_s1 + $0x78] sm:$0xff]  ;;  %1873 = vmatprep.subr.msk.mxu0 %vm89_vm0, %v88_v0  ;;  %1937 = vmatprep.subr.msk.mxu1 %vm89_vm0, %v88_v0  ;;  %25 = vst.msk [vmem:[#allocation2] sm:$0xff] %vm24_vm2, %v23_v4  ;;  %26 = vst.msk [vmem:[#allocation2 + $0x8] sm:$0xff] %vm24_vm2, %v23_v4  ;;  %v71_v5 = vld [vmem:[%s3704_s1 + $0x70] sm:$0xff] }
   0x3   :  { %1874 = vmatpush3.xpose.msk.msra.mxu0 %vm89_vm0, %v72_v1  ;;  %1953 = vmatpush3.xpose.msk.msra.mxu1 %vm89_vm0, %v72_v1  ;;  %27 = vst.msk [vmem:[#allocation2 + $0x10] sm:$0xff] %vm24_vm2, %v23_v4  ;;  %28 = vst.msk [vmem:[#allocation2 + $0x18] sm:$0xff] %vm24_vm2, %v23_v4  ;;  %v70_v8 = vld [vmem:[%s3704_s1 + $0x68] sm:$0xff]  ;;  %v85_v9 = vld [vmem:[%s3704_s1 + $0xe0] sm:$0xff] }
   0x4   :  { %29 = vst.msk [vmem:[#allocation2 + $0x20] sm:$0xff] %vm24_vm2, %v23_v4  ;;  %30 = vst.msk [vmem:[#allocation2 + $0x28] sm:$0xff] %vm24_vm2, %v23_v4  ;;  %1875 = vmatprep.subr.msk.mxu0 %vm89_vm0, %v87_v2  ;;  %1938 = vmatprep.subr.msk.mxu1 %vm89_vm0, %v87_v2  ;;  %v69_v12 = vld [vmem:[%s3704_s1 + $0x60] sm:$0xff]  ;;  %v84_v13 = vld [vmem:[%s3704_s1 + $0xd8] sm:$0xff] }
   0x5   :  { %31 = vst.msk [vmem:[#allocation2 + $0x30] sm:$0xff] %vm24_vm2, %v23_v4  ;;  %32 = vst.msk [vmem:[#allocation2 + $0x38] sm:$0xff] %vm24_vm2, %v23_v4  ;;  %1977 = vset.pattern.permute.xlu1 %v2193_v7  ;;  %1976 = vset.pattern.permute.xlu0 %v2193_v7  ;;  %v68_v16 = vld [vmem:[%s3704_s1 + $0x58] sm:$0xff]  ;;  %v2305_v17 = vld [vmem:[%s3703_s0] sm:$0xff] }
   0x6   :  { %33 = vst.msk [vmem:[#allocation2 + $0x40] sm:$0xff] %vm24_vm2, %v23_v4  ;;  %34 = vst.msk [vmem:[#allocation2 + $0x48] sm:$0xff] %vm24_vm2, %v23_v4  ;;  %v2310_v18 = vld [vmem:[%s3703_s0 + $0x40] sm:$0xff]  ;;  %v83_v19 = vld [vmem:[%s3704_s1 + $0xd0] sm:$0xff]  ;;  %1905 = vmatprep.mubr.msk.f32.mxu0 %vm89_vm0, %v2305_v17 }
   0x7   :  { %35 = vst.msk [vmem:[#allocation2 + $0x50] sm:$0xff] %vm24_vm2, %v23_v4  ;;  %36 = vst.msk [vmem:[#allocation2 + $0x58] sm:$0xff] %vm24_vm2, %v23_v4  ;;  %1876 = vmatpush3.xpose.msk.msra.mxu0 %vm89_vm0, %v71_v5  ;;  %1954 = vmatpush3.xpose.msk.msra.mxu1 %vm89_vm0, %v71_v5  ;;  %v67_v22 = vld [vmem:[%s3704_s1 + $0x50] sm:$0xff]  ;;  %v82_v23 = vld [vmem:[%s3704_s1 + $0xc8] sm:$0xff] }
   0x8   :  { %37 = vst.msk [vmem:[#allocation2 + $0x60] sm:$0xff] %vm24_vm2, %v23_v4  ;;  %38 = vst.msk [vmem:[#allocation2 + $0x68] sm:$0xff] %vm24_vm2, %v23_v4  ;;  %1877 = vmatprep.subr.msk.mxu0 %vm89_vm0, %v86_v6  ;;  %1939 = vmatprep.subr.msk.mxu1 %vm89_vm0, %v86_v6  ;;  %v66_v26 = vld [vmem:[%s3704_s1 + $0x48] sm:$0xff]  ;;  %v81_v27 = vld [vmem:[%s3704_s1 + $0xc0] sm:$0xff] }
   0x9   :  { %39 = vst.msk [vmem:[#allocation2 + $0x70] sm:$0xff] %vm24_vm2, %v23_v4  ;;  %40 = vst.msk [vmem:[#allocation2 + $0x78] sm:$0xff] %vm24_vm2, %v23_v4  ;;  %v2273_v10 = vld [vmem:[#allocation2] sm:$0xff]  ;;  %v2275_v11 = vld [vmem:[#allocation2 + $0x8] sm:$0xff]  ;;  %1921 = vmatprep.mubr.msk.f32.mxu1 %vm89_vm0, %v2310_v18 }
   0xa   :  { %731 = vrot.lane.b32.xlu1 %v2273_v10, %s2194_s6  ;;  %733 = vrot.lane.b32.xlu0 %v2275_v11, %s2194_s6  ;;  %v2291_v14 = vld [vmem:[#allocation2 + $0x10] sm:$0xff]  ;;  %v2293_v15 = vld [vmem:[#allocation2 + $0x18] sm:$0xff]  ;;  %v65_v30 = vld [vmem:[%s3704_s1 + $0x40] sm:$0xff] }
   0xb   :  { %1878 = vmatpush3.xpose.msk.msra.mxu0 %vm89_vm0, %v70_v8  ;;  %1955 = vmatpush3.xpose.msk.msra.mxu1 %vm89_vm0, %v70_v8  ;;  %v2319_v20 = vld [vmem:[#allocation2 + $0x20] sm:$0xff]  ;;  %v2321_v21 = vld [vmem:[#allocation2 + $0x28] sm:$0xff] }
   0xc   :  { %1879 = vmatprep.subr.msk.mxu0 %vm89_vm0, %v85_v9  ;;  %1940 = vmatprep.subr.msk.mxu1 %vm89_vm0, %v85_v9  ;;  %v2341_v24 = vld [vmem:[#allocation2 + $0x30] sm:$0xff]  ;;  %v2343_v25 = vld [vmem:[#allocation2 + $0x38] sm:$0xff] }
   0xd   :  { %v2359_v28 = vld [vmem:[#allocation2 + $0x40] sm:$0xff]  ;;  %v2361_v29 = vld [vmem:[#allocation2 + $0x48] sm:$0xff] }
   0xe   :  { %735 = vrot.lane.b32.xlu1 %v2291_v14, %s2194_s6  ;;  %737 = vrot.lane.b32.xlu0 %v2293_v15, %s2194_s6 }
   0xf   :  { %1880 = vmatpush3.xpose.msk.msra.mxu0 %vm89_vm0, %v69_v12  ;;  %1956 = vmatpush3.xpose.msk.msra.mxu1 %vm89_vm0, %v69_v12 }
  0x10   :  { %1881 = vmatprep.subr.msk.mxu0 %vm89_vm0, %v84_v13  ;;  %1941 = vmatprep.subr.msk.mxu1 %vm89_vm0, %v84_v13 }
  0x12   :  { %739 = vrot.lane.b32.xlu1 %v2319_v20, %s2194_s6  ;;  %741 = vrot.lane.b32.xlu0 %v2321_v21, %s2194_s6 }
  0x13   :  { %1882 = vmatpush3.xpose.msk.msra.mxu0 %vm89_vm0, %v68_v16  ;;  %1957 = vmatpush3.xpose.msk.msra.mxu1 %vm89_vm0, %v68_v16 }
  0x14   :  { %1883 = vmatprep.subr.msk.mxu0 %vm89_vm0, %v83_v19  ;;  %1942 = vmatprep.subr.msk.mxu1 %vm89_vm0, %v83_v19 }
  0x16   :  { %743 = vrot.lane.b32.xlu1 %v2341_v24, %s2194_s6  ;;  %745 = vrot.lane.b32.xlu0 %v2343_v25, %s2194_s6 }
  0x17   :  { %1884 = vmatpush3.xpose.msk.msra.mxu0 %vm89_vm0, %v67_v22  ;;  %1958 = vmatpush3.xpose.msk.msra.mxu1 %vm89_vm0, %v67_v22 }
  0x18   :  { %1885 = vmatprep.subr.msk.mxu0 %vm89_vm0, %v82_v23  ;;  %1943 = vmatprep.subr.msk.mxu1 %vm89_vm0, %v82_v23 }
  0x1b   :  { %1886 = vmatpush3.xpose.msk.msra.mxu0 %vm89_vm0, %v66_v26  ;;  %1959 = vmatpush3.xpose.msk.msra.mxu1 %vm89_vm0, %v66_v26 }
  0x1c   :  { %1887 = vmatprep.subr.msk.mxu0 %vm89_vm0, %v81_v27  ;;  %1944 = vmatprep.subr.msk.mxu1 %vm89_vm0, %v81_v27 }
  0x1d   :  { %9 = vsyncpa [#allocation4], 0  ;;  %v80_v31 = vld [vmem:[%s3704_s1 + $0xb8] sm:$0xff]  ;;  %747 = vrot.lane.b32.xlu1 %v2359_v28, %s2194_s6  ;;  %749 = vrot.lane.b32.xlu0 %v2361_v29, %s2194_s6  ;;  %v2377_v32 = vld [vmem:[#allocation2 + $0x50] sm:$0xff]  ;;  %s2195_s17 = smov 126   ;;  %s2196_s10 = smov 1  }
  0x1e   :  { %v2379_v33 = vld [vmem:[#allocation2 + $0x58] sm:$0xff]  ;;  %v79_v35 = vld [vmem:[%s3704_s1 + $0xb0] sm:$0xff]  ;;  %v2395_v36 = vld [vmem:[#allocation2 + $0x60] sm:$0xff]  ;;  %s2197_s11 = smov 2  }
  0x1f   :  { %1888 = vmatpush3.xpose.msk.msra.mxu0 %vm89_vm0, %v65_v30  ;;  %1960 = vmatpush3.xpose.msk.msra.mxu1 %vm89_vm0, %v65_v30  ;;  %v64_v34 = vld [vmem:[%s3704_s1 + $0x38] sm:$0xff]  ;;  %v2397_v37 = vld [vmem:[#allocation2 + $0x68] sm:$0xff]  ;;  %v63_v38 = vld [vmem:[%s3704_s1 + $0x30] sm:$0xff] }
  0x20   :  { %1889 = vmatprep.subr.msk.mxu0 %vm89_vm0, %v80_v31  ;;  %1945 = vmatprep.subr.msk.mxu1 %vm89_vm0, %v80_v31  ;;  %v78_v39 = vld [vmem:[%s3704_s1 + $0xa8] sm:$0xff]  ;;  %v2413_v40 = vld [vmem:[#allocation2 + $0x70] sm:$0xff]  ;;  %v2415_v41 = vld [vmem:[#allocation2 + $0x78] sm:$0xff] }
  0x21   :  { %751 = vrot.lane.b32.xlu1 %v2377_v32, %s2194_s6  ;;  %753 = vrot.lane.b32.xlu0 %v2379_v33, %s2194_s6  ;;  %v62_v42 = vld [vmem:[%s3704_s1 + $0x28] sm:$0xff]  ;;  %v77_v43 = vld [vmem:[%s3704_s1 + $0xa0] sm:$0xff] }
  0x22   :  { %v61_v44 = vld [vmem:[%s3704_s1 + $0x20] sm:$0xff]  ;;  %v76_v45 = vld [vmem:[%s3704_s1 + $0x98] sm:$0xff]  ;;  %v75_v47 = vld [vmem:[%s3704_s1 + $0x90] sm:$0xff] }
  0x23   :  { %1890 = vmatpush3.xpose.msk.msra.mxu0 %vm89_vm0, %v64_v34  ;;  %1961 = vmatpush3.xpose.msk.msra.mxu1 %vm89_vm0, %v64_v34  ;;  %v60_v46 = vld [vmem:[%s3704_s1 + $0x18] sm:$0xff]  ;;  %v59_v48 = vld [vmem:[%s3704_s1 + $0x10] sm:$0xff]  ;;  %v74_v49 = vld [vmem:[%s3704_s1 + $0x88] sm:$0xff] }
  0x24   :  { %1891 = vmatprep.subr.msk.mxu0 %vm89_vm0, %v79_v35  ;;  %1946 = vmatprep.subr.msk.mxu1 %vm89_vm0, %v79_v35  ;;  %v58_v50 = vld [vmem:[%s3704_s1 + $0x8] sm:$0xff]  ;;  %v73_v51 = vld [vmem:[%s3704_s1 + $0x80] sm:$0xff]  ;;  %v43_v55 = vld [vmem:[%s3703_s0 + $0x10] sm:$0xff] }
  0x25   :  { %755 = vrot.lane.b32.xlu1 %v2395_v36, %s2194_s6  ;;  %757 = vrot.lane.b32.xlu0 %v2397_v37, %s2194_s6  ;;  %v57_v52 = vld [vmem:[%s3704_s1] sm:$0xff]  ;;  %v42_v53 = vld [vmem:[%s3703_s0 + $0x8] sm:$0xff] }
  0x26   :  { %v50_v54 = vld [vmem:[%s3703_s0 + $0x48] sm:$0xff]  ;;  %v51_v56 = vld [vmem:[%s3703_s0 + $0x50] sm:$0xff]  ;;  %v44_v57 = vld [vmem:[%s3703_s0 + $0x18] sm:$0xff] }
  0x27   :  { %1892 = vmatpush3.xpose.msk.msra.mxu0 %vm89_vm0, %v63_v38  ;;  %1962 = vmatpush3.xpose.msk.msra.mxu1 %vm89_vm0, %v63_v38  ;;  %v52_v58 = vld [vmem:[%s3703_s0 + $0x58] sm:$0xff]  ;;  %v396_v59 = vld [vmem:[%s3705_s2 + $0x8] sm:$0xff]  ;;  %v395_v60 = vld [vmem:[%s3705_s2] sm:$0xff] }
  0x28   :  { %1893 = vmatprep.subr.msk.mxu0 %vm89_vm0, %v78_v39  ;;  %1947 = vmatprep.subr.msk.mxu1 %vm89_vm0, %v78_v39  ;;  %v45_v61 = vld [vmem:[%s3703_s0 + $0x20] sm:$0xff]  ;;  %v397_v63 = vld [vmem:[%s3705_s2 + $0x10] sm:$0xff]  ;;  %v398_v0 = vld [vmem:[%s3705_s2 + $0x18] sm:$0xff] }
  0x29   :  { %759 = vrot.lane.b32.xlu1 %v2413_v40, %s2194_s6  ;;  %761 = vrot.lane.b32.xlu0 %v2415_v41, %s2194_s6  ;;  %v53_v62 = vld [vmem:[%s3703_s0 + $0x60] sm:$0xff]  ;;  %v46_v1 = vld [vmem:[%s3703_s0 + $0x28] sm:$0xff] }
  0x2a   :  { %v54_v2 = vld [vmem:[%s3703_s0 + $0x68] sm:$0xff]  ;;  %v399_v4 = vld [vmem:[%s3705_s2 + $0x20] sm:$0xff]  ;;  %v47_v6 = vld [vmem:[%s3703_s0 + $0x30] sm:$0xff] }
  0x2b   :  { %1894 = vmatpush3.xpose.msk.msra.mxu0 %vm89_vm0, %v62_v42  ;;  %1963 = vmatpush3.xpose.msk.msra.mxu1 %vm89_vm0, %v62_v42  ;;  %v400_v5 = vld [vmem:[%s3705_s2 + $0x28] sm:$0xff]  ;;  %v55_v7 = vld [vmem:[%s3703_s0 + $0x70] sm:$0xff]  ;;  %v402_v9 = vld [vmem:[%s3705_s2 + $0x38] sm:$0xff] }
  0x2c   :  { %1895 = vmatprep.subr.msk.mxu0 %vm89_vm0, %v77_v43  ;;  %1948 = vmatprep.subr.msk.mxu1 %vm89_vm0, %v77_v43  ;;  %v401_v8 = vld [vmem:[%s3705_s2 + $0x30] sm:$0xff]  ;;  %v48_v12 = vld [vmem:[%s3703_s0 + $0x38] sm:$0xff]  ;;  %v403_v16 = vld [vmem:[%s3705_s2 + $0x40] sm:$0xff] }
  0x2d   :  { %861 = vrot.lane.b32.xlu1 %v2275_v11, %s2195_s17  ;;  %859 = vrot.lane.b32.xlu0 %v2273_v10, %s2195_s17  ;;  %v56_v13 = vld [vmem:[%s3703_s0 + $0x78] sm:$0xff]  ;;  %v407_v22 = vld [vmem:[%s3705_s2 + $0x60] sm:$0xff] }
  0x2e   :  { %v406_v19 = vld [vmem:[%s3705_s2 + $0x58] sm:$0xff]  ;;  %v408_v23 = vld [vmem:[%s3705_s2 + $0x68] sm:$0xff]  ;;  %v409_v26 = vld [vmem:[%s3705_s2 + $0x70] sm:$0xff] }
  0x2f   :  { %1896 = vmatpush3.xpose.msk.msra.mxu0 %vm89_vm0, %v61_v44  ;;  %1964 = vmatpush3.xpose.msk.msra.mxu1 %vm89_vm0, %v61_v44  ;;  %v410_v27 = vld [vmem:[%s3705_s2 + $0x78] sm:$0xff] }
  0x30   :  { %1897 = vmatprep.subr.msk.mxu0 %vm89_vm0, %v76_v45  ;;  %1949 = vmatprep.subr.msk.mxu1 %vm89_vm0, %v76_v45 }
  0x31   :  { %863 = vrot.lane.b32.xlu1 %v2291_v14, %s2195_s17  ;;  %865 = vrot.lane.b32.xlu0 %v2293_v15, %s2195_s17 }
  0x33   :  { %1898 = vmatpush3.xpose.msk.msra.mxu0 %vm89_vm0, %v60_v46  ;;  %1965 = vmatpush3.xpose.msk.msra.mxu1 %vm89_vm0, %v60_v46 }
  0x34   :  { %1899 = vmatprep.subr.msk.mxu0 %vm89_vm0, %v75_v47  ;;  %1950 = vmatprep.subr.msk.mxu1 %vm89_vm0, %v75_v47 }
  0x35   :  { %867 = vrot.lane.b32.xlu1 %v2319_v20, %s2195_s17  ;;  %869 = vrot.lane.b32.xlu0 %v2321_v21, %s2195_s17 }
  0x37   :  { %1900 = vmatpush3.xpose.msk.msra.mxu0 %vm89_vm0, %v59_v48  ;;  %1966 = vmatpush3.xpose.msk.msra.mxu1 %vm89_vm0, %v59_v48 }
  0x38   :  { %1901 = vmatprep.subr.msk.mxu0 %vm89_vm0, %v74_v49  ;;  %1951 = vmatprep.subr.msk.mxu1 %vm89_vm0, %v74_v49 }
  0x39   :  { %871 = vrot.lane.b32.xlu1 %v2341_v24, %s2195_s17  ;;  %873 = vrot.lane.b32.xlu0 %v2343_v25, %s2195_s17 }
  0x3b   :  { %1902 = vmatpush3.xpose.msk.msra.mxu0 %vm89_vm0, %v58_v50  ;;  %1967 = vmatpush3.xpose.msk.msra.mxu1 %vm89_vm0, %v58_v50 }
  0x3c   :  { %1903 = vmatprep.subr.msk.mxu0 %vm89_vm0, %v73_v51  ;;  %1952 = vmatprep.subr.msk.mxu1 %vm89_vm0, %v73_v51 }
  0x3d   :  { %875 = vrot.lane.b32.xlu1 %v2359_v28, %s2195_s17  ;;  %877 = vrot.lane.b32.xlu0 %v2361_v29, %s2195_s17 }
  0x3f   :  { %1904 = vmatpush3.xpose.msk.msra.mxu0 %vm89_vm0, %v57_v52  ;;  %1968 = vmatpush3.xpose.msk.msra.mxu1 %vm89_vm0, %v57_v52 }
  0x41   :  { %879 = vrot.lane.b32.xlu1 %v2377_v32, %s2195_s17  ;;  %881 = vrot.lane.b32.xlu0 %v2379_v33, %s2195_s17 }
  0x42   :  { %1906 = vmatmul.mubr.msk.f32.vlgmr.msra.gmra.mxu0 %vm89_vm0, %v2305_v17  ;;  %1922 = vmatmul.mubr.msk.f32.vlgmr.msra.gmra.mxu1 %vm89_vm0, %v2310_v18  ;;  %v404_v17 = vld [vmem:[%s3705_s2 + $0x48] sm:$0xff]  ;;  %v405_v18 = vld [vmem:[%s3705_s2 + $0x50] sm:$0xff] }
  0x43   :  { %1907 = vmatprep.mubr.msk.f32.mxu0 %vm89_vm0, %v42_v53  ;;  %1923 = vmatprep.mubr.msk.f32.mxu1 %vm89_vm0, %v50_v54 }
  0x45   :  { %883 = vrot.lane.b32.xlu1 %v2395_v36, %s2195_s17  ;;  %885 = vrot.lane.b32.xlu0 %v2397_v37, %s2195_s17 }
  0x46   :  { %1908 = vmatmul.mubr.msk.f32.gmra.mxu0 %vm89_vm0, %v42_v53  ;;  %1924 = vmatmul.mubr.msk.f32.gmra.mxu1 %vm89_vm0, %v50_v54 }
  0x47   :  { %1909 = vmatprep.mubr.msk.f32.mxu0 %vm89_vm0, %v43_v55  ;;  %1925 = vmatprep.mubr.msk.f32.mxu1 %vm89_vm0, %v51_v56 }
  0x49   :  { %887 = vrot.lane.b32.xlu1 %v2413_v40, %s2195_s17  ;;  %889 = vrot.lane.b32.xlu0 %v2415_v41, %s2195_s17 }
  0x4a   :  { %1910 = vmatmul.mubr.msk.f32.gmra.mxu0 %vm89_vm0, %v43_v55  ;;  %1926 = vmatmul.mubr.msk.f32.gmra.mxu1 %vm89_vm0, %v51_v56 }
  0x4b   :  { %1911 = vmatprep.mubr.msk.f32.mxu0 %vm89_vm0, %v44_v57  ;;  %1927 = vmatprep.mubr.msk.f32.mxu1 %vm89_vm0, %v52_v58 }
  0x4d   :  { %1026 = vperm.xlu1 %1977, %v396_v59   ;;  %1021 = vperm.xlu0 %1976, %v395_v60  }
  0x4e   :  { %1912 = vmatmul.mubr.msk.f32.gmra.mxu0 %vm89_vm0, %v44_v57  ;;  %1928 = vmatmul.mubr.msk.f32.gmra.mxu1 %vm89_vm0, %v52_v58 }
  0x4f   :  { %1913 = vmatprep.mubr.msk.f32.mxu0 %vm89_vm0, %v45_v61  ;;  %1929 = vmatprep.mubr.msk.f32.mxu1 %vm89_vm0, %v53_v62 }
  0x51   :  { %1031 = vperm.xlu1 %1977, %v397_v63   ;;  %1036 = vperm.xlu0 %1976, %v398_v0  }
  0x52   :  { %1914 = vmatmul.mubr.msk.f32.gmra.mxu0 %vm89_vm0, %v45_v61  ;;  %1930 = vmatmul.mubr.msk.f32.gmra.mxu1 %vm89_vm0, %v53_v62 }
  0x53   :  { %1915 = vmatprep.mubr.msk.f32.mxu0 %vm89_vm0, %v46_v1  ;;  %1931 = vmatprep.mubr.msk.f32.mxu1 %vm89_vm0, %v54_v2 }
  0x55   :  { %1041 = vperm.xlu1 %1977, %v399_v4   ;;  %1046 = vperm.xlu0 %1976, %v400_v5  }
  0x56   :  { %1916 = vmatmul.mubr.msk.f32.gmra.mxu0 %vm89_vm0, %v46_v1  ;;  %1932 = vmatmul.mubr.msk.f32.gmra.mxu1 %vm89_vm0, %v54_v2 }
  0x57   :  { %1917 = vmatprep.mubr.msk.f32.mxu0 %vm89_vm0, %v47_v6  ;;  %1933 = vmatprep.mubr.msk.f32.mxu1 %vm89_vm0, %v55_v7 }
  0x59   :  { %1051 = vperm.xlu1 %1977, %v401_v8   ;;  %1056 = vperm.xlu0 %1976, %v402_v9  }
  0x5a   :  { %1918 = vmatmul.mubr.msk.f32.gmra.mxu0 %vm89_vm0, %v47_v6  ;;  %1934 = vmatmul.mubr.msk.f32.gmra.mxu1 %vm89_vm0, %v55_v7 }
  0x5b   :  { %1919 = vmatprep.mubr.msk.f32.mxu0 %vm89_vm0, %v48_v12  ;;  %1935 = vmatprep.mubr.msk.f32.mxu1 %vm89_vm0, %v56_v13 }
  0x5d   :  { %1061 = vperm.xlu1 %1977, %v403_v16   ;;  %1066 = vperm.xlu0 %1976, %v404_v17  }
  0x5e   :  { %1920 = vmatmul.mubr.msk.f32.gmra.mxu0 %vm89_vm0, %v48_v12  ;;  %1936 = vmatmul.mubr.msk.f32.gmra.mxu1 %vm89_vm0, %v56_v13 }
  0x61   :  { %1071 = vperm.xlu1 %1977, %v405_v18   ;;  %1076 = vperm.xlu0 %1976, %v406_v19  }
  0x65   :  { %1081 = vperm.xlu1 %1977, %v407_v22   ;;  %1086 = vperm.xlu0 %1976, %v408_v23  }
  0x69   :  { %1091 = vperm.xlu1 %1977, %v409_v26   ;;  %1096 = vperm.xlu0 %1976, %v410_v27  }
  0x7c   :  { %v2634_v30 = vpop.permute.xlu1 %731  ;;  %v2636_v31 = vpop.permute.xlu0 %733 }
  0x7d   :  { %3739 = vst [vmem:[#allocation6_spill] sm:$0xff] %v2634_v30  ;;  %3740 = vst [vmem:[#allocation7_spill] sm:$0xff] %v2636_v31 }
  0x80   :  { %v2638_v34 = vpop.permute.xlu1 %735  ;;  %v2640_v35 = vpop.permute.xlu0 %737 }
  0x81   :  { %3741 = vst [vmem:[#allocation8_spill] sm:$0xff] %v2638_v34  ;;  %3742 = vst [vmem:[#allocation9_spill] sm:$0xff] %v2640_v35 }
  0x84   :  { %v2642_v38 = vpop.permute.xlu1 %739  ;;  %v2644_v39 = vpop.permute.xlu0 %741 }
  0x85   :  { %3743 = vst [vmem:[#allocation10_spill] sm:$0xff] %v2642_v38  ;;  %3744 = vst [vmem:[#allocation11_spill] sm:$0xff] %v2644_v39 }
  0x88   :  { %v2646_v42 = vpop.permute.xlu1 %743  ;;  %v2648_v43 = vpop.permute.xlu0 %745 }
  0x89   :  { %3745 = vst [vmem:[#allocation12_spill] sm:$0xff] %v2646_v42  ;;  %3746 = vst [vmem:[#allocation13_spill] sm:$0xff] %v2648_v43 }
  0x8f   :  { %v2650_v44 = vpop.permute.xlu1 %747  ;;  %v2652_v45 = vpop.permute.xlu0 %749 }
  0x90   :  { %3747 = vst [vmem:[#allocation14_spill] sm:$0xff] %v2652_v45 }
  0x93   :  { %v2654_v46 = vpop.permute.xlu1 %751  ;;  %v2656_v47 = vpop.permute.xlu0 %753 }
  0x94   :  { %3748 = vst [vmem:[#allocation15_spill] sm:$0xff] %v2654_v46  ;;  %3749 = vst [vmem:[#allocation16_spill] sm:$0xff] %v2656_v47 }
  0x97   :  { %v2658_v48 = vpop.permute.xlu1 %755  ;;  %v2660_v49 = vpop.permute.xlu0 %757 }
  0x98   :  { %3750 = vst [vmem:[#allocation17_spill] sm:$0xff] %v2658_v48  ;;  %3751 = vst [vmem:[#allocation18_spill] sm:$0xff] %v2660_v49 }
  0x9b   :  { %v2662_v50 = vpop.permute.xlu1 %759  ;;  %v2664_v51 = vpop.permute.xlu0 %761 }
  0x9c   :  { %3752 = vst [vmem:[#allocation19_spill] sm:$0xff] %v2662_v50  ;;  %3753 = vst [vmem:[#allocation20_spill] sm:$0xff] %v2664_v51 }
  0x9f   :  { %v2666_v52 = vpop.permute.xlu1 %861  ;;  %v2668_v53 = vpop.permute.xlu0 %859 }
  0xa0   :  { %3754 = vst [vmem:[#allocation21_spill] sm:$0xff] %v2666_v52  ;;  %3755 = vst [vmem:[#allocation22_spill] sm:$0xff] %v2668_v53 }
  0xa3   :  { %v2670_v54 = vpop.permute.xlu1 %863  ;;  %v2672_v55 = vpop.permute.xlu0 %865 }
  0xa4   :  { %3756 = vst [vmem:[#allocation23_spill] sm:$0xff] %v2670_v54  ;;  %3757 = vst [vmem:[#allocation24_spill] sm:$0xff] %v2672_v55 }
  0xa7   :  { %v2674_v56 = vpop.permute.xlu1 %867  ;;  %v2676_v57 = vpop.permute.xlu0 %869 }
  0xa8   :  { %3758 = vst [vmem:[#allocation25_spill] sm:$0xff] %v2674_v56  ;;  %3759 = vst [vmem:[#allocation26_spill] sm:$0xff] %v2676_v57 }
  0xab   :  { %v2678_v58 = vpop.permute.xlu1 %871  ;;  %v2680_v59 = vpop.permute.xlu0 %873 }
  0xac   :  { %3760 = vst [vmem:[#allocation27_spill] sm:$0xff] %v2678_v58  ;;  %3761 = vst [vmem:[#allocation28_spill] sm:$0xff] %v2680_v59 }
  0xaf   :  { %v2682_v60 = vpop.permute.xlu1 %875  ;;  %v2684_v61 = vpop.permute.xlu0 %877 }
  0xb0   :  { %3762 = vst [vmem:[#allocation29_spill] sm:$0xff] %v2682_v60  ;;  %3763 = vst [vmem:[#allocation30_spill] sm:$0xff] %v2684_v61 }
  0xb3   :  { %v2686_v62 = vpop.permute.xlu1 %879  ;;  %v2688_v63 = vpop.permute.xlu0 %881 }
  0xb4   :  { %3764 = vst [vmem:[#allocation31_spill] sm:$0xff] %v2686_v62  ;;  %3765 = vst [vmem:[#allocation32_spill] sm:$0xff] %v2688_v63 }
  0xb7   :  { %v2690_v0 = vpop.permute.xlu1 %883  ;;  %v2692_v1 = vpop.permute.xlu0 %885 }
  0xb8   :  { %3766 = vst [vmem:[#allocation33_spill] sm:$0xff] %v2690_v0  ;;  %3767 = vst [vmem:[#allocation34_spill] sm:$0xff] %v2692_v1 }
  0xbb   :  { %v2694_v2 = vpop.permute.xlu1 %887  ;;  %v2696_v4 = vpop.permute.xlu0 %889 }
  0xbc   :  { %3768 = vst [vmem:[#allocation35_spill] sm:$0xff] %v2694_v2  ;;  %3769 = vst [vmem:[#allocation36_spill] sm:$0xff] %v2696_v4  ;;  %v3770_v2 = vmov 0.0  }
  0xc8   :  { %v1027_v5 = vpop.permute.xlu1 %1026  ;;  %v1022_v6 = vpop.permute.xlu0 %1021 }
  0xcc   :  { %v2698_v7 = vpop.permute.xlu1 %1031  ;;  %v2700_v8 = vpop.permute.xlu0 %1036 }
  0xd0   :  { %v2702_v9 = vpop.permute.xlu1 %1041  ;;  %v2704_v12 = vpop.permute.xlu0 %1046 }
  0xd4   :  { %v2706_v13 = vpop.permute.xlu1 %1051  ;;  %v2708_v16 = vpop.permute.xlu0 %1056 }
  0xd8   :  { %v1062_v23 = vpop.permute.xlu1 %1061  ;;  %v1067_v58 = vpop.permute.xlu0 %1066 }
 0x102   :  { %v2710_v17 = vpop.f32.mrf.mxu0  ;;  %v2712_v18 = vpop.f32.mrf.mxu1 }
 0x103   :  { %vm1099_vm3 = vcmp.gt.f32.partialorder %v2710_v17, %v1022_v6  ;;  %vm1115_vm6 = vcmp.gt.f32.partialorder %v2712_v18, %v1062_v23 }
 0x104   :  { %v2715_v19 = vpop.f32.mrf.mxu0  ;;  %v2717_v22 = vpop.f32.mrf.mxu1  ;;  %v1841_v4 = vsel %vm1099_vm3, 1.0, %v3770_v2 }
 0x105   :  { %v427_v26 = vmax.f32 %v2710_v17, %v2715_v19  ;;  %vm1100_vm4 = vcmp.gt.f32.partialorder %v2715_v19, %v1022_v6  ;;  %vm1116_vm5 = vcmp.gt.f32.partialorder %v2717_v22, %v1062_v23  ;;  %v451_v6 = vmax.f32 %v2712_v18, %v2717_v22 }
 0x106   :  { %v2722_v27 = vpop.f32.mrf.mxu0  ;;  %v2724_v3 = vpop.f32.mrf.mxu1  ;;  %v1842_v59 = vsel %vm1100_vm4, 1.0, %v3770_v2 }
 0x107   :  { %428 = vmax.xlane.f32.xlu0 %v427_v26  ;;  %v1195_v50 = vadd.f32 %v1842_v59, %v1841_v4  ;;  %v1858_v59 = vsel %vm1116_vm5, 1.0, %v3770_v2  ;;  %vm1117_vm8 = vcmp.gt.f32.partialorder %v2724_v3, %v1067_v58  ;;  %v1857_v26 = vsel %vm1115_vm6, 1.0, %v3770_v2 }
 0x108   :  { %v2729_v51 = vpop.f32.mrf.mxu0  ;;  %v2731_v1 = vpop.f32.mrf.mxu1  ;;  %v1219_v0 = vadd.f32 %v1858_v59, %v1857_v26  ;;  %v1859_v23 = vsel %vm1117_vm8, 1.0, %v3770_v2  ;;  %vm1101_vm10 = vcmp.gt.f32.partialorder %v2722_v27, %v1027_v5 }
 0x109   :  { %1196 = vadd.xlane.f32.xlu1 %v1195_v50  ;;  %v454_v57 = vmax.f32 %v2724_v3, %v2731_v1  ;;  %vm1118_vm7 = vcmp.gt.f32.partialorder %v2731_v1, %v1067_v58  ;;  %vm1102_vm9 = vcmp.gt.f32.partialorder %v2729_v51, %v1027_v5  ;;  %v430_v58 = vmax.f32 %v2722_v27, %v2729_v51 }
 0x10a   :  { %v2739_v43 = vpop.f32.mrf.mxu0  ;;  %v2743_v4 = vpop.f32.mrf.mxu1  ;;  %v1860_v42 = vsel %vm1118_vm7, 1.0, %v3770_v2  ;;  %v1843_v59 = vsel %vm1101_vm10, 1.0, %v3770_v2 }
 0x10b   :  { %452 = vmax.xlane.f32.xlu0 %v451_v6  ;;  %v1222_v49 = vadd.f32 %v1860_v42, %v1859_v23  ;;  %vm1103_vm12 = vcmp.gt.f32.partialorder %v2739_v43, %v2698_v7 }
 0x10c   :  { %v2745_v50 = vpop.f32.mrf.mxu0  ;;  %v2751_v56 = vpop.f32.mrf.mxu1  ;;  %v1845_v39 = vsel %vm1103_vm12, 1.0, %v3770_v2 }
 0x10d   :  { %455 = vmax.xlane.f32.xlu1 %v454_v57  ;;  %v433_v63 = vmax.f32 %v2739_v43, %v2745_v50  ;;  %v1844_v57 = vsel %vm1102_vm9, 1.0, %v3770_v2  ;;  %v457_v23 = vmax.f32 %v2743_v4, %v2751_v56  ;;  %vm1104_vm11 = vcmp.gt.f32.partialorder %v2745_v50, %v2698_v7 }
 0x10e   :  { %v2753_v6 = vpop.f32.mrf.mxu0  ;;  %v1198_v26 = vadd.f32 %v1844_v57, %v1843_v59  ;;  %v1846_v57 = vsel %vm1104_vm11, 1.0, %v3770_v2  ;;  %v1077_v59 = vpop.permute.xlu0 %1076 }
 0x10f   :  { %1220 = vadd.xlane.f32.xlu0 %v1219_v0  ;;  %v2761_v0 = vpop.f32.mrf.mxu1  ;;  %vm1105_vm14 = vcmp.gt.f32.partialorder %v2753_v6, %v2700_v8  ;;  %v1201_v55 = vadd.f32 %v1846_v57, %v1845_v39 }
 0x110   :  { %v2763_v42 = vpop.f32.mrf.mxu0  ;;  %vm1121_vm4 = vcmp.gt.f32.partialorder %v2761_v0, %v1077_v59 }
 0x111   :  { %1223 = vadd.xlane.f32.xlu1 %v1222_v49  ;;  %v436_v49 = vmax.f32 %v2753_v6, %v2763_v42  ;;  %v2772_v5 = vpop.f32.mrf.mxu1  ;;  %vm1106_vm13 = vcmp.gt.f32.partialorder %v2763_v42, %v2700_v8 }
 0x112   :  { %v460_v48 = vmax.f32 %v2761_v0, %v2772_v5  ;;  %v1848_v7 = vsel %vm1106_vm13, 1.0, %v3770_v2  ;;  %vm1122_vm3 = vcmp.gt.f32.partialorder %v2772_v5, %v1077_v59 }
 0x113   :  { %431 = vmax.xlane.f32.xlu0 %v430_v58  ;;  %v2774_v58 = vpop.f32.mrf.mxu0  ;;  %v1864_v39 = vsel %vm1122_vm3, 1.0, %v3770_v2 }
 0x114   :  { %vm1107_vm6 = vcmp.gt.f32.partialorder %v2774_v58, %v2702_v9 }
 0x115   :  { %434 = vmax.xlane.f32.xlu1 %v433_v63  ;;  %v1072_v63 = vpop.permute.xlu1 %1071  ;;  %v1849_v52 = vsel %vm1107_vm6, 1.0, %v3770_v2 }
 0x116   :  { %vm1120_vm15 = vcmp.gt.f32.partialorder %v2751_v56, %v1072_v63  ;;  %vm1119_vm0 = vcmp.gt.f32.partialorder %v2743_v4, %v1072_v63  ;;  %v1863_v63 = vsel %vm1121_vm4, 1.0, %v3770_v2 }
 0x117   :  { %1199 = vadd.xlane.f32.xlu0 %v1198_v26  ;;  %v2786_v26 = vpop.f32.mrf.mxu1  ;;  %v1862_v8 = vsel %vm1120_vm15, 1.0, %v3770_v2  ;;  %v1861_v54 = vsel %vm1119_vm0, 1.0, %v3770_v2  ;;  %v1228_v57 = vadd.f32 %v1864_v39, %v1863_v63 }
 0x119   :  { %437 = vmax.xlane.f32.xlu1 %v436_v49  ;;  %v2788_v49 = vpop.f32.mrf.mxu0  ;;  %v2797_v62 = vpop.f32.mrf.mxu1 }
 0x11a   :  { %vm1108_vm5 = vcmp.gt.f32.partialorder %v2788_v49, %v2702_v9 }
 0x11b   :  { %458 = vmax.xlane.f32.xlu0 %v457_v23  ;;  %v1847_v23 = vsel %vm1105_vm14, 1.0, %v3770_v2  ;;  %v2799_v61 = vpop.f32.mrf.mxu0  ;;  %v1850_v63 = vsel %vm1108_vm5, 1.0, %v3770_v2 }
 0x11c   :  { %v1204_v38 = vadd.f32 %v1848_v7, %v1847_v23  ;;  %v2806_v7 = vpop.f32.mrf.mxu1  ;;  %vm1109_vm8 = vcmp.gt.f32.partialorder %v2799_v61, %v2704_v12  ;;  %v1207_v47 = vadd.f32 %v1850_v63, %v1849_v52 }
 0x11d   :  { %461 = vmax.xlane.f32.xlu1 %v460_v48  ;;  %v1225_v48 = vadd.f32 %v1862_v8, %v1861_v54  ;;  %v2808_v59 = vpop.f32.mrf.mxu0 }
 0x11e   :  { %v442_v23 = vmax.f32 %v2799_v61, %v2808_v59  ;;  %v2816_v54 = vpop.f32.mrf.mxu1  ;;  %vm1110_vm7 = vcmp.gt.f32.partialorder %v2808_v59, %v2704_v12 }
 0x11f   :  { %1202 = vadd.xlane.f32.xlu0 %v1201_v55  ;;  %v439_v55 = vmax.f32 %v2774_v58, %v2788_v49  ;;  %v2818_v8 = vpop.f32.mrf.mxu0  ;;  %v466_v39 = vmax.f32 %v2806_v7, %v2816_v54  ;;  %v1852_v9 = vsel %vm1110_vm7, 1.0, %v3770_v2  ;;  %vm1404_vm7 = vcmask 15360  }
 0x120   :  { %vm1111_vm14 = vcmp.gt.f32.partialorder %v2818_v8, %v2706_v13 }
 0x121   :  { %1205 = vadd.xlane.f32.xlu1 %v1204_v38  ;;  %v463_v38 = vmax.f32 %v2786_v26, %v2797_v62 }
 0x123   :  { %1226 = vadd.xlane.f32.xlu0 %v1225_v48  ;;  %v1082_v48 = vpop.permute.xlu1 %1081 }
 0x124   :  { %vm1124_vm9 = vcmp.gt.f32.partialorder %v2797_v62, %v1082_v48  ;;  %vm1123_vm10 = vcmp.gt.f32.partialorder %v2786_v26, %v1082_v48 }
 0x125   :  { %1229 = vadd.xlane.f32.xlu1 %v1228_v57  ;;  %v1087_v57 = vpop.permute.xlu0 %1086  ;;  %v1866_v12 = vsel %vm1124_vm9, 1.0, %v3770_v2  ;;  %v1865_v34 = vsel %vm1123_vm10, 1.0, %v3770_v2 }
 0x126   :  { %vm1126_vm11 = vcmp.gt.f32.partialorder %v2816_v54, %v1087_v57  ;;  %vm1125_vm12 = vcmp.gt.f32.partialorder %v2806_v7, %v1087_v57 }
 0x127   :  { %440 = vmax.xlane.f32.xlu0 %v439_v55  ;;  %v2830_v55 = vpop.f32.mrf.mxu1  ;;  %v1868_v52 = vsel %vm1126_vm11, 1.0, %v3770_v2  ;;  %v1867_v48 = vsel %vm1125_vm12, 1.0, %v3770_v2 }
 0x128   :  { %v1234_v63 = vadd.f32 %v1868_v52, %v1867_v48  ;;  %v1092_v52 = vpop.permute.xlu1 %1091 }
 0x129   :  { %443 = vmax.xlane.f32.xlu1 %v442_v23  ;;  %v2832_v23 = vpop.f32.mrf.mxu0  ;;  %v2841_v45 = vpop.f32.mrf.mxu1  ;;  %vm1127_vm4 = vcmp.gt.f32.partialorder %v2830_v55, %v1092_v52 }
 0x12a   :  { %vm1112_vm13 = vcmp.gt.f32.partialorder %v2832_v23, %v2706_v13  ;;  %vm1128_vm3 = vcmp.gt.f32.partialorder %v2841_v45, %v1092_v52  ;;  %v1097_v48 = vpop.permute.xlu0 %1096 }
 0x12b   :  { %464 = vmax.xlane.f32.xlu0 %v463_v38  ;;  %v1851_v38 = vsel %vm1109_vm8, 1.0, %v3770_v2  ;;  %v2843_v35 = vpop.f32.mrf.mxu0  ;;  %vm1421_vm8 = vcmask 23552  }
 0x12c   :  { %v1210_v46 = vadd.f32 %v1852_v9, %v1851_v38  ;;  %v2850_v9 = vpop.f32.mrf.mxu1  ;;  %vm1113_vm0 = vcmp.gt.f32.partialorder %v2843_v35, %v2708_v16 }
 0x12d   :  { %467 = vmax.xlane.f32.xlu1 %v466_v39  ;;  %v1231_v39 = vadd.f32 %v1866_v12, %v1865_v34  ;;  %v2852_v57 = vpop.f32.mrf.mxu0  ;;  %v1855_v13 = vsel %vm1113_vm0, 1.0, %v3770_v2  ;;  %vm1129_vm6 = vcmp.gt.f32.partialorder %v2850_v9, %v1097_v48 }
 0x12e   :  { %v448_v38 = vmax.f32 %v2843_v35, %v2852_v57  ;;  %v2860_v34 = vpop.f32.mrf.mxu1  ;;  %vm1114_vm15 = vcmp.gt.f32.partialorder %v2852_v57, %v2708_v16  ;;  %v1869_v16 = vsel %vm1127_vm4, 1.0, %v3770_v2 }
 0x12f   :  { %1208 = vadd.xlane.f32.xlu0 %v1207_v47  ;;  %v445_v47 = vmax.f32 %v2818_v8, %v2832_v23  ;;  %v472_v12 = vmax.f32 %v2850_v9, %v2860_v34  ;;  %vm1130_vm5 = vcmp.gt.f32.partialorder %v2860_v34, %v1097_v48 }
 0x130   :  { %v1872_v31 = vsel %vm1130_vm5, 1.0, %v3770_v2 }
 0x131   :  { %1211 = vadd.xlane.f32.xlu1 %v1210_v46  ;;  %v469_v46 = vmax.f32 %v2830_v55, %v2841_v45 }
 0x133   :  { %1232 = vadd.xlane.f32.xlu0 %v1231_v39  ;;  %v1854_v39 = vsel %vm1112_vm13, 1.0, %v3770_v2 }
 0x135   :  { %1235 = vadd.xlane.f32.xlu1 %v1234_v63  ;;  %v1853_v63 = vsel %vm1111_vm14, 1.0, %v3770_v2 }
 0x137   :  { %446 = vmax.xlane.f32.xlu0 %v445_v47  ;;  %v1856_v47 = vsel %vm1114_vm15, 1.0, %v3770_v2 }
 0x138   :  { %v1216_v30 = vadd.f32 %v1856_v47, %v1855_v13 }
 0x139   :  { %449 = vmax.xlane.f32.xlu1 %v448_v38  ;;  %v1213_v38 = vadd.f32 %v1854_v39, %v1853_v63 }
 0x13b   :  { %470 = vmax.xlane.f32.xlu0 %v469_v46  ;;  %v1870_v46 = vsel %vm1128_vm3, 1.0, %v3770_v2 }
 0x13c   :  { %v1237_v60 = vadd.f32 %v1870_v46, %v1869_v16 }
 0x13d   :  { %473 = vmax.xlane.f32.xlu1 %v472_v12  ;;  %v1871_v12 = vsel %vm1129_vm6, 1.0, %v3770_v2 }
 0x13e   :  { %v1240_v52 = vadd.f32 %v1872_v31, %v1871_v12 }
 0x13f   :  { %1214 = vadd.xlane.f32.xlu0 %v1213_v38 }
 0x141   :  { %1217 = vadd.xlane.f32.xlu1 %v1216_v30 }
 0x143   :  { %1238 = vadd.xlane.f32.xlu0 %v1237_v60 }
 0x145   :  { %1241 = vadd.xlane.f32.xlu1 %v1240_v52 }
 0x190   :  { %v429_v39 = vpop.xlane.xlu0 %428 }
 0x191   :  { %v2883_v63 = vmax.f32 %v2273_v10, %v429_v39 }
 0x192   :  { %v1197_v53 = vpop.xlane.xlu1 %1196 }
 0x193   :  { %541 = vperm.xlu0 %1976, %v2883_v63   ;;  %v2887_v48 = vadd.f32 %v1197_v53, %v2273_v10 }
 0x194   :  { %v453_v47 = vpop.xlane.xlu0 %452 }
 0x195   :  { %3771 = vst [vmem:[#allocation37_spill] sm:$0xff] %v2887_v48  ;;  %v2890_v38 = vmax.f32 %v2359_v28, %v453_v47 }
 0x196   :  { %v456_v30 = vpop.xlane.xlu1 %455 }
 0x197   :  { %581 = vperm.xlu1 %1977, %v2890_v38   ;;  %1650 = vrot.lane.b32.xlu0 %v2887_v48, %s2194_s6  ;;  %v2903_v53 = vmax.f32 %v2361_v29, %v456_v30 }
 0x198   :  { %v1221_v31 = vpop.xlane.xlu0 %1220 }
 0x199   :  { %v2896_v60 = vadd.f32 %v1221_v31, %v2359_v28 }
 0x19a   :  { %v2898_v2 = vpop.xlane.xlu1 %1223 }
 0x19b   :  { %3772 = vst [vmem:[#allocation38_spill] sm:$0xff] %v2896_v60  ;;  %1666 = vrot.lane.b32.xlu0 %v2896_v60, %s2194_s6 }
 0x19c   :  { %v432_v10 = vpop.xlane.xlu0 %431 }
 0x19d   :  { %v2906_v13 = vmax.f32 %v2275_v11, %v432_v10 }
 0x19e   :  { %v435_v46 = vpop.xlane.xlu1 %434 }
 0x19f   :  { %546 = vperm.xlu1 %1977, %v2906_v13   ;;  %586 = vperm.xlu0 %1976, %v2903_v53   ;;  %v2911_v28 = vmax.f32 %v2291_v14, %v435_v46 }
 0x1a0   :  { %v1200_v16 = vpop.xlane.xlu0 %1199 }
 0x1a1   :  { %v2914_v12 = vadd.f32 %v1200_v16, %v2275_v11 }
 0x1a2   :  { %v438_v52 = vpop.xlane.xlu1 %437 }
 0x1a3   :  { %3773 = vst [vmem:[#allocation39_spill] sm:$0xff] %v2914_v12  ;;  %1652 = vrot.lane.b32.xlu0 %v2914_v12, %s2194_s6  ;;  %551 = vperm.xlu1 %1977, %v2911_v28   ;;  %v2924_v31 = vmax.f32 %v2293_v15, %v438_v52 }
 0x1a4   :  { %v459_v29 = vpop.xlane.xlu0 %458 }
 0x1a5   :  { %v2920_v39 = vmax.f32 %v2377_v32, %v459_v29 }
 0x1a6   :  { %v462_v47 = vpop.xlane.xlu1 %461 }
 0x1a7   :  { %591 = vperm.xlu1 %1977, %v2920_v39   ;;  %v2935_v32 = vmax.f32 %v2379_v33, %v462_v47 }
 0x1a8   :  { %v1203_v30 = vpop.xlane.xlu0 %1202 }
 0x1a9   :  { %v2927_v11 = vadd.f32 %v1203_v30, %v2291_v14 }
 0x1aa   :  { %v1206_v10 = vpop.xlane.xlu1 %1205 }
 0x1ab   :  { %3774 = vst [vmem:[#allocation40_spill] sm:$0xff] %v2927_v11  ;;  %1654 = vrot.lane.b32.xlu0 %v2927_v11, %s2194_s6  ;;  %556 = vperm.xlu1 %1977, %v2924_v31   ;;  %v2941_v29 = vadd.f32 %v1206_v10, %v2293_v15 }
 0x1ac   :  { %v2932_v46 = vpop.xlane.xlu0 %1226 }
 0x1ad   :  { %3775 = vst [vmem:[#allocation41_spill] sm:$0xff] %v2941_v29 }
 0x1ae   :  { %v2937_v16 = vpop.xlane.xlu1 %1229 }
 0x1af   :  { %596 = vperm.xlu0 %1976, %v2935_v32  }
 0x1b0   :  { %v441_v52 = vpop.xlane.xlu0 %440 }
 0x1b1   :  { %v2944_v14 = vmax.f32 %v2319_v20, %v441_v52 }
 0x1b2   :  { %v444_v30 = vpop.xlane.xlu1 %443 }
 0x1b3   :  { %3776 = vst [vmem:[#allocation42_spill] sm:$0xff] %v2944_v14  ;;  %561 = vperm.xlu1 %1977, %v2944_v14   ;;  %1656 = vrot.lane.b32.xlu0 %v2941_v29, %s2194_s6  ;;  %v2954_v15 = vmax.f32 %v2321_v21, %v444_v30 }
 0x1b4   :  { %v465_v12 = vpop.xlane.xlu0 %464 }
 0x1b5   :  { %v2950_v33 = vmax.f32 %v2395_v36, %v465_v12  ;;  %3778 = vst [vmem:[#allocation44_spill] sm:$0xff] %v2954_v15 }
 0x1b6   :  { %v468_v47 = vpop.xlane.xlu1 %467 }
 0x1b7   :  { %3777 = vst [vmem:[#allocation43_spill] sm:$0xff] %v2950_v33  ;;  %601 = vperm.xlu1 %1977, %v2950_v33   ;;  %v2965_v36 = vmax.f32 %v2397_v37, %v468_v47 }
 0x1b8   :  { %v1209_v11 = vpop.xlane.xlu0 %1208 }
 0x1b9   :  { %v2957_v10 = vadd.f32 %v1209_v11, %v2319_v20  ;;  %3780 = vst [vmem:[#allocation46_spill] sm:$0xff] %v2965_v36 }
 0x1ba   :  { %v1212_v52 = vpop.xlane.xlu1 %1211 }
 0x1bb   :  { %3779 = vst [vmem:[#allocation45_spill] sm:$0xff] %v2957_v10  ;;  %1658 = vrot.lane.b32.xlu0 %v2957_v10, %s2194_s6  ;;  %566 = vperm.xlu1 %1977, %v2954_v15   ;;  %v2971_v48 = vadd.f32 %v1212_v52, %v2321_v21 }
 0x1bc   :  { %v2962_v29 = vpop.xlane.xlu0 %1232 }
 0x1bd   :  { %3782 = vst [vmem:[#allocation48_spill] sm:$0xff] %v2971_v48 }
 0x1be   :  { %v2967_v12 = vpop.xlane.xlu1 %1235 }
 0x1bf   :  { %3781 = vst [vmem:[#allocation47_spill] sm:$0xff] %v2967_v12  ;;  %606 = vperm.xlu0 %1976, %v2965_v36  }
 0x1c0   :  { %v447_v30 = vpop.xlane.xlu0 %446 }
 0x1c1   :  { %v2974_v20 = vmax.f32 %v2341_v24, %v447_v30 }
 0x1c2   :  { %v450_v11 = vpop.xlane.xlu1 %449 }
 0x1c3   :  { %3783 = vst [vmem:[#allocation49_spill] sm:$0xff] %v2974_v20  ;;  %571 = vperm.xlu1 %1977, %v2974_v20   ;;  %1660 = vrot.lane.b32.xlu0 %v2971_v48, %s2194_s6  ;;  %v2984_v21 = vmax.f32 %v2343_v25, %v450_v11 }
 0x1c4   :  { %v471_v10 = vpop.xlane.xlu0 %470 }
 0x1c5   :  { %v2980_v37 = vmax.f32 %v2413_v40, %v471_v10  ;;  %3785 = vst [vmem:[#allocation51_spill] sm:$0xff] %v2984_v21 }
 0x1c6   :  { %v474_v47 = vpop.xlane.xlu1 %473 }
 0x1c7   :  { %3784 = vst [vmem:[#allocation50_spill] sm:$0xff] %v2980_v37  ;;  %611 = vperm.xlu1 %1977, %v2980_v37   ;;  %v2993_v30 = vmax.f32 %v2415_v41, %v474_v47 }
 0x1c8   :  { %v1215_v60 = vpop.xlane.xlu0 %1214 }
 0x1c9   :  { %v2987_v52 = vadd.f32 %v1215_v60, %v2341_v24  ;;  %3787 = vst [vmem:[#allocation53_spill] sm:$0xff] %v2993_v30 }
 0x1ca   :  { %v1218_v40 = vpop.xlane.xlu1 %1217 }
 0x1cb   :  { %3786 = vst [vmem:[#allocation52_spill] sm:$0xff] %v2987_v52  ;;  %1662 = vrot.lane.b32.xlu0 %v2987_v52, %s2194_s6  ;;  %576 = vperm.xlu1 %1977, %v2984_v21   ;;  %v2997_v10 = vadd.f32 %v1218_v40, %v2343_v25 }
 0x1cc   :  { %v3001_v11 = vpop.xlane.xlu0 %1238 }
 0x1cd   :  { %3788 = vst [vmem:[#allocation54_spill] sm:$0xff] %v2997_v10  ;;  %3789 = vst [vmem:[#allocation55_spill] sm:$0xff] %v3001_v11 }
 0x1ce   :  { %v3003_v24 = vpop.xlane.xlu1 %1241 }
 0x1cf   :  { %616 = vperm.xlu0 %1976, %v2993_v30   ;;  %3790 = vst [vmem:[#allocation56_spill] sm:$0xff] %v3003_v24 }
 0x1d3   :  { %1664 = vrot.lane.b32.xlu0 %v2997_v10, %s2194_s6 }
 0x20e   :  { %v542_v60 = vpop.permute.xlu0 %541 }
 0x20f   :  { %v619_v52 = vsub.f32 %v2710_v17, %v542_v60  ;;  %v620_v48 = vsub.f32 %v2715_v19, %v542_v60 }
 0x211   :  { %v651_v41 = vmul.f32 1.442695, %v619_v52  ;;  %v653_v47 = vmul.f32 1.442695, %v620_v48 }
 0x212   :  { %v3007_v37 = vpop.permute.xlu0 %1650  ;;  %v582_v30 = vpop.permute.xlu1 %581 }
 0x213   :  { %3791 = vst [vmem:[#allocation57_spill] sm:$0xff] %v3007_v37  ;;  %1978 = vpow2.f32 %v651_v41  ;;  %v635_v25 = vsub.f32 %v2712_v18, %v582_v30  ;;  %v636_v40 = vsub.f32 %v2717_v22, %v582_v30 }
 0x214   :  { %1980 = vpow2.f32 %v653_v47 }
 0x215   :  { %v683_v10 = vmul.f32 1.442695, %v635_v25  ;;  %v685_v21 = vmul.f32 1.442695, %v636_v40 }
 0x216   :  { %v3011_v20 = vpop.permute.xlu0 %1666 }
 0x217   :  { %3792 = vst [vmem:[#allocation58_spill] sm:$0xff] %v3011_v20  ;;  %1982 = vpow2.f32 %v683_v10 }
 0x218   :  { %1984 = vpow2.f32 %v685_v21 }
 0x21a   :  { %v587_v24 = vpop.permute.xlu0 %586  ;;  %v547_v36 = vpop.permute.xlu1 %546 }
 0x21b   :  { %v637_v52 = vsub.f32 %v2724_v3, %v587_v24  ;;  %v638_v48 = vsub.f32 %v2731_v1, %v587_v24  ;;  %v621_v60 = vsub.f32 %v2722_v27, %v547_v36  ;;  %v622_v41 = vsub.f32 %v2729_v51, %v547_v36 }
 0x21d   :  { %v687_v37 = vmul.f32 1.442695, %v637_v52  ;;  %v689_v11 = vmul.f32 1.442695, %v638_v48  ;;  %v655_v30 = vmul.f32 1.442695, %v621_v60 }
 0x21e   :  { %v657_v47 = vmul.f32 1.442695, %v622_v41  ;;  %v552_v25 = vpop.permute.xlu1 %551  ;;  %v3018_v21 = vpop.permute.xlu0 %1652 }
 0x21f   :  { %1986 = vpow2.f32 %v687_v37  ;;  %v623_v40 = vsub.f32 %v2739_v43, %v552_v25  ;;  %3793 = vst [vmem:[#allocation59_spill] sm:$0xff] %v3018_v21  ;;  %v624_v20 = vsub.f32 %v2745_v50, %v552_v25 }
 0x220   :  { %v1979_v10 = vpop.eup %1978  ;;  %1988 = vpow2.f32 %v689_v11 }
 0x221   :  { %v1981_v33 = vpop.eup %1980  ;;  %1990 = vpow2.f32 %v655_v30  ;;  %v923_v24 = vmul.f32 %v1979_v10, %v2710_v17  ;;  %v659_v60 = vmul.f32 1.442695, %v623_v40  ;;  %v661_v11 = vmul.f32 1.442695, %v624_v20 }
 0x222   :  { %1992 = vpow2.f32 %v657_v47  ;;  %v592_v36 = vpop.permute.xlu1 %591  ;;  %v795_v52 = vadd.f32 %v1981_v33, %v1979_v10  ;;  %v924_v48 = vmul.f32 %v1981_v33, %v2715_v19  ;;  %v3025_v12 = vpop.permute.xlu0 %1654 }
 0x223   :  { %v639_v37 = vsub.f32 %v2743_v4, %v592_v36  ;;  %v640_v41 = vsub.f32 %v2751_v56, %v592_v36  ;;  %3794 = vst [vmem:[#allocation60_spill] sm:$0xff] %v3025_v12  ;;  %1994 = vpow2.f32 %v659_v60 }
 0x224   :  { %v1983_v15 = vpop.eup %1982  ;;  %796 = vadd.xlane.f32.xlu1 %v795_v52  ;;  %v955_v25 = vadd.f32 %v924_v48, %v923_v24  ;;  %1996 = vpow2.f32 %v661_v11 }
 0x225   :  { %v1985_v21 = vpop.eup %1984  ;;  %v691_v14 = vmul.f32 1.442695, %v639_v37  ;;  %v693_v30 = vmul.f32 1.442695, %v640_v41  ;;  %v939_v10 = vmul.f32 %v1983_v15, %v2712_v18 }
 0x226   :  { %v557_v17 = vpop.permute.xlu1 %556  ;;  %v819_v47 = vadd.f32 %v1985_v21, %v1983_v15  ;;  %v940_v19 = vmul.f32 %v1985_v21, %v2717_v22 }
 0x227   :  { %v625_v33 = vsub.f32 %v2753_v6, %v557_v17  ;;  %v626_v40 = vsub.f32 %v2763_v42, %v557_v17  ;;  %1998 = vpow2.f32 %v691_v14 }
 0x228   :  { %956 = vadd.xlane.f32.xlu1 %v955_v25  ;;  %820 = vadd.xlane.f32.xlu0 %v819_v47  ;;  %2000 = vpow2.f32 %v693_v30  ;;  %v979_v52 = vadd.f32 %v940_v19, %v939_v10 }
 0x229   :  { %v663_v20 = vmul.f32 1.442695, %v625_v33  ;;  %v665_v24 = vmul.f32 1.442695, %v626_v40 }
 0x22a   :  { %v597_v36 = vpop.permute.xlu0 %596 }
 0x22b   :  { %2002 = vpow2.f32 %v663_v20  ;;  %v641_v48 = vsub.f32 %v2761_v0, %v597_v36  ;;  %v642_v18 = vsub.f32 %v2772_v5, %v597_v36 }
 0x22c   :  { %v1987_v22 = vpop.eup %1986  ;;  %2004 = vpow2.f32 %v665_v24  ;;  %980 = vadd.xlane.f32.xlu0 %v979_v52 }
 0x22d   :  { %v1989_v15 = vpop.eup %1988  ;;  %v695_v21 = vmul.f32 1.442695, %v641_v48  ;;  %v697_v60 = vmul.f32 1.442695, %v642_v18  ;;  %v941_v14 = vmul.f32 %v1987_v22, %v2724_v3 }
 0x22e   :  { %v1991_v37 = vpop.eup %1990  ;;  %v562_v41 = vpop.permute.xlu1 %561  ;;  %v822_v11 = vadd.f32 %v1989_v15, %v1987_v22  ;;  %v942_v25 = vmul.f32 %v1989_v15, %v2731_v1 }
 0x22f   :  { %v1993_v30 = vpop.eup %1992  ;;  %2006 = vpow2.f32 %v695_v21  ;;  %v627_v17 = vsub.f32 %v2774_v58, %v562_v41  ;;  %v628_v47 = vsub.f32 %v2788_v49, %v562_v41  ;;  %v3037_v10 = vpop.permute.xlu0 %1656  ;;  %v925_v33 = vmul.f32 %v1991_v37, %v2722_v27 }
 0x230   :  { %2008 = vpow2.f32 %v697_v60  ;;  %3795 = vst [vmem:[#allocation61_spill] sm:$0xff] %v3037_v10  ;;  %823 = vadd.xlane.f32.xlu1 %v822_v11  ;;  %v798_v19 = vadd.f32 %v1993_v30, %v1991_v37  ;;  %v926_v40 = vmul.f32 %v1993_v30, %v2729_v51  ;;  %v982_v3 = vadd.f32 %v942_v25, %v941_v14  ;;  %v1995_v52 = vpop.eup %1994 }
 0x231   :  { %v667_v24 = vmul.f32 1.442695, %v627_v17  ;;  %v669_v48 = vmul.f32 1.442695, %v628_v47  ;;  %v1997_v22 = vpop.eup %1996 }
 0x232   :  { %799 = vadd.xlane.f32.xlu0 %v798_v19  ;;  %v602_v20 = vpop.permute.xlu1 %601  ;;  %v958_v18 = vadd.f32 %v926_v40, %v925_v33  ;;  %v801_v25 = vadd.f32 %v1997_v22, %v1995_v52 }
 0x233   :  { %v643_v1 = vsub.f32 %v2786_v26, %v602_v20  ;;  %v644_v36 = vsub.f32 %v2797_v62, %v602_v20  ;;  %v3043_v60 = vpop.permute.xlu0 %1658  ;;  %2010 = vpow2.f32 %v667_v24 }
 0x234   :  { %983 = vadd.xlane.f32.xlu1 %v982_v3  ;;  %v1999_v21 = vpop.eup %1998  ;;  %3796 = vst [vmem:[#allocation62_spill] sm:$0xff] %v3043_v60  ;;  %2012 = vpow2.f32 %v669_v48 }
 0x235   :  { %v699_v15 = vmul.f32 1.442695, %v643_v1  ;;  %v701_v27 = vmul.f32 1.442695, %v644_v36  ;;  %v2001_v37 = vpop.eup %2000  ;;  %v927_v1 = vmul.f32 %v1995_v52, %v2739_v43  ;;  %v928_v36 = vmul.f32 %v1997_v22, %v2745_v50 }
 0x236   :  { %959 = vadd.xlane.f32.xlu0 %v958_v18  ;;  %v567_v51 = vpop.permute.xlu1 %566  ;;  %v825_v24 = vadd.f32 %v2001_v37, %v1999_v21  ;;  %v943_v50 = vmul.f32 %v1999_v21, %v2743_v4  ;;  %v944_v52 = vmul.f32 %v2001_v37, %v2751_v56 }
 0x237   :  { %v629_v41 = vsub.f32 %v2799_v61, %v567_v51  ;;  %v630_v11 = vsub.f32 %v2808_v59, %v567_v51  ;;  %2014 = vpow2.f32 %v699_v15  ;;  %v961_v43 = vadd.f32 %v928_v36, %v927_v1 }
 0x238   :  { %v2003_v14 = vpop.eup %2002  ;;  %2016 = vpow2.f32 %v701_v27 }
 0x239   :  { %v2005_v30 = vpop.eup %2004  ;;  %v671_v17 = vmul.f32 1.442695, %v629_v41  ;;  %v673_v47 = vmul.f32 1.442695, %v630_v11  ;;  %v929_v41 = vmul.f32 %v2003_v14, %v2753_v6 }
 0x23a   :  { %802 = vadd.xlane.f32.xlu0 %v801_v25  ;;  %v607_v19 = vpop.permute.xlu0 %606  ;;  %v804_v33 = vadd.f32 %v2005_v30, %v2003_v14  ;;  %v930_v11 = vmul.f32 %v2005_v30, %v2763_v42 }
 0x23b   :  { %2018 = vpow2.f32 %v671_v17  ;;  %v645_v40 = vsub.f32 %v2806_v7, %v607_v19  ;;  %v646_v20 = vsub.f32 %v2816_v54, %v607_v19 }
 0x23c   :  { %v2007_v3 = vpop.eup %2006  ;;  %2020 = vpow2.f32 %v673_v47  ;;  %805 = vadd.xlane.f32.xlu1 %v804_v33  ;;  %v964_v14 = vadd.f32 %v930_v11, %v929_v41 }
 0x23d   :  { %v2009_v48 = vpop.eup %2008  ;;  %v703_v18 = vmul.f32 1.442695, %v645_v40  ;;  %v705_v15 = vmul.f32 1.442695, %v646_v20  ;;  %v945_v42 = vmul.f32 %v2007_v3, %v2761_v0 }
 0x23e   :  { %826 = vadd.xlane.f32.xlu0 %v825_v24  ;;  %v572_v27 = vpop.permute.xlu1 %571  ;;  %v828_v51 = vadd.f32 %v2009_v48, %v2007_v3  ;;  %v3055_v47 = vpop.permute.xlu0 %1660  ;;  %v946_v30 = vmul.f32 %v2009_v48, %v2772_v5  ;;  %v985_v24 = vadd.f32 %v944_v52, %v943_v50 }
 0x23f   :  { %2022 = vpow2.f32 %v703_v18  ;;  %v631_v25 = vsub.f32 %v2818_v8, %v572_v27  ;;  %v632_v17 = vsub.f32 %v2832_v23, %v572_v27  ;;  %3797 = vst [vmem:[#allocation63_spill] sm:$0xff] %v3055_v47 }
 0x240   :  { %2024 = vpow2.f32 %v705_v15  ;;  %829 = vadd.xlane.f32.xlu1 %v828_v51  ;;  %v2011_v20 = vpop.eup %2010  ;;  %v988_v0 = vadd.f32 %v946_v30, %v945_v42 }
 0x241   :  { %v675_v22 = vmul.f32 1.442695, %v631_v25  ;;  %v677_v19 = vmul.f32 1.442695, %v632_v17  ;;  %v2013_v1 = vpop.eup %2012 }
 0x242   :  { %962 = vadd.xlane.f32.xlu0 %v961_v43  ;;  %v612_v6 = vpop.permute.xlu1 %611  ;;  %v3063_v37 = vpop.permute.xlu0 %1662  ;;  %v807_v15 = vadd.f32 %v2013_v1, %v2011_v20 }
 0x243   :  { %v647_v33 = vsub.f32 %v2830_v55, %v612_v6  ;;  %v648_v40 = vsub.f32 %v2841_v45, %v612_v6  ;;  %2026 = vpow2.f32 %v675_v22  ;;  %3798 = vst [vmem:[#allocation64_spill] sm:$0xff] %v3063_v37  ;;  %v931_v22 = vmul.f32 %v2011_v20, %v2774_v58 }
 0x244   :  { %965 = vadd.xlane.f32.xlu1 %v964_v14  ;;  %v2015_v21 = vpop.eup %2014  ;;  %2028 = vpow2.f32 %v677_v19  ;;  %v932_v19 = vmul.f32 %v2013_v1, %v2788_v49 }
 0x245   :  { %v707_v4 = vmul.f32 1.442695, %v647_v33  ;;  %v709_v56 = vmul.f32 1.442695, %v648_v40  ;;  %v2017_v3 = vpop.eup %2016 }
 0x246   :  { %986 = vadd.xlane.f32.xlu0 %v985_v24  ;;  %v577_v36 = vpop.permute.xlu1 %576  ;;  %v831_v52 = vadd.f32 %v2017_v3, %v2015_v21  ;;  %v967_v24 = vadd.f32 %v932_v19, %v931_v22  ;;  %v2140_v22 = vld [vmem:[#allocation2] sm:$0xff] }
 0x247   :  { %2030 = vpow2.f32 %v707_v4  ;;  %v633_v5 = vsub.f32 %v2843_v35, %v577_v36  ;;  %v634_v48 = vsub.f32 %v2852_v57, %v577_v36  ;;  %v947_v4 = vmul.f32 %v2015_v21, %v2786_v26 }
 0x248   :  { %v2019_v18 = vpop.eup %2018  ;;  %2032 = vpow2.f32 %v709_v56  ;;  %989 = vadd.xlane.f32.xlu1 %v988_v0  ;;  %v948_v56 = vmul.f32 %v2017_v3, %v2797_v62  ;;  %v491_v19 = vsub.f32 %v2140_v22, %v2883_v63  ;;  %v3806_v22 = vld [vmem:[#allocation43_spill] sm:$0xff] }
 0x249   :  { %v2021_v27 = vpop.eup %2020  ;;  %v679_v51 = vmul.f32 1.442695, %v633_v5  ;;  %v681_v41 = vmul.f32 1.442695, %v634_v48  ;;  %v933_v33 = vmul.f32 %v2019_v18, %v2799_v61 }
 0x24a   :  { %808 = vadd.xlane.f32.xlu0 %v807_v15  ;;  %v617_v11 = vpop.permute.xlu0 %616  ;;  %v810_v25 = vadd.f32 %v2021_v27, %v2019_v18  ;;  %v934_v40 = vmul.f32 %v2021_v27, %v2808_v59  ;;  %v991_v61 = vadd.f32 %v948_v56, %v947_v4 }
 0x24b   :  { %2034 = vpow2.f32 %v679_v51  ;;  %v649_v17 = vsub.f32 %v2850_v9, %v617_v11  ;;  %v650_v43 = vsub.f32 %v2860_v34, %v617_v11 }
 0x24c   :  { %v2023_v50 = vpop.eup %2022  ;;  %2036 = vpow2.f32 %v681_v41  ;;  %811 = vadd.xlane.f32.xlu1 %v810_v25  ;;  %v970_v49 = vadd.f32 %v934_v40, %v933_v33  ;;  %v2143_v33 = vld [vmem:[#allocation2 + $0x50] sm:$0xff] }
 0x24d   :  { %v2025_v6 = vpop.eup %2024  ;;  %v711_v14 = vmul.f32 1.442695, %v649_v17  ;;  %v713_v42 = vmul.f32 1.442695, %v650_v43  ;;  %v949_v20 = vmul.f32 %v2023_v50, %v2806_v7  ;;  %v3095_v40 = vadd.f32 %v2143_v33, %v2932_v46 }
 0x24e   :  { %832 = vadd.xlane.f32.xlu0 %v831_v52  ;;  %v834_v30 = vadd.f32 %v2025_v6, %v2023_v50  ;;  %v950_v1 = vmul.f32 %v2025_v6, %v2816_v54  ;;  %v507_v6 = vmul.f32 1.442695, %v491_v19 }
 0x24f   :  { %2038 = vpow2.f32 %v711_v14 }
 0x250   :  { %2040 = vpow2.f32 %v713_v42  ;;  %835 = vadd.xlane.f32.xlu1 %v834_v30  ;;  %v2027_v58 = vpop.eup %2026  ;;  %v994_v48 = vadd.f32 %v950_v1, %v949_v20 }
 0x251   :  { %v2029_v36 = vpop.eup %2028  ;;  %v935_v27 = vmul.f32 %v2027_v58, %v2818_v8  ;;  %v2138_v8 = vld [vmem:[#allocation2 + $0x48] sm:$0xff] }
 0x252   :  { %968 = vadd.xlane.f32.xlu0 %v967_v24  ;;  %v813_v62 = vadd.f32 %v2029_v36, %v2027_v58  ;;  %v936_v51 = vmul.f32 %v2029_v36, %v2832_v23  ;;  %v3086_v23 = vadd.f32 %v2138_v8, %v2898_v2  ;;  %v2142_v2 = vld [vmem:[#allocation2 + $0x10] sm:$0xff]  ;;  %v2144_v24 = vld [vmem:[#allocation2 + $0x18] sm:$0xff]  ;;  %v500_v58 = vsub.f32 %v2138_v8, %v2903_v53 }
 0x253   :  { %v493_v30 = vsub.f32 %v2142_v2, %v2911_v28  ;;  %v494_v4 = vsub.f32 %v2144_v24, %v2924_v31  ;;  %v501_v36 = vsub.f32 %v2143_v33, %v2920_v39  ;;  %v3805_v8 = vld [vmem:[#allocation44_spill] sm:$0xff]  ;;  %v3809_v2 = vld [vmem:[#allocation46_spill] sm:$0xff]  ;;  %v3810_v33 = vld [vmem:[#allocation7_spill] sm:$0xff] }
 0x254   :  { %v2031_v0 = vpop.eup %2030  ;;  %971 = vadd.xlane.f32.xlu1 %v970_v49  ;;  %v973_v25 = vadd.f32 %v936_v51, %v935_v27  ;;  %v3099_v49 = vpop.permute.xlu0 %1664 }
 0x255   :  { %v2033_v59 = vpop.eup %2032  ;;  %v951_v5 = vmul.f32 %v2031_v0, %v2830_v55  ;;  %3799 = vst [vmem:[#allocation65_spill] sm:$0xff] %v3099_v49  ;;  %v511_v1 = vmul.f32 1.442695, %v493_v30 }
 0x256   :  { %992 = vadd.xlane.f32.xlu0 %v991_v61  ;;  %v952_v26 = vmul.f32 %v2033_v59, %v2841_v45  ;;  %v837_v54 = vadd.f32 %v2033_v59, %v2031_v0  ;;  %v2145_v0 = vld [vmem:[#allocation2 + $0x58] sm:$0xff]  ;;  %v513_v61 = vmul.f32 1.442695, %v494_v4 }
 0x257   :  { %v3107_v46 = vadd.f32 %v2145_v0, %v2937_v16  ;;  %v502_v59 = vsub.f32 %v2145_v0, %v2935_v32  ;;  %v3152_v0 = vld [vmem:[#allocation2 + $0x78] sm:$0xff] }
 0x258   :  { %v2035_v21 = vpop.eup %2034  ;;  %995 = vadd.xlane.f32.xlu1 %v994_v48  ;;  %v997_v3 = vadd.f32 %v952_v26, %v951_v5  ;;  %v525_v26 = vmul.f32 1.442695, %v500_v58 }
 0x259   :  { %v2037_v18 = vpop.eup %2036  ;;  %v937_v11 = vmul.f32 %v2035_v21, %v2843_v35  ;;  %v2139_v35 = vld [vmem:[#allocation2 + $0x40] sm:$0xff] }
 0x25a   :  { %814 = vadd.xlane.f32.xlu0 %v813_v62  ;;  %v816_v7 = vadd.f32 %v2037_v18, %v2035_v21  ;;  %v938_v45 = vmul.f32 %v2037_v18, %v2852_v57  ;;  %v499_v57 = vsub.f32 %v2139_v35, %v2890_v38  ;;  %v527_v62 = vmul.f32 1.442695, %v501_v36  ;;  %v2146_v18 = vld [vmem:[#allocation2 + $0x60] sm:$0xff] }
 0x25b   :  { %v503_v19 = vsub.f32 %v2146_v18, %v3806_v22 }
 0x25c   :  { %v2039_v15 = vpop.eup %2038  ;;  %817 = vadd.xlane.f32.xlu1 %v816_v7  ;;  %v976_v17 = vadd.f32 %v938_v45, %v937_v11  ;;  %v3116_v7 = vadd.f32 %v2146_v18, %v2962_v29  ;;  %v3801_v29 = vld [vmem:[#allocation47_spill] sm:$0xff]  ;;  %v3803_v11 = vld [vmem:[#allocation29_spill] sm:$0xff] }
 0x25d   :  { %v2041_v41 = vpop.eup %2040  ;;  %v953_v43 = vmul.f32 %v2039_v15, %v2850_v9  ;;  %v523_v9 = vmul.f32 1.442695, %v499_v57  ;;  %v531_v36 = vmul.f32 1.442695, %v503_v19  ;;  %v3817_v19 = vld [vmem:[#allocation49_spill] sm:$0xff] }
 0x25e   :  { %838 = vadd.xlane.f32.xlu0 %v837_v54  ;;  %v840_v55 = vadd.f32 %v2041_v41, %v2039_v15  ;;  %v954_v50 = vmul.f32 %v2041_v41, %v2860_v34  ;;  %v2141_v34 = vld [vmem:[#allocation2 + $0x8] sm:$0xff]  ;;  %v529_v15 = vmul.f32 1.442695, %v502_v59 }
 0x25f   :  { %2042 = vpow2.f32 %v523_v9  ;;  %v492_v14 = vsub.f32 %v2141_v34, %v2906_v13  ;;  %v3800_v54 = vld [vmem:[#allocation22_spill] sm:$0xff]  ;;  %v3138_v9 = vld [vmem:[#allocation2 + $0x70] sm:$0xff] }
 0x260   :  { %841 = vadd.xlane.f32.xlu1 %v840_v55  ;;  %v1000_v52 = vadd.f32 %v954_v50, %v953_v43  ;;  %2044 = vpow2.f32 %v507_v6  ;;  %v2147_v41 = vld [vmem:[#allocation2 + $0x68] sm:$0xff]  ;;  %v3807_v6 = vld [vmem:[#allocation55_spill] sm:$0xff] }
 0x261   :  { %v509_v42 = vmul.f32 1.442695, %v492_v14  ;;  %v3126_v55 = vadd.f32 %v2147_v41, %v3801_v29  ;;  %v3804_v43 = vld [vmem:[#allocation42_spill] sm:$0xff]  ;;  %v3142_v34 = vadd.f32 %v3138_v9, %v3807_v6  ;;  %v504_v30 = vsub.f32 %v2147_v41, %v3809_v2 }
 0x262   :  { %974 = vadd.xlane.f32.xlu0 %v973_v25 }
 0x263   :  { %2046 = vpow2.f32 %v509_v42  ;;  %3802 = vst [vmem:[#allocation22_spill] sm:$0xff] %v3126_v55  ;;  %3808 = vst [vmem:[#allocation47_spill] sm:$0xff] %v3142_v34 }
 0x264   :  { %977 = vadd.xlane.f32.xlu1 %v976_v17  ;;  %2048 = vpow2.f32 %v511_v1  ;;  %v2148_v17 = vld [vmem:[#allocation2 + $0x20] sm:$0xff] }
 0x265   :  { %2050 = vpow2.f32 %v513_v61  ;;  %v495_v50 = vsub.f32 %v2148_v17, %v3804_v43  ;;  %v3811_v61 = vld [vmem:[#allocation56_spill] sm:$0xff] }
 0x266   :  { %2052 = vpow2.f32 %v525_v26  ;;  %v3156_v59 = vadd.f32 %v3152_v0, %v3811_v61 }
 0x267   :  { %2054 = vpow2.f32 %v527_v62  ;;  %v515_v4 = vmul.f32 1.442695, %v495_v50  ;;  %v533_v62 = vmul.f32 1.442695, %v504_v30 }
 0x268   :  { %1001 = vadd.xlane.f32.xlu1 %v1000_v52  ;;  %2056 = vpow2.f32 %v529_v15  ;;  %v2149_v52 = vld [vmem:[#allocation2 + $0x28] sm:$0xff]  ;;  %3812 = vst [vmem:[#allocation29_spill] sm:$0xff] %v3156_v59 }
 0x269   :  { %v496_v35 = vsub.f32 %v2149_v52, %v3805_v8  ;;  %2058 = vpow2.f32 %v515_v4 }
 0x26c   :  { %v2043_v56 = vpop.eup %2042 }
 0x26d   :  { %v787_v5 = vmul.f32 %v2043_v56, %v2650_v44  ;;  %v2045_v48 = vpop.eup %2044  ;;  %v915_v45 = vmul.f32 %v2043_v56, %v3803_v11  ;;  %v517_v56 = vmul.f32 1.442695, %v496_v35  ;;  %v3815_v11 = vld [vmem:[#allocation9_spill] sm:$0xff]  ;;  %v2152_v35 = vld [vmem:[#allocation2 + $0x30] sm:$0xff] }
 0x26e   :  { %v907_v27 = vmul.f32 %v2045_v48, %v3800_v54  ;;  %v497_v6 = vsub.f32 %v2152_v35, %v3817_v19 }
 0x26f   :  { %2060 = vpow2.f32 %v517_v56  ;;  %v2153_v56 = vld [vmem:[#allocation2 + $0x38] sm:$0xff] }
 0x270   :  { %v2047_v25 = vpop.eup %2046  ;;  %2062 = vpow2.f32 %v531_v36  ;;  %v3819_v36 = vld [vmem:[#allocation51_spill] sm:$0xff] }
 0x271   :  { %v780_v24 = vmul.f32 %v2047_v25, %v3810_v33  ;;  %v2049_v1 = vpop.eup %2048  ;;  %2064 = vpow2.f32 %v533_v62  ;;  %v498_v61 = vsub.f32 %v2153_v56, %v3819_v36 }
 0x272   :  { %v3161_v18 = vpop.eup %2050 }
 0x273   :  { %v2053_v54 = vpop.eup %2052 }
 0x278   :  { %1668 = vrot.lane.b32.xlu0 %v3086_v23, %s2194_s6 }
 0x297   :  { %998 = vadd.xlane.f32.xlu0 %v997_v3 }
 0x2ad   :  { %1670 = vrot.lane.b32.xlu0 %v3095_v40, %s2194_s6  ;;  %v3103_v20 = vpop.xlane.xlu1 %796 }
 0x2b1   :  { %1672 = vrot.lane.b32.xlu0 %v3107_v46, %s2194_s6  ;;  %v821_v21 = vpop.xlane.xlu0 %820  ;;  %v957_v16 = vpop.xlane.xlu1 %956 }
 0x2b2   :  { %v3113_v3 = vadd.f32 %v821_v21, %v787_v5  ;;  %v3123_v51 = vadd.f32 %v957_v16, %v907_v27  ;;  %v3813_v5 = vld [vmem:[#allocation6_spill] sm:$0xff]  ;;  %v3814_v27 = vld [vmem:[#allocation8_spill] sm:$0xff] }
 0x2b3   :  { %v779_v26 = vmul.f32 %v2045_v48, %v3813_v5  ;;  %v2055_v48 = vpop.eup %2054 }
 0x2b4   :  { %1291 = vrot.lane.b32.xlu1 %v3113_v3, %s2196_s10  ;;  %v3171_v17 = vpop.eup %2056 }
 0x2b5   :  { %1674 = vrot.lane.b32.xlu0 %v3116_v7, %s2194_s6  ;;  %v981_v44 = vpop.xlane.xlu0 %980  ;;  %v3164_v16 = vadd.f32 %v3103_v20, %v779_v26  ;;  %v3816_v20 = vld [vmem:[#allocation14_spill] sm:$0xff]  ;;  %v3820_v26 = vld [vmem:[#allocation16_spill] sm:$0xff] }
 0x2b6   :  { %v3135_v57 = vadd.f32 %v981_v44, %v915_v45  ;;  %v781_v44 = vmul.f32 %v2049_v1, %v3814_v27  ;;  %v782_v45 = vmul.f32 %v3161_v18, %v3815_v11  ;;  %v788_v50 = vmul.f32 %v2053_v54, %v3816_v20  ;;  %v3821_v27 = vld [vmem:[#allocation50_spill] sm:$0xff] }
 0x2b7   :  { %2066 = vlog2.f32 %v3164_v16  ;;  %v790_v62 = vmul.f32 %v3171_v17, %v3820_v26  ;;  %v2059_v26 = vpop.eup %2058 }
 0x2b8   :  { %1339 = vrot.lane.b32.xlu1 %v3123_v51, %s2197_s11 }
 0x2b9   :  { %1676 = vrot.lane.b32.xlu0 %v3126_v55, %s2194_s6  ;;  %v824_v42 = vpop.xlane.xlu1 %823 }
 0x2bb   :  { %v800_v14 = vpop.xlane.xlu0 %799 }
 0x2bc   :  { %1355 = vrot.lane.b32.xlu1 %v3135_v57, %s2197_s11  ;;  %v3150_v58 = vadd.f32 %v800_v14, %v780_v24  ;;  %v3818_v14 = vld [vmem:[#allocation15_spill] sm:$0xff]  ;;  %v3182_v24 = vadd.f32 %v824_v42, %v788_v50 }
 0x2bd   :  { %1678 = vrot.lane.b32.xlu0 %v3142_v34, %s2194_s6  ;;  %v984_v15 = vpop.xlane.xlu1 %983  ;;  %v789_v30 = vmul.f32 %v2055_v48, %v3818_v14  ;;  %v521_v14 = vmul.f32 1.442695, %v498_v61  ;;  %v3837_v34 = vld [vmem:[#allocation13_spill] sm:$0xff] }
 0x2bf   :  { %v960_v21 = vpop.xlane.xlu0 %959 }
 0x2c0   :  { %1277 = vrot.lane.b32.xlu1 %v3150_v58, %s2196_s10 }
 0x2c1   :  { %1680 = vrot.lane.b32.xlu0 %v3156_v59, %s2194_s6 }
 0x2c3   :  { %v803_v41 = vpop.xlane.xlu0 %802 }
 0x2c4   :  { %v845_v29 = vadd.f32 %v803_v41, %v781_v44  ;;  %v505_v44 = vsub.f32 %v3138_v9, %v3821_v27  ;;  %v3822_v41 = vld [vmem:[#allocation21_spill] sm:$0xff] }
 0x2c5   :  { %1275 = vrot.lane.b32.xlu0 %v3164_v16, %s2196_s10  ;;  %v806_v52 = vpop.xlane.xlu1 %805  ;;  %v908_v11 = vmul.f32 %v2047_v25, %v3822_v41 }
 0x2c6   :  { %2068 = vlog2.f32 %v845_v29  ;;  %1279 = vrot.lane.b32.xlu1 %v845_v29, %s2196_s10  ;;  %v3180_v33 = vadd.f32 %v806_v52, %v782_v45  ;;  %v3823_v45 = vld [vmem:[#allocation23_spill] sm:$0xff]  ;;  %v3824_v52 = vld [vmem:[#allocation53_spill] sm:$0xff] }
 0x2c7   :  { %2070 = vrcp.f32 %v845_v29  ;;  %v827_v4 = vpop.xlane.xlu0 %826  ;;  %v519_v29 = vmul.f32 1.442695, %v497_v6  ;;  %v909_v20 = vmul.f32 %v2049_v1, %v3823_v45  ;;  %v506_v35 = vsub.f32 %v3152_v0, %v3824_v52  ;;  %v3825_v6 = vld [vmem:[#allocation30_spill] sm:$0xff]  ;;  %v3826_v0 = vld [vmem:[#allocation31_spill] sm:$0xff] }
 0x2c8   :  { %v853_v5 = vadd.f32 %v827_v4, %v789_v30  ;;  %2072 = vlog2.f32 %v3180_v33  ;;  %v3200_v9 = vadd.f32 %v960_v21, %v908_v11  ;;  %v535_v4 = vmul.f32 1.442695, %v505_v44 }
 0x2c9   :  { %2074 = vrcp.f32 %v3180_v33  ;;  %1293 = vrot.lane.b32.xlu0 %v3182_v24, %s2196_s10  ;;  %v830_v42 = vpop.xlane.xlu1 %829  ;;  %v916_v56 = vmul.f32 %v2053_v54, %v3825_v6  ;;  %v917_v21 = vmul.f32 %v2055_v48, %v3826_v0  ;;  %v537_v61 = vmul.f32 1.442695, %v506_v35 }
 0x2ca   :  { %2076 = vlog2.f32 %v853_v5  ;;  %1295 = vrot.lane.b32.xlu1 %v853_v5, %s2196_s10  ;;  %v3196_v50 = vadd.f32 %v830_v42, %v790_v62 }
 0x2cb   :  { %2078 = vrcp.f32 %v853_v5  ;;  %v963_v25 = vpop.xlane.xlu0 %962  ;;  %v3209_v5 = vpop.eup %2060  ;;  %v3212_v62 = vadd.f32 %v984_v15, %v916_v56  ;;  %v3829_v56 = vld [vmem:[#allocation11_spill] sm:$0xff] }
 0x2cc   :  { %v1005_v30 = vadd.f32 %v963_v25, %v909_v20  ;;  %2080 = vlog2.f32 %v3196_v50  ;;  %v3214_v44 = vpop.eup %2062  ;;  %v3828_v20 = vld [vmem:[#allocation24_spill] sm:$0xff]  ;;  %v784_v0 = vmul.f32 %v3209_v5, %v3829_v56 }
 0x2cd   :  { %2082 = vrcp.f32 %v3196_v50  ;;  %1341 = vrot.lane.b32.xlu0 %v3200_v9, %s2197_s11  ;;  %v966_v1 = vpop.xlane.xlu1 %965  ;;  %v3216_v11 = vpop.eup %2064  ;;  %v910_v35 = vmul.f32 %v3161_v18, %v3828_v20 }
 0x2ce   :  { %2084 = vpow2.f32 %v519_v29  ;;  %1343 = vrot.lane.b32.xlu1 %v1005_v30, %s2197_s11  ;;  %v2067_v48 = vpop.eup %2066  ;;  %v3827_v29 = vld [vmem:[#allocation10_spill] sm:$0xff] }
 0x2cf   :  { %2086 = vlog2.f32 %v3113_v3  ;;  %v987_v54 = vpop.xlane.xlu0 %986  ;;  %v783_v15 = vmul.f32 %v2059_v26, %v3827_v29 }
 0x2d0   :  { %2088 = vpow2.f32 %v521_v14  ;;  %v1013_v41 = vadd.f32 %v987_v54, %v917_v21  ;;  %v1006_v54 = vadd.f32 %v966_v1, %v910_v35  ;;  %v3831_v1 = vld [vmem:[#allocation32_spill] sm:$0xff] }
 0x2d1   :  { %2090 = vpow2.f32 %v535_v4  ;;  %1357 = vrot.lane.b32.xlu0 %v3212_v62, %s2197_s11  ;;  %v990_v42 = vpop.xlane.xlu1 %989 }
 0x2d2   :  { %2092 = vrcp.f32 %v3164_v16  ;;  %1359 = vrot.lane.b32.xlu1 %v1013_v41, %s2197_s11 }
 0x2d3   :  { %v2069_v45 = vpop.eup %2068  ;;  %2094 = vpow2.f32 %v537_v61  ;;  %v809_v25 = vpop.xlane.xlu0 %808  ;;  %v3830_v61 = vld [vmem:[#allocation17_spill] sm:$0xff] }
 0x2d4   :  { %v2071_v14 = vpop.eup %2070  ;;  %2096 = vrcp.f32 %v3113_v3  ;;  %v1463_v4 = vmul.f32 0.6931472, %v2069_v45  ;;  %v847_v6 = vadd.f32 %v809_v25, %v783_v15  ;;  %v791_v18 = vmul.f32 %v3214_v44, %v3830_v61 }
 0x2d5   :  { %v2073_v21 = vpop.eup %2072  ;;  %2098 = vlog2.f32 %v3150_v58  ;;  %v3229_v16 = vmul.f32 %v2071_v14, %v1005_v30  ;;  %1281 = vrot.lane.b32.xlu0 %v3180_v33, %s2196_s10  ;;  %v812_v29 = vpop.xlane.xlu1 %811  ;;  %v918_v33 = vmul.f32 %v3171_v17, %v3831_v1  ;;  %v3832_v14 = vld [vmem:[#allocation25_spill] sm:$0xff]  ;;  %v3833_v17 = vld [vmem:[#allocation18_spill] sm:$0xff] }
 0x2d6   :  { %v2075_v20 = vpop.eup %2074  ;;  %v3236_v3 = vadd.f32 %v1463_v4, %v2911_v28  ;;  %v1465_v15 = vmul.f32 0.6931472, %v2073_v21  ;;  %2100 = vlog2.f32 %v847_v6  ;;  %1283 = vrot.lane.b32.xlu1 %v847_v6, %s2196_s10  ;;  %v3239_v45 = vadd.f32 %v812_v29, %v784_v0 }
 0x2d7   :  { %v2077_v30 = vpop.eup %2076  ;;  %v3241_v25 = vmul.f32 %v2075_v20, %v1006_v54  ;;  %2102 = vrcp.f32 %v847_v6  ;;  %v833_v35 = vpop.xlane.xlu0 %832  ;;  %v911_v56 = vmul.f32 %v2059_v26, %v3832_v14  ;;  %v1014_v20 = vadd.f32 %v990_v42, %v918_v33 }
 0x2d8   :  { %v2079_v61 = vpop.eup %2078  ;;  %v1479_v21 = vmul.f32 0.6931472, %v2077_v30  ;;  %v3249_v49 = vadd.f32 %v1465_v15, %v2924_v31  ;;  %v855_v0 = vadd.f32 %v833_v35, %v791_v18  ;;  %2104 = vlog2.f32 %v3239_v45 }
 0x2d9   :  { %v2081_v29 = vpop.eup %2080  ;;  %v3251_v37 = vmul.f32 %v2079_v61, %v1013_v41  ;;  %1297 = vrot.lane.b32.xlu0 %v3196_v50, %s2196_s10  ;;  %v792_v26 = vmul.f32 %v3216_v11, %v3833_v17  ;;  %v836_v6 = vpop.xlane.xlu1 %835  ;;  %v1459_v42 = vmul.f32 0.6931472, %v2067_v48 }
 0x2da   :  { %v2083_v1 = vpop.eup %2082  ;;  %v3259_v30 = vadd.f32 %v1479_v21, %v2920_v39  ;;  %v1481_v15 = vmul.f32 0.6931472, %v2081_v29  ;;  %2106 = vlog2.f32 %v855_v0  ;;  %1299 = vrot.lane.b32.xlu1 %v855_v0, %s2196_s10 }
 0x2db   :  { %v3264_v41 = vpop.eup %2084  ;;  %v3266_v33 = vmul.f32 %v2083_v1, %v1014_v20  ;;  %2108 = vrcp.f32 %v855_v0  ;;  %v969_v50 = vpop.xlane.xlu0 %968  ;;  %v3268_v35 = vadd.f32 %v836_v6, %v792_v26  ;;  %v3834_v6 = vld [vmem:[#allocation33_spill] sm:$0xff] }
 0x2dc   :  { %v2087_v14 = vpop.eup %2086  ;;  %v3273_v21 = vadd.f32 %v1481_v15, %v2935_v32  ;;  %2110 = vrcp.f32 %v3239_v45  ;;  %v1007_v29 = vadd.f32 %v969_v50, %v911_v56  ;;  %v919_v1 = vmul.f32 %v3214_v44, %v3834_v6  ;;  %v3836_v44 = vld [vmem:[#allocation12_spill] sm:$0xff] }
 0x2dd   :  { %v3276_v17 = vpop.eup %2088  ;;  %2112 = vlog2.f32 %v3268_v35  ;;  %1345 = vrot.lane.b32.xlu0 %v1006_v54, %s2197_s11  ;;  %v972_v48 = vpop.xlane.xlu1 %971  ;;  %v1475_v15 = vmul.f32 0.6931472, %v2087_v14  ;;  %v3291_v54 = vadd.f32 %v1459_v42, %v2883_v63  ;;  %v785_v14 = vmul.f32 %v3264_v41, %v3836_v44  ;;  %v3838_v44 = vld [vmem:[#allocation26_spill] sm:$0xff] }
 0x2de   :  { %v3280_v0 = vpop.eup %2090  ;;  %2114 = vrcp.f32 %v3268_v35  ;;  %1347 = vrot.lane.b32.xlu1 %v1007_v29, %s2197_s11  ;;  %v912_v59 = vmul.f32 %v3209_v5, %v3838_v44  ;;  %v3840_v5 = vld [vmem:[#allocation20_spill] sm:$0xff] }
 0x2df   :  { %v2093_v56 = vpop.eup %2092  ;;  %v993_v50 = vpop.xlane.xlu0 %992  ;;  %3835 = vst [vmem:[#allocation42_spill] sm:$0xff] %v3291_v54  ;;  %2116 = vlog2.f32 %v3182_v24  ;;  %v3301_v42 = vadd.f32 %v1475_v15, %v2890_v38 }
 0x2e0   :  { %v3288_v18 = vpop.eup %2094  ;;  %v1015_v61 = vadd.f32 %v993_v50, %v919_v1  ;;  %v1523_v60 = vmul.f32 %v2093_v56, %v3123_v51  ;;  %2118 = vrcp.f32 %v3150_v58  ;;  %v786_v51 = vmul.f32 %v3276_v17, %v3837_v34 }
 0x2e1   :  { %v2097_v4 = vpop.eup %2096  ;;  %1361 = vrot.lane.b32.xlu0 %v1014_v20, %s2197_s11  ;;  %v996_v26 = vpop.xlane.xlu1 %995  ;;  %2120 = vrcp.f32 %v3182_v24 }
 0x2e2   :  { %v2099_v47 = vpop.eup %2098  ;;  %1363 = vrot.lane.b32.xlu1 %v1015_v61, %s2197_s11  ;;  %v1554_v50 = vsub.f32 %v3291_v54, %v1523_v60  ;;  %v1539_v58 = vmul.f32 %v2097_v4, %v3135_v57 }
 0x2e3   :  { %v2101_v6 = vpop.eup %2100  ;;  %v815_v10 = vpop.xlane.xlu0 %814 }
 0x2e4   :  { %v2103_v1 = vpop.eup %2102  ;;  %v1467_v20 = vmul.f32 0.6931472, %v2101_v6  ;;  %v849_v12 = vadd.f32 %v815_v10, %v785_v14  ;;  %v3839_v10 = vld [vmem:[#allocation34_spill] sm:$0xff]  ;;  %v1562_v4 = vsub.f32 %v3301_v42, %v1539_v58 }
 0x2e5   :  { %v3308_v56 = vmul.f32 %v2103_v1, %v1007_v29  ;;  %1285 = vrot.lane.b32.xlu0 %v3239_v45, %s2196_s10  ;;  %v818_v15 = vpop.xlane.xlu1 %817  ;;  %v2105_v55 = vpop.eup %2104  ;;  %v920_v34 = vmul.f32 %v3216_v11, %v3839_v10  ;;  %v794_v45 = vmul.f32 %v3288_v18, %v3840_v5 }
 0x2e6   :  { %v3315_v60 = vadd.f32 %v1467_v20, %v3804_v43  ;;  %2122 = vlog2.f32 %v849_v12  ;;  %1586 = vrot.lane.b32.xlu1 %v1554_v50, %s2196_s10  ;;  %v850_v57 = vadd.f32 %v818_v15, %v786_v51  ;;  %v1469_v29 = vmul.f32 0.6931472, %v2105_v55 }
 0x2e7   :  { %v2107_v24 = vpop.eup %2106  ;;  %2124 = vrcp.f32 %v849_v12  ;;  %v1008_v20 = vadd.f32 %v972_v48, %v912_v59  ;;  %v1016_v10 = vadd.f32 %v996_v26, %v920_v34  ;;  %v839_v59 = vpop.xlane.xlu0 %838  ;;  %v3841_v26 = vld [vmem:[#allocation19_spill] sm:$0xff] }
 0x2e8   :  { %v2109_v14 = vpop.eup %2108  ;;  %v1483_v1 = vmul.f32 0.6931472, %v2107_v24  ;;  %2126 = vlog2.f32 %v850_v57  ;;  %v3328_v50 = vadd.f32 %v1469_v29, %v3805_v8  ;;  %v1461_v29 = vmul.f32 0.6931472, %v2099_v47 }
 0x2e9   :  { %v2111_v44 = vpop.eup %2110  ;;  %v3325_v11 = vmul.f32 %v2109_v14, %v1015_v61  ;;  %2128 = vrcp.f32 %v850_v57  ;;  %1301 = vrot.lane.b32.xlu0 %v3268_v35, %s2196_s10  ;;  %v842_v55 = vpop.xlane.xlu1 %841  ;;  %v793_v34 = vmul.f32 %v3280_v0, %v3841_v26 }
 0x2ea   :  { %v2113_v51 = vpop.eup %2112  ;;  %v3333_v58 = vadd.f32 %v1483_v1, %v3806_v22  ;;  %v3335_v15 = vmul.f32 %v2111_v44, %v1008_v20  ;;  %1602 = vrot.lane.b32.xlu1 %v1562_v4, %s2196_s10  ;;  %v858_v61 = vadd.f32 %v842_v55, %v794_v45  ;;  %v3354_v45 = vadd.f32 %v1461_v29, %v2906_v13  ;;  %v3843_v29 = vld [vmem:[#allocation28_spill] sm:$0xff] }
 0x2eb   :  { %v2115_v48 = vpop.eup %2114  ;;  %v1485_v24 = vmul.f32 0.6931472, %v2113_v51  ;;  %v3356_v51 = vadd.f32 %v839_v59, %v793_v34 }
 0x2ec   :  { %v3342_v14 = vmul.f32 %v2115_v48, %v1016_v10  ;;  %v2117_v1 = vpop.eup %2116  ;;  %2130 = vlog2.f32 %v858_v61  ;;  %v975_v48 = vpop.xlane.xlu0 %974 }
 0x2ed   :  { %v3345_v44 = vadd.f32 %v1485_v24, %v3809_v2  ;;  %1349 = vrot.lane.b32.xlu0 %v1008_v20, %s2197_s11  ;;  %2132 = vrcp.f32 %v858_v61  ;;  %v2119_v47 = vpop.eup %2118  ;;  %v1477_v55 = vmul.f32 0.6931472, %v2117_v1  ;;  %v3842_v24 = vld [vmem:[#allocation27_spill] sm:$0xff]  ;;  %v978_v35 = vpop.xlane.xlu1 %977  ;;  %v914_v1 = vmul.f32 %v3276_v17, %v3843_v29 }
 0x2ee   :  { %1287 = vrot.lane.b32.xlu1 %v849_v12, %s2196_s10  ;;  %v913_v20 = vmul.f32 %v3264_v41, %v3842_v24  ;;  %v2121_v26 = vpop.eup %2120  ;;  %v1525_v12 = vmul.f32 %v2119_v47, %v3200_v9  ;;  %2134 = vlog2.f32 %v3356_v51 }
 0x2ef   :  { %v3368_v6 = vadd.f32 %v1477_v55, %v2903_v53  ;;  %v1010_v54 = vadd.f32 %v978_v35, %v914_v1  ;;  %v1541_v47 = vmul.f32 %v2121_v26, %v3212_v62  ;;  %2136 = vrcp.f32 %v3356_v51 }
 0x2f0   :  { %v1009_v5 = vadd.f32 %v975_v48, %v913_v20  ;;  %v1555_v34 = vsub.f32 %v3354_v45, %v1525_v12 }
 0x2f1   :  { %1365 = vrot.lane.b32.xlu0 %v1016_v10, %s2197_s11  ;;  %v1002_v55 = vpop.xlane.xlu1 %1001 }
 0x2f2   :  { %1303 = vrot.lane.b32.xlu1 %v3356_v51, %s2196_s10 }
 0x2f3   :  { %v2123_v4 = vpop.eup %2122 }
 0x2f4   :  { %v2125_v59 = vpop.eup %2124  ;;  %v1471_v41 = vmul.f32 0.6931472, %v2123_v4  ;;  %v1563_v4 = vsub.f32 %v3368_v6, %v1541_v47 }
 0x2f5   :  { %v2127_v24 = vpop.eup %2126  ;;  %v3370_v10 = vmul.f32 %v2125_v59, %v1009_v5  ;;  %1289 = vrot.lane.b32.xlu0 %v850_v57, %s2196_s10  ;;  %v3844_v57 = vld [vmem:[#allocation36_spill] sm:$0xff] }
 0x2f6   :  { %v2129_v9 = vpop.eup %2128  ;;  %v3375_v48 = vadd.f32 %v1471_v41, %v3817_v19  ;;  %v1473_v17 = vmul.f32 0.6931472, %v2127_v24  ;;  %1588 = vrot.lane.b32.xlu1 %v1555_v34, %s2196_s10  ;;  %v922_v62 = vmul.f32 %v3288_v18, %v3844_v57 }
 0x2f7   :  { %v3378_v20 = vmul.f32 %v2129_v9, %v1010_v54  ;;  %v3845_v9 = vld [vmem:[#allocation35_spill] sm:$0xff] }
 0x2f8   :  { %v1560_v12 = vsub.f32 %v3375_v48, %v3370_v10  ;;  %v3384_v35 = vadd.f32 %v1473_v17, %v3819_v36  ;;  %v1018_v1 = vadd.f32 %v1002_v55, %v922_v62  ;;  %v921_v47 = vmul.f32 %v3280_v0, %v3845_v9 }
 0x2f9   :  { %1305 = vrot.lane.b32.xlu0 %v858_v61, %s2196_s10  ;;  %v2131_v26 = vpop.eup %2130  ;;  %v3402_v61 = vpop.permute.xlu0 %1668 }
 0x2fa   :  { %v1561_v29 = vsub.f32 %v3384_v35, %v3378_v20  ;;  %1604 = vrot.lane.b32.xlu1 %v1563_v4, %s2196_s10  ;;  %v2133_v59 = vpop.eup %2132  ;;  %v1489_v34 = vmul.f32 0.6931472, %v2131_v26  ;;  %v3847_v26 = vsub.f32 %v3259_v30, %v3251_v37 }
 0x2fb   :  { %v3392_v41 = vmul.f32 %v2133_v59, %v1018_v1 }
 0x2fc   :  { %v3395_v24 = vadd.f32 %v1489_v34, %v3824_v52 }
 0x2fd   :  { %1353 = vrot.lane.b32.xlu0 %v1010_v54, %s2197_s11  ;;  %v3846_v54 = vsub.f32 %v3236_v3, %v3229_v16  ;;  %v3848_v16 = vsub.f32 %v3249_v49, %v3241_v25  ;;  %v3851_v25 = vsub.f32 %v3315_v60, %v3308_v56  ;;  %v3854_v56 = vsub.f32 %v3328_v50, %v3335_v15 }
 0x2fe   :  { %1351 = vrot.lane.b32.xlu1 %v1009_v5, %s2197_s11  ;;  %v1569_v18 = vsub.f32 %v3395_v24, %v3392_v41  ;;  %v3856_v15 = vsub.f32 %v3345_v44, %v3342_v14 }
 0x301   :  { %1369 = vrot.lane.b32.xlu0 %v1018_v1, %s2197_s11 }
 0x320   :  { %v999_v17 = vpop.xlane.xlu0 %998 }
 0x321   :  { %v1017_v55 = vadd.f32 %v999_v17, %v921_v47  ;;  %v3849_v47 = vld [vmem:[#allocation38_spill] sm:$0xff] }
 0x323   :  { %1367 = vrot.lane.b32.xlu1 %v1017_v55, %s2197_s11 }
 0x324   :  { %v3407_v4 = vpop.permute.xlu0 %1670 }
 0x326   :  { %v1292_v57 = vpop.permute.xlu1 %1291 }
 0x327   :  { %1590 = vrot.lane.b32.xlu1 %v3846_v54, %s2196_s10  ;;  %v1396_v1 = vsel %vm22_vm1, %v2890_v38, %v1292_v57  ;;  %v3850_v38 = vsub.f32 %v3273_v21, %v3266_v33 }
 0x328   :  { %v3413_v5 = vpop.permute.xlu0 %1672 }
 0x32a   :  { %v1340_v62 = vpop.permute.xlu1 %1339 }
 0x32b   :  { %1606 = vrot.lane.b32.xlu1 %v3847_v26, %s2196_s10 }
 0x32c   :  { %v3419_v0 = vpop.permute.xlu0 %1674 }
 0x32e   :  { %v1356_v59 = vpop.permute.xlu1 %1355 }
 0x32f   :  { %1592 = vrot.lane.b32.xlu1 %v3848_v16, %s2196_s10  ;;  %v1413_v34 = vsel %vm1404_vm7, %v1396_v1, %v1356_v59  ;;  %v3852_v1 = vsub.f32 %v3333_v58, %v3325_v11 }
 0x330   :  { %v3428_v9 = vpop.permute.xlu0 %1676  ;;  %v1430_v37 = vsel %vm1421_vm8, %v1413_v34, %v3849_v47  ;;  %v3853_v34 = vld [vmem:[#allocation37_spill] sm:$0xff] }
 0x331   :  { %1447 = vst.msk [vmem:[#allocation2 + $0x40] sm:$0xff] %vm24_vm2, %v1430_v37  ;;  %v2135_v37 = vpop.eup %2134 }
 0x332   :  { %v1278_v17 = vpop.permute.xlu1 %1277 }
 0x333   :  { %1608 = vrot.lane.b32.xlu1 %v3850_v38, %s2196_s10 }
 0x334   :  { %v3438_v57 = vpop.permute.xlu0 %1678 }
 0x337   :  { %1594 = vrot.lane.b32.xlu1 %v3851_v25, %s2196_s10 }
 0x338   :  { %v3445_v54 = vpop.permute.xlu0 %1680  ;;  %v1280_v26 = vpop.permute.xlu1 %1279 }
 0x339   :  { %v1390_v11 = vsel %vm22_vm1, %v2911_v28, %v1280_v26  ;;  %v1389_v28 = vsel %vm22_vm1, %v2906_v13, %v1278_v17 }
 0x33b   :  { %1610 = vrot.lane.b32.xlu1 %v3852_v1, %s2196_s10  ;;  %v3855_v1 = vld [vmem:[#allocation40_spill] sm:$0xff] }
 0x33c   :  { %v1276_v59 = vpop.permute.xlu0 %1275  ;;  %v1296_v33 = vpop.permute.xlu1 %1295 }
 0x33d   :  { %v1388_v16 = vsel %vm22_vm1, %v2883_v63, %v1276_v59  ;;  %v1487_v59 = vmul.f32 0.6931472, %v2135_v37  ;;  %v1398_v26 = vsel %vm22_vm1, %v2920_v39, %v1296_v33 }
 0x33e   :  { %v1405_v51 = vsel %vm1404_vm7, %v1388_v16, %v1340_v62  ;;  %v2137_v16 = vpop.eup %2136 }
 0x33f   :  { %v1422_v47 = vsel %vm1421_vm8, %v1405_v51, %v3853_v34  ;;  %1596 = vrot.lane.b32.xlu1 %v3854_v56, %s2196_s10 }
 0x340   :  { %1439 = vst.msk [vmem:[#allocation2] sm:$0xff] %vm24_vm2, %v1422_v47  ;;  %v1294_v38 = vpop.permute.xlu0 %1293  ;;  %v1344_v25 = vpop.permute.xlu1 %1343  ;;  %v1551_v47 = vmul.f32 %v2137_v16, %v1017_v55 }
 0x341   :  { %v1407_v63 = vsel %vm1404_vm7, %v1390_v11, %v1344_v25  ;;  %v3857_v11 = vld [vmem:[#allocation39_spill] sm:$0xff]  ;;  %v1397_v13 = vsel %vm22_vm1, %v2903_v53, %v1294_v38 }
 0x342   :  { %v1424_v62 = vsel %vm1421_vm8, %v1407_v63, %v3855_v1  ;;  %v3482_v63 = vadd.f32 %v1487_v59, %v3821_v27  ;;  %v3858_v59 = vld [vmem:[#allocation45_spill] sm:$0xff] }
 0x343   :  { %1441 = vst.msk [vmem:[#allocation2 + $0x10] sm:$0xff] %vm24_vm2, %v1424_v62  ;;  %1612 = vrot.lane.b32.xlu1 %v3856_v15, %s2196_s10 }
 0x344   :  { %v1342_v51 = vpop.permute.xlu0 %1341  ;;  %v1360_v34 = vpop.permute.xlu1 %1359  ;;  %v1568_v17 = vsub.f32 %v3482_v63, %v1551_v47 }
 0x345   :  { %v1406_v56 = vsel %vm1404_vm7, %v1389_v28, %v1342_v51  ;;  %v1415_v37 = vsel %vm1404_vm7, %v1398_v26, %v1360_v34  ;;  %v3859_v26 = vld [vmem:[#allocation41_spill] sm:$0xff] }
 0x346   :  { %v1423_v25 = vsel %vm1421_vm8, %v1406_v56, %v3857_v11  ;;  %v1432_v14 = vsel %vm1421_vm8, %v1415_v37, %v3095_v40 }
 0x347   :  { %1440 = vst.msk [vmem:[#allocation2 + $0x8] sm:$0xff] %vm24_vm2, %v1423_v25  ;;  %1449 = vst.msk [vmem:[#allocation2 + $0x50] sm:$0xff] %vm24_vm2, %v1432_v14  ;;  %1598 = vrot.lane.b32.xlu1 %v1560_v12, %s2196_s10 }
 0x348   :  { %v1358_v39 = vpop.permute.xlu0 %1357  ;;  %v1284_v55 = vpop.permute.xlu1 %1283 }
 0x349   :  { %v1414_v40 = vsel %vm1404_vm7, %v1397_v13, %v1358_v39  ;;  %v1392_v53 = vsel %vm22_vm1, %v3804_v43, %v1284_v55 }
 0x34a   :  { %v1431_v33 = vsel %vm1421_vm8, %v1414_v40, %v3086_v23 }
 0x34b   :  { %1448 = vst.msk [vmem:[#allocation2 + $0x48] sm:$0xff] %vm24_vm2, %v1431_v33  ;;  %1614 = vrot.lane.b32.xlu1 %v1568_v17, %s2196_s10  ;;  %v3860_v17 = vld [vmem:[#allocation48_spill] sm:$0xff] }
 0x34c   :  { %v1282_v1 = vpop.permute.xlu0 %1281  ;;  %v1300_v62 = vpop.permute.xlu1 %1299 }
 0x34d   :  { %v1391_v20 = vsel %vm22_vm1, %v2924_v31, %v1282_v1  ;;  %v1400_v43 = vsel %vm22_vm1, %v3806_v22, %v1300_v62 }
 0x34f   :  { %1600 = vrot.lane.b32.xlu1 %v1561_v29, %s2196_s10 }
 0x350   :  { %v1298_v10 = vpop.permute.xlu0 %1297  ;;  %v1348_v12 = vpop.permute.xlu1 %1347 }
 0x351   :  { %v1409_v38 = vsel %vm1404_vm7, %v1392_v53, %v1348_v12  ;;  %v1399_v31 = vsel %vm22_vm1, %v2935_v32, %v1298_v10  ;;  %v3861_v53 = vld [vmem:[#allocation22_spill] sm:$0xff] }
 0x352   :  { %v1426_v23 = vsel %vm1421_vm8, %v1409_v38, %v3858_v59 }
 0x353   :  { %1443 = vst.msk [vmem:[#allocation2 + $0x20] sm:$0xff] %vm24_vm2, %v1426_v23  ;;  %1616 = vrot.lane.b32.xlu1 %v1569_v18, %s2196_s10 }
 0x354   :  { %v1346_v29 = vpop.permute.xlu0 %1345  ;;  %v1364_v15 = vpop.permute.xlu1 %1363 }
 0x355   :  { %v1408_v16 = vsel %vm1404_vm7, %v1391_v20, %v1346_v29  ;;  %v1417_v28 = vsel %vm1404_vm7, %v1400_v43, %v1364_v15  ;;  %v3862_v15 = vld [vmem:[#allocation52_spill] sm:$0xff] }
 0x356   :  { %v1425_v51 = vsel %vm1421_vm8, %v1408_v16, %v3859_v26  ;;  %v1434_v34 = vsel %vm1421_vm8, %v1417_v28, %v3116_v7  ;;  %v2154_v7 = vld [vmem:[%s3705_s2 + $0x40] sm:$0xff] }
 0x357   :  { %1442 = vst.msk [vmem:[#allocation2 + $0x18] sm:$0xff] %vm24_vm2, %v1425_v51  ;;  %1451 = vst.msk [vmem:[#allocation2 + $0x60] sm:$0xff] %vm24_vm2, %v1434_v34  ;;  %v1514_v56 = vsub.f32 %v3301_v42, %v2154_v7  ;;  %v2156_v28 = vld [vmem:[%s3705_s2] sm:$0xff] }
 0x358   :  { %v1362_v22 = vpop.permute.xlu0 %1361  ;;  %v1587_v41 = vpop.permute.xlu1 %1586 }
 0x359   :  { %v1416_v18 = vsel %vm1404_vm7, %v1399_v31, %v1362_v22  ;;  %v3864_v22 = vld [vmem:[#allocation54_spill] sm:$0xff] }
 0x35a   :  { %v1433_v47 = vsel %vm1421_vm8, %v1416_v18, %v3107_v46 }
 0x35b   :  { %1450 = vst.msk [vmem:[#allocation2 + $0x58] sm:$0xff] %vm24_vm2, %v1433_v47  ;;  %v2157_v47 = vld [vmem:[%s3705_s2 + $0x8] sm:$0xff] }
 0x35c   :  { %v1286_v37 = vpop.permute.xlu0 %1285  ;;  %v1603_v11 = vpop.permute.xlu1 %1602  ;;  %v1507_v7 = vsub.f32 %v3354_v45, %v2157_v47 }
 0x35d   :  { %v3535_v25 = vsel %vm22_vm1, %v1514_v56, %v1603_v11  ;;  %v1393_v13 = vsel %vm22_vm1, %v3805_v8, %v1286_v37  ;;  %v2155_v8 = vld [vmem:[%s3705_s2 + $0x48] sm:$0xff]  ;;  %v3865_v56 = vld [vmem:[#allocation57_spill] sm:$0xff] }
 0x35e   :  { %v1515_v12 = vsub.f32 %v3368_v6, %v2155_v8  ;;  %v3863_v6 = vld [vmem:[#allocation42_spill] sm:$0xff] }
 0x35f   :  { %v1506_v26 = vsub.f32 %v3863_v6, %v2156_v28  ;;  %v2160_v28 = vld [vmem:[%s3705_s2 + $0x20] sm:$0xff] }
 0x360   :  { %v1302_v32 = vpop.permute.xlu0 %1301  ;;  %v1288_v14 = vpop.permute.xlu1 %1287  ;;  %v1510_v6 = vsub.f32 %v3315_v60, %v2160_v28  ;;  %v3872_v60 = vld [vmem:[#allocation63_spill] sm:$0xff] }
 0x361   :  { %v1401_v42 = vsel %vm22_vm1, %v3809_v2, %v1302_v32  ;;  %v1394_v2 = vsel %vm22_vm1, %v3817_v19, %v1288_v14  ;;  %v1698_v19 = vsel %vm22_vm1, %v1506_v26, %v1587_v41  ;;  %v3866_v14 = vld [vmem:[#allocation29_spill] sm:$0xff] }
 0x362   :  { %v1714_v37 = vsel %vm1404_vm7, %v1698_v19, %v3865_v56 }
 0x363   :  { %v1730_v45 = vsel %vm1421_vm8, %v1714_v37, 0.0 }
 0x364   :  { %v1350_v39 = vpop.permute.xlu0 %1349  ;;  %v1304_v46 = vpop.permute.xlu1 %1303 }
 0x365   :  { %v1410_v55 = vsel %vm1404_vm7, %v1393_v13, %v1350_v39  ;;  %v3867_v39 = vld [vmem:[#allocation59_spill] sm:$0xff] }
 0x366   :  { %v1427_v40 = vsel %vm1421_vm8, %v1410_v55, %v3860_v17 }
 0x367   :  { %1444 = vst.msk [vmem:[#allocation2 + $0x28] sm:$0xff] %vm24_vm2, %v1427_v40 }
 0x368   :  { %v1366_v33 = vpop.permute.xlu0 %1365  ;;  %v1589_v1 = vpop.permute.xlu1 %1588 }
 0x369   :  { %v1418_v62 = vsel %vm1404_vm7, %v1401_v42, %v1366_v33  ;;  %v1699_v11 = vsel %vm22_vm1, %v1507_v7, %v1589_v1  ;;  %v3868_v33 = vld [vmem:[#allocation47_spill] sm:$0xff] }
 0x36a   :  { %v1435_v10 = vsel %vm1421_vm8, %v1418_v62, %v3861_v53  ;;  %v1715_v55 = vsel %vm1404_vm7, %v1699_v11, %v3867_v39  ;;  %v2158_v62 = vld [vmem:[%s3705_s2 + $0x10] sm:$0xff] }
 0x36b   :  { %1452 = vst.msk [vmem:[#allocation2 + $0x68] sm:$0xff] %vm24_vm2, %v1435_v10  ;;  %v1731_v17 = vsel %vm1421_vm8, %v1715_v55, 0.0  ;;  %v1508_v53 = vsub.f32 %v3236_v3, %v2158_v62  ;;  %v3870_v3 = vld [vmem:[#allocation61_spill] sm:$0xff]  ;;  %v2163_v55 = vld [vmem:[%s3705_s2 + $0x38] sm:$0xff] }
 0x36c   :  { %v1290_v38 = vpop.permute.xlu0 %1289  ;;  %v1605_v59 = vpop.permute.xlu1 %1604 }
 0x36d   :  { %v3554_v23 = vsel %vm22_vm1, %v1515_v12, %v1605_v59  ;;  %v1395_v51 = vsel %vm22_vm1, %v3819_v36, %v1290_v38  ;;  %v3869_v12 = vld [vmem:[#allocation60_spill] sm:$0xff] }
 0x36e   :  { %v2159_v59 = vld [vmem:[%s3705_s2 + $0x18] sm:$0xff] }
 0x370   :  { %v1306_v20 = vpop.permute.xlu0 %1305  ;;  %v1352_v43 = vpop.permute.xlu1 %1351 }
 0x371   :  { %v1411_v29 = vsel %vm1404_vm7, %v1394_v2, %v1352_v43  ;;  %v1403_v36 = vsel %vm22_vm1, %v3824_v52, %v1306_v20  ;;  %v1402_v52 = vsel %vm22_vm1, %v3821_v27, %v1304_v46  ;;  %v1509_v2 = vsub.f32 %v3249_v49, %v2159_v59  ;;  %v3871_v49 = vld [vmem:[#allocation62_spill] sm:$0xff] }
 0x372   :  { %v1428_v16 = vsel %vm1421_vm8, %v1411_v29, %v3862_v15 }
 0x373   :  { %1445 = vst.msk [vmem:[#allocation2 + $0x30] sm:$0xff] %vm24_vm2, %v1428_v16 }
 0x374   :  { %v1354_v34 = vpop.permute.xlu0 %1353 }
 0x375   :  { %v1412_v31 = vsel %vm1404_vm7, %v1395_v51, %v1354_v34 }
 0x376   :  { %v1429_v18 = vsel %vm1421_vm8, %v1412_v31, %v3864_v22  ;;  %v2161_v22 = vld [vmem:[%s3705_s2 + $0x28] sm:$0xff] }
 0x377   :  { %1446 = vst.msk [vmem:[#allocation2 + $0x38] sm:$0xff] %vm24_vm2, %v1429_v18  ;;  %v1511_v18 = vsub.f32 %v3328_v50, %v2161_v22  ;;  %v3873_v50 = vld [vmem:[#allocation64_spill] sm:$0xff] }
 0x378   :  { %v1370_v41 = vpop.permute.xlu0 %1369 }
 0x379   :  { %v1420_v32 = vsel %vm1404_vm7, %v1403_v36, %v1370_v41  ;;  %v2162_v41 = vld [vmem:[%s3705_s2 + $0x30] sm:$0xff] }
 0x37a   :  { %v1437_v13 = vsel %vm1421_vm8, %v1420_v32, %v3866_v14  ;;  %v1512_v11 = vsub.f32 %v3375_v48, %v2162_v41  ;;  %v3874_v48 = vld [vmem:[#allocation65_spill] sm:$0xff] }
 0x37b   :  { %1454 = vst.msk [vmem:[#allocation2 + $0x78] sm:$0xff] %vm24_vm2, %v1437_v13 }
 0x37c   :  { %1746 = vxpose.xlu1.b32.start [1/16] (narrow) %v1730_v45, 8 }
 0x380   :  { %1747 = vxpose.xlu1.b32.cont [2/16] (narrow) %v1731_v17, 8  ;;  %v1513_v17 = vsub.f32 %v3384_v35, %v2163_v55 }
 0x395   :  { %v1368_v40 = vpop.permute.xlu1 %1367 }
 0x396   :  { %v1419_v42 = vsel %vm1404_vm7, %v1402_v52, %v1368_v40 }
 0x397   :  { %v1436_v1 = vsel %vm1421_vm8, %v1419_v42, %v3868_v33 }
 0x398   :  { %1453 = vst.msk [vmem:[#allocation2 + $0x70] sm:$0xff] %vm24_vm2, %v1436_v1  ;;  %v3875_v1 = vld [vmem:[#allocation58_spill] sm:$0xff] }
 0x399   :  { %v1591_v10 = vpop.permute.xlu1 %1590  ;;  %v1722_v62 = vsel %vm1404_vm7, %v3535_v25, %v3875_v1  ;;  %v2165_v25 = vld [vmem:[%s3705_s2 + $0x58] sm:$0xff] }
 0x39a   :  { %v1700_v8 = vsel %vm22_vm1, %v1508_v53, %v1591_v10  ;;  %v2164_v53 = vld [vmem:[%s3705_s2 + $0x50] sm:$0xff]  ;;  %v1738_v35 = vsel %vm1421_vm8, %v1722_v62, 0.0 }
 0x39b   :  { %v1716_v27 = vsel %vm1404_vm7, %v1700_v8, %v3869_v12  ;;  %v1516_v10 = vsub.f32 %v3259_v30, %v2164_v53  ;;  %v1723_v8 = vsel %vm1404_vm7, %v3554_v23, %v3402_v61  ;;  %v2166_v61 = vld [vmem:[%s3705_s2 + $0x60] sm:$0xff] }
 0x39c   :  { %v1732_v46 = vsel %vm1421_vm8, %v1716_v27, 0.0  ;;  %v1517_v27 = vsub.f32 %v3273_v21, %v2165_v25  ;;  %v1518_v23 = vsub.f32 %v3333_v58, %v2166_v61 }
 0x39d   :  { %1748 = vxpose.xlu1.b32.cont [3/16] (narrow) %v1732_v46, 8  ;;  %v1607_v38 = vpop.permute.xlu1 %1606  ;;  %v1739_v46 = vsel %vm1421_vm8, %v1723_v8, 0.0 }
 0x39e   :  { %v1708_v12 = vsel %vm22_vm1, %v1516_v10, %v1607_v38 }
 0x39f   :  { %v1724_v30 = vsel %vm1404_vm7, %v1708_v12, %v3407_v4  ;;  %v2167_v4 = vld [vmem:[%s3705_s2 + $0x68] sm:$0xff] }
 0x3a0   :  { %v1740_v38 = vsel %vm1421_vm8, %v1724_v30, 0.0 }
 0x3a1   :  { %v1593_v20 = vpop.permute.xlu1 %1592 }
 0x3a2   :  { %v1701_v43 = vsel %vm22_vm1, %v1509_v2, %v1593_v20  ;;  %v1519_v20 = vsub.f32 %v3345_v44, %v2167_v4 }
 0x3a3   :  { %v1717_v29 = vsel %vm1404_vm7, %v1701_v43, %v3870_v3 }
 0x3a4   :  { %v1733_v15 = vsel %vm1421_vm8, %v1717_v29, 0.0 }
 0x3a5   :  { %1749 = vxpose.xlu1.b32.cont [4/16] (narrow) %v1733_v15, 8  ;;  %v1609_v16 = vpop.permute.xlu1 %1608 }
 0x3a6   :  { %v1709_v59 = vsel %vm22_vm1, %v1517_v27, %v1609_v16 }
 0x3a7   :  { %v1725_v2 = vsel %vm1404_vm7, %v1709_v59, %v3413_v5  ;;  %v2168_v5 = vld [vmem:[%s3705_s2 + $0x70] sm:$0xff] }
 0x3a8   :  { %v1741_v43 = vsel %vm1421_vm8, %v1725_v2, 0.0  ;;  %v1520_v29 = vsub.f32 %v3482_v63, %v2168_v5 }
 0x3a9   :  { %v1595_v26 = vpop.permute.xlu1 %1594 }
 0x3aa   :  { %v1702_v51 = vsel %vm22_vm1, %v1510_v6, %v1595_v26 }
 0x3ab   :  { %v1718_v34 = vsel %vm1404_vm7, %v1702_v51, %v3871_v49 }
 0x3ac   :  { %v1734_v19 = vsel %vm1421_vm8, %v1718_v34, 0.0 }
 0x3ad   :  { %1750 = vxpose.xlu1.b32.cont [5/16] (narrow) %v1734_v19, 8  ;;  %v1611_v31 = vpop.permute.xlu1 %1610 }
 0x3ae   :  { %v1710_v21 = vsel %vm22_vm1, %v1518_v23, %v1611_v31 }
 0x3af   :  { %v1726_v3 = vsel %vm1404_vm7, %v1710_v21, %v3419_v0  ;;  %v2169_v0 = vld [vmem:[%s3705_s2 + $0x78] sm:$0xff]  ;;  %s2198_s2 = smov [#allocation3]  }
 0x3b0   :  { %v1742_v15 = vsel %vm1421_vm8, %v1726_v3, 0.0  ;;  %v1521_v6 = vsub.f32 %v3395_v24, %v2169_v0  ;;  %s1785_s14 = sshll.u32 %s2198_s2, 4  ;;  %s1786_s14 = int_to_ptr.vmem [resolvable:$true] %s1785_s14 }
 0x3b1   :  { %v1597_v47 = vpop.permute.xlu1 %1596  ;;  %s2170_s15 = scalar_lea.vmem %s1786_s14, 128  ;;  %p2175_p1 = scmp.lt.s32.totalorder %s1786_s14, %s1786_s14 }
 0x3b2   :  { %v1703_v7 = vsel %vm22_vm1, %v1511_v18, %v1597_v47  ;;  %p2171_p0 = scmp.ne.s32.totalorder %s1786_s14, %s2170_s15  ;;  %p2176_p2 = scmp.lt.s32.totalorder %s2170_s15, %s2170_s15 }
 0x3b3   :  { %v1719_v56 = vsel %vm1404_vm7, %v1703_v7, %v3872_v60 }
 0x3b4   :  { %v1735_v37 = vsel %vm1421_vm8, %v1719_v56, 0.0  ;;  %p2177_p3 = por %p2176_p2, %p2175_p1 }
 0x3b5   :  { %1751 = vxpose.xlu1.b32.cont [6/16] (narrow) %v1735_v37, 8  ;;  %v1613_v36 = vpop.permute.xlu1 %1612 }
 0x3b6   :  { %v1711_v58 = vsel %vm22_vm1, %v1519_v20, %v1613_v36  ;;  %p2178_p4 = pnand %p2177_p3, %p2171_p0 }
 0x3b7   :  { %v1727_v16 = vsel %vm1404_vm7, %v1711_v58, %v3428_v9 }
 0x3b8   :  { %v1743_v26 = vsel %vm1421_vm8, %v1727_v16, 0.0 }
 0x3b9   :  { %v1599_v32 = vpop.permute.xlu1 %1598 }
 0x3ba   :  { %v1704_v14 = vsel %vm22_vm1, %v1512_v11, %v1599_v32 }
 0x3bb   :  { %v1720_v13 = vsel %vm1404_vm7, %v1704_v14, %v3873_v50 }
 0x3bc   :  { %v1736_v45 = vsel %vm1421_vm8, %v1720_v13, 0.0 }
 0x3bd   :  { %1752 = vxpose.xlu1.b32.cont [7/16] (narrow) %v1736_v45, 8  ;;  %v1615_v39 = vpop.permute.xlu1 %1614 }
 0x3be   :  { %v1712_v44 = vsel %vm22_vm1, %v1520_v29, %v1615_v39 }
 0x3bf   :  { %v1728_v63 = vsel %vm1404_vm7, %v1712_v44, %v3438_v57 }
 0x3c0   :  { %v1744_v9 = vsel %vm1421_vm8, %v1728_v63, 0.0 }
 0x3c1   :  { %v1601_v52 = vpop.permute.xlu1 %1600 }
 0x3c2   :  { %v1705_v40 = vsel %vm22_vm1, %v1513_v17, %v1601_v52 }
 0x3c3   :  { %v1721_v42 = vsel %vm1404_vm7, %v1705_v40, %v3874_v48 }
 0x3c4   :  { %v1737_v33 = vsel %vm1421_vm8, %v1721_v42, 0.0 }
 0x3c5   :  { %1753 = vxpose.xlu1.b32.cont [8/16] (narrow) %v1737_v33, 8  ;;  %v1617_v28 = vpop.permute.xlu1 %1616 }
 0x3c6   :  { %v1713_v51 = vsel %vm22_vm1, %v1521_v6, %v1617_v28 }
 0x3c7   :  { %v1729_v49 = vsel %vm1404_vm7, %v1713_v51, %v3445_v54 }
 0x3c8   :  { %v1745_v34 = vsel %vm1421_vm8, %v1729_v49, 0.0 }
 0x3c9   :  { %1754 = vxpose.xlu1.b32.cont [9/16] (narrow) %v1738_v35, 8 }
 0x3cd   :  { %1755 = vxpose.xlu1.b32.cont [10/16] (narrow) %v1739_v46, 8 }
 0x3d1   :  { %1756 = vxpose.xlu1.b32.cont [11/16] (narrow) %v1740_v38, 8 }
 0x3d5   :  { %1757 = vxpose.xlu1.b32.cont [12/16] (narrow) %v1741_v43, 8 }
 0x3d9   :  { %1758 = vxpose.xlu1.b32.cont [13/16] (narrow) %v1742_v15, 8 }
 0x3dd   :  { %1759 = vxpose.xlu1.b32.cont [14/16] (narrow) %v1743_v26, 8 }
 0x3e1   :  { %1760 = vxpose.xlu1.b32.cont [15/16] (narrow) %v1744_v9, 8 }
 0x3e5   :  { %1761 = vxpose.xlu1.b32.end [16/16] (narrow) %v1745_v34, 8 }
 0x425   :  { %v1762_v24 = vpop.trf.xlu1 }
 0x426   :  { %1778 = vst [vmem:[#allocation3] sm:$0xff] %v1762_v24 }
 0x427   :  { %2181 = shalt.err (!%p2178_p4)
}
 0x428   :  { %1788 = dma.vmem_to_hbm [thread:$0]  %s1786_s14, 128, %s3707_s4, [#allocation4]  }
 0x429   :  { %2190 = dma.done.wait [#allocation4], 128  }
 0x42a   :  { %2191 = vsyncadd [#allocation4], 4294967168 }
 0x42b   :  { %1792 = vsyncpa [#allocation4], 1 }

</bundles_post_ra>
